<compile_context>
chip_gen: v7x
topology: tpu7x:2x2x1
jax: 0.10.0
libtpu: 0.0.40
codegen_flags: <defaults>
</compile_context>

<pallas_src>
import math

import jax
import jax.numpy as jnp
from jax.experimental import pallas as pl
from jax.experimental.pallas import tpu as pltpu

DTYPE = jnp.float32
_VMEM_LIMIT_BYTES = 32 * 1024 * 1024   # safe on v5e/v6e/v7x (v7x scoped default is 32 MiB)
_VMEM_BUDGET_BYTES = 20 * 1024 * 1024  # target working set; headroom under the limit


def _mlp_kernel(x_ref, w1_ref, b1_ref, w2_ref, b2_ref, o_ref, acc_ref):
    """One (row-tile, hid-tile) step of y = gelu(x @ w1 + b1) @ w2 + b2.

    Grid axis 1 (hid) is a reduction: fc2 partial products accumulate into the f32 VMEM
    scratch `acc_ref`; the output block is written once on the last hid step.
    """
    k = pl.program_id(1)

    @pl.when(k == 0)
    def _():
        acc_ref[...] = jnp.zeros_like(acc_ref)

    # fc1 + GELU on this hid chunk.  bf16 MXU operands, f32 accumulation / elementwise.
    x = x_ref[...].astype(jnp.bfloat16)                                   # (tile, in_dim)
    h = jnp.dot(x, w1_ref[...], preferred_element_type=jnp.float32)       # (tile, tk) f32
    h = h + b1_ref[...]
    h = jax.nn.gelu(h, approximate=True)   # tanh GELU -> EUP (exact erf would burn VALU slots)

    # fc2 partial product for this hid chunk, accumulated in f32.
    acc_ref[...] += jnp.dot(h.astype(jnp.bfloat16), w2_ref[...],
                            preferred_element_type=jnp.float32)           # (tile, out) f32

    @pl.when(k == pl.num_programs(1) - 1)
    def _():
        o_ref[...] = (acc_ref[...] + b2_ref[...]).astype(o_ref.dtype)


def _spec(block_shape, index_map, *, single_buffer=False):
    """BlockSpec with optional single-buffering for constant-index operands."""
    if single_buffer and hasattr(pl, "Buffered"):
        try:
            return pl.BlockSpec(block_shape, index_map, pipeline_mode=pl.Buffered(1))
        except TypeError:  # older jax without pipeline_mode: fall back to default buffering
            pass
    return pl.BlockSpec(block_shape, index_map)


def _vmem_bytes(tile, tk, in_dim, out_dim, n_k):
    wbuf = 1 if n_k == 1 else 2            # weight chunks single-buffered when index is constant
    total = 2 * tile * in_dim * 4          # x tile (f32, double-buffered)
    total += 2 * tile * out_dim * 4        # out tile (f32, double-buffered)
    total += tile * out_dim * 4            # f32 accumulator scratch
    total += tile * tk * 4                 # hidden intermediate (vregs / VMEM)
    total += wbuf * in_dim * tk * 2        # w1 chunk (bf16)
    total += wbuf * tk * out_dim * 2       # w2 chunk (bf16)
    total += wbuf * tk * 4 + out_dim * 4   # biases (f32)
    return total


def _pick_hid_tile(hid):
    if hid % 128 != 0 or hid <= 512:
        return hid                          # full-extent block is always legal
    for cand in (512, 256, 128):
        if hid % cand == 0:
            return cand
    return hid


def _pick_row_tile(n_rows, in_dim, out_dim, tk, n_k):
    cands = [c for c in (1024, 512, 256, 128) if n_rows % c == 0] or [n_rows]
    fits = lambda c: _vmem_bytes(c, tk, in_dim, out_dim, n_k) <= _VMEM_BUDGET_BYTES
    for c in cands:                         # prefer >= 4 row steps (2 per TC on v7x megacore)
        if n_rows // c >= 4 and fits(c):
            return c
    for c in cands:                         # else >= 2 steps (keeps the pipeline alive)
        if n_rows // c >= 2 and fits(c):
            return c
    for c in reversed(cands):               # else smallest candidate that fits the budget
        if fits(c):
            return c
    return cands[-1]


def mlp_forward(x, w1, b1, w2, b2):
    """Fused Mlp forward.  x: (..., in_dim); w1: (in_dim, hid); w2: (hid, out_dim)."""
    *lead, in_dim = x.shape
    n_rows = math.prod(lead) if lead else 1
    hid = w1.shape[1]
    out_dim = w2.shape[1]
    assert w1.shape[0] == in_dim and w2.shape[0] == hid
    assert b1.shape == (hid,) and b2.shape == (out_dim,)

    x2d = x.reshape(n_rows, in_dim)

    # Pad rows up to a multiple of 128: lane/sublane-dense tiles and a healthy grid instead of
    # one huge grid=(1,) block for non-divisible row counts.
    n_pad = (-n_rows) % 128
    if n_pad:
        x2d = jnp.pad(x2d, ((0, n_pad), (0, 0)))
    n_rows_p = n_rows + n_pad

    tk = _pick_hid_tile(hid)
    n_k = hid // tk
    tile = _pick_row_tile(n_rows_p, in_dim, out_dim, tk, n_k)
    grid = (n_rows_p // tile, n_k)

    # MXU operands in bf16 (accumulation stays f32 in-kernel); biases stay f32.
    w1_bf = w1.astype(jnp.bfloat16)
    w2_bf = w2.astype(jnp.bfloat16)

    weights_const = n_k == 1    # hid not tiled -> weight block index never changes

    y2d = pl.pallas_call(
        _mlp_kernel,
        out_shape=jax.ShapeDtypeStruct((n_rows_p, out_dim), x.dtype),
        grid=grid,
        in_specs=[
            _spec((tile, in_dim), lambda i, k: (i, 0)),                              # x rows
            _spec((in_dim, tk), lambda i, k: (0, k), single_buffer=weights_const),   # fc1 w
            _spec((1, tk), lambda i, k: (0, k), single_buffer=weights_const),        # fc1 b
            _spec((tk, out_dim), lambda i, k: (k, 0), single_buffer=weights_const),  # fc2 w
            _spec((1, out_dim), lambda i, k: (0, 0), single_buffer=True),            # fc2 b
        ],
        out_specs=pl.BlockSpec((tile, out_dim), lambda i, k: (i, 0)),
        scratch_shapes=[pltpu.VMEM((tile, out_dim), jnp.float32)],
        compiler_params=pltpu.CompilerParams(
            dimension_semantics=("parallel", "arbitrary"),
            vmem_limit_bytes=_VMEM_LIMIT_BYTES,
        ),
    )(x2d, w1_bf, b1.reshape(1, hid), w2_bf, b2.reshape(1, out_dim))

    if n_pad:
        y2d = y2d[:n_rows]
    return y2d.reshape(*lead, out_dim)


def mlp_reference(x, w1, b1, w2, b2):
    """Plain-JAX f32 reference, exact-erf GELU (PyTorch nn.GELU default); dropout p=0 = identity."""
    h = jax.nn.gelu(jnp.dot(x, w1) + b1, approximate=False)
    return jnp.dot(h, w2) + b2


def init_params(key, in_dim, hid_dim, out_dim):
    k1, k2, k3, k4 = jax.random.split(key, 4)
    w1 = (jax.random.normal(k1, (in_dim, hid_dim), DTYPE) * (in_dim ** -0.5)).astype(DTYPE)
    b1 = (jax.random.normal(k2, (hid_dim,), DTYPE) * 0.01).astype(DTYPE)
    w2 = (jax.random.normal(k3, (hid_dim, out_dim), DTYPE) * (hid_dim ** -0.5)).astype(DTYPE)
    b2 = (jax.random.normal(k4, (out_dim,), DTYPE) * 0.01).astype(DTYPE)
    return w1, b1, w2, b2


if __name__ == "__main__":
    # Small lane-dense shapes consistent with the module; hid=1024 exercises the hid-reduction
    # grid axis (2 k-steps) and n_rows=1024 gives a 4-step parallel row grid (2 per TC on v7x).
    B, S, IN_DIM, HID_DIM, OUT_DIM = 2, 512, 128, 1024, 128

    root = jax.random.PRNGKey(0)
    k_x, k_p = jax.random.split(root)
    x = jax.random.normal(k_x, (B, S, IN_DIM), DTYPE)
    w1, b1, w2, b2 = init_params(k_p, IN_DIM, HID_DIM, OUT_DIM)

    fwd = jax.jit(mlp_forward)
    y = fwd(x, w1, b1, w2, b2)
    jax.block_until_ready(y)

    assert y.shape == (B, S, OUT_DIM), y.shape
    assert bool(jnp.all(jnp.isfinite(y)))

    # Compare against the exact-erf f32 reference; bf16 MXU operands + tanh GELU stay well
    # within this tolerance.
    y_ref = mlp_reference(x, w1, b1, w2, b2)
    assert bool(jnp.allclose(y, y_ref, rtol=3e-2, atol=3e-2)), \
        float(jnp.max(jnp.abs(y - y_ref)))

    print("KERNEL_OK")
</pallas_src>

<mosaic_0001>
module attributes {stable_mosaic.version = 11 : i64} {
  func.func @_mlp_kernel(%arg0: i32, %arg1: i32, %arg2: memref<256x128xf32, #tpu.memory_space<vmem>>, %arg3: memref<128x512xbf16, #tpu.memory_space<vmem>>, %arg4: memref<1x512xf32, #tpu.memory_space<vmem>>, %arg5: memref<512x128xbf16, #tpu.memory_space<vmem>>, %arg6: memref<1x128xf32, #tpu.memory_space<vmem>>, %arg7: memref<256x128xf32, #tpu.memory_space<vmem>>, %arg8: memref<256x128xf32, #tpu.memory_space<vmem>>) attributes {dimension_semantics = [#tpu.dimension_semantics<parallel>, #tpu.dimension_semantics<arbitrary>], iteration_bounds = array<i64: 4, 2>, scalar_prefetch = 0 : i64, scratch_operands = 1 : i64, tpu.core_type = #tpu.core_type<tc>, window_params = [{transform_indices = @transform_0, window_bounds = array<i64: 256, 128>}, {transform_indices = @transform_1, window_bounds = array<i64: 128, 512>}, {transform_indices = @transform_2, window_bounds = array<i64: 1, 512>}, {transform_indices = @transform_3, window_bounds = array<i64: 512, 128>}, {pipeline_mode = #tpu.pipeline_mode<synchronous>, transform_indices = @transform_4, window_bounds = array<i64: 1, 128>}, {transform_indices = @transform_5, window_bounds = array<i64: 256, 128>}]} {
    %c0_i32 = arith.constant 0 : i32
    %0 = arith.cmpi eq, %arg1, %c0_i32 : i32
    %1 = arith.extui %0 : i1 to i32
    %c0_i32_0 = arith.constant 0 : i32
    %2 = arith.cmpi ne, %1, %c0_i32_0 : i32
    scf.if %2 {
      %cst_18 = arith.constant 0.000000e+00 : f32
      %32 = vector.broadcast %cst_18 : f32 to vector<256x128xf32>
      %c0_19 = arith.constant 0 : index
      %c0_20 = arith.constant 0 : index
      %33 = vector.load %arg8[%c0_19, %c0_20] : memref<256x128xf32, #tpu.memory_space<vmem>>, vector<256x128xf32>
      tpu.vector_store %arg8[%c0_19, %c0_20], %32 {strides = array<i32>} : memref<256x128xf32, #tpu.memory_space<vmem>>, vector<256x128xf32>,
    } else {
    }
    %c0 = arith.constant 0 : index
    %c0_1 = arith.constant 0 : index
    %3 = vector.load %arg2[%c0, %c0_1] : memref<256x128xf32, #tpu.memory_space<vmem>>, vector<256x128xf32>
    %4 = arith.truncf %3 : vector<256x128xf32> to vector<256x128xbf16>
    %c0_2 = arith.constant 0 : index
    %c0_3 = arith.constant 0 : index
    %5 = vector.load %arg3[%c0_2, %c0_3] : memref<128x512xbf16, #tpu.memory_space<vmem>>, vector<128x512xbf16>
    %cst = arith.constant dense<0.000000e+00> : vector<256x512xf32>
    %6 = tpu.matmul %4, %5, %cst {dimension_numbers = #tpu.dot_dimension_numbers<[1], [0], [0], [1], [0, 0, 1, 1], [], []>} : vector<256x128xbf16>, vector<128x512xbf16>, vector<256x512xf32> -> vector<256x512xf32>
    %c0_4 = arith.constant 0 : index
    %c0_5 = arith.constant 0 : index
    %7 = vector.load %arg4[%c0_4, %c0_5] : memref<1x512xf32, #tpu.memory_space<vmem>>, vector<1x512xf32>
    %8 = vector.broadcast %7 : vector<1x512xf32> to vector<256x512xf32>
    %9 = arith.addf %6, %8 : vector<256x512xf32>
    %10 = arith.mulf %9, %9 : vector<256x512xf32>
    %11 = arith.mulf %9, %10 : vector<256x512xf32>
    %cst_6 = arith.constant 4.471500e-02 : f32
    %12 = vector.broadcast %cst_6 : f32 to vector<256x512xf32>
    %13 = arith.mulf %12, %11 : vector<256x512xf32>
    %14 = arith.addf %9, %13 : vector<256x512xf32>
    %cst_7 = arith.constant 0.797884583 : f32
    %15 = vector.broadcast %cst_7 : f32 to vector<256x512xf32>
    %16 = arith.mulf %15, %14 : vector<256x512xf32>
    %17 = math.tanh %16 : vector<256x512xf32>
    %cst_8 = arith.constant 1.000000e+00 : f32
    %18 = vector.broadcast %cst_8 : f32 to vector<256x512xf32>
    %19 = arith.addf %18, %17 : vector<256x512xf32>
    %cst_9 = arith.constant 5.000000e-01 : f32
    %20 = vector.broadcast %cst_9 : f32 to vector<256x512xf32>
    %21 = arith.mulf %20, %19 : vector<256x512xf32>
    %22 = arith.mulf %9, %21 : vector<256x512xf32>
    %c0_10 = arith.constant 0 : index
    %c0_11 = arith.constant 0 : index
    %23 = vector.load %arg8[%c0_10, %c0_11] : memref<256x128xf32, #tpu.memory_space<vmem>>, vector<256x128xf32>
    %24 = arith.truncf %22 : vector<256x512xf32> to vector<256x512xbf16>
    %c0_12 = arith.constant 0 : index
    %c0_13 = arith.constant 0 : index
    %25 = vector.load %arg5[%c0_12, %c0_13] : memref<512x128xbf16, #tpu.memory_space<vmem>>, vector<512x128xbf16>
    %cst_14 = arith.constant dense<0.000000e+00> : vector<256x128xf32>
    %26 = tpu.matmul %24, %25, %cst_14 {dimension_numbers = #tpu.dot_dimension_numbers<[1], [0], [0], [1], [0, 0, 1, 1], [], []>} : vector<256x512xbf16>, vector<512x128xbf16>, vector<256x128xf32> -> vector<256x128xf32>
    %27 = arith.addf %23, %26 : vector<256x128xf32>
    %c0_15 = arith.constant 0 : index
    %c0_16 = arith.constant 0 : index
    %28 = vector.load %arg8[%c0_15, %c0_16] : memref<256x128xf32, #tpu.memory_space<vmem>>, vector<256x128xf32>
    tpu.vector_store %arg8[%c0_15, %c0_16], %27 {strides = array<i32>} : memref<256x128xf32, #tpu.memory_space<vmem>>, vector<256x128xf32>,
    %c1_i32 = arith.constant 1 : i32
    %29 = arith.cmpi eq, %arg1, %c1_i32 : i32
    %30 = arith.extui %29 : i1 to i32
    %c0_i32_17 = arith.constant 0 : i32
    %31 = arith.cmpi ne, %30, %c0_i32_17 : i32
    scf.if %31 {
      %c0_18 = arith.constant 0 : index
      %c0_19 = arith.constant 0 : index
      %32 = vector.load %arg8[%c0_18, %c0_19] : memref<256x128xf32, #tpu.memory_space<vmem>>, vector<256x128xf32>
      %c0_20 = arith.constant 0 : index
      %c0_21 = arith.constant 0 : index
      %33 = vector.load %arg6[%c0_20, %c0_21] : memref<1x128xf32, #tpu.memory_space<vmem>>, vector<1x128xf32>
      %34 = vector.broadcast %33 : vector<1x128xf32> to vector<256x128xf32>
      %35 = arith.addf %32, %34 : vector<256x128xf32>
      %c0_22 = arith.constant 0 : index
      %c0_23 = arith.constant 0 : index
      %36 = vector.load %arg7[%c0_22, %c0_23] : memref<256x128xf32, #tpu.memory_space<vmem>>, vector<256x128xf32>
      tpu.vector_store %arg7[%c0_22, %c0_23], %35 {strides = array<i32>} : memref<256x128xf32, #tpu.memory_space<vmem>>, vector<256x128xf32>,
    } else {
    }
    return
  }
  func.func @transform_0(%arg0: i32, %arg1: i32) -> (i32, i32) {
    %c0_i32 = arith.constant 0 : i32
    %c0_i32_0 = arith.constant 0 : i32
    return %arg0, %c0_i32 : i32, i32
  }
  func.func @transform_1(%arg0: i32, %arg1: i32) -> (i32, i32) {
    %c0_i32 = arith.constant 0 : i32
    %c0_i32_0 = arith.constant 0 : i32
    return %c0_i32, %arg1 : i32, i32
  }
  func.func @transform_2(%arg0: i32, %arg1: i32) -> (i32, i32) {
    %c0_i32 = arith.constant 0 : i32
    %c0_i32_0 = arith.constant 0 : i32
    return %c0_i32, %arg1 : i32, i32
  }
  func.func @transform_3(%arg0: i32, %arg1: i32) -> (i32, i32) {
    %c0_i32 = arith.constant 0 : i32
    %c0_i32_0 = arith.constant 0 : i32
    return %arg1, %c0_i32 : i32, i32
  }
  func.func @transform_4(%arg0: i32, %arg1: i32) -> (i32, i32) {
    %c0_i32 = arith.constant 0 : i32
    %c0_i32_0 = arith.constant 0 : i32
    %c0_i32_1 = arith.constant 0 : i32
    return %c0_i32, %c0_i32_0 : i32, i32
  }
  func.func @transform_5(%arg0: i32, %arg1: i32) -> (i32, i32) {
    %c0_i32 = arith.constant 0 : i32
    %c0_i32_0 = arith.constant 0 : i32
    return %arg0, %c0_i32 : i32, i32
  }
}

</mosaic_0001>

<bundles_post_ra>
// kernel: mlp_forward.1
= control target key start
LH: loop header
LB: loop body
LE: loop exit
PB: predicated region body
PF: predicated region fallthrough
CT: control target
= control target key end

     0   :  { %s6351_s0 = inlined_call_operand.vmem [shape: f32[1024,128], index: 0, kind: input, shape index: {}]   ;;  %s6352_s1 = inlined_call_operand.vmem [shape: bf16[128,1024], index: 1, kind: input, shape index: {}]   ;;  %s6353_s2 = inlined_call_operand.vmem [shape: f32[1,1024], index: 2, kind: input, shape index: {}]   ;;  %s6354_s3 = inlined_call_operand.vmem [shape: bf16[1024,128], index: 3, kind: input, shape index: {}]   ;;  %s6355_s4 = inlined_call_operand.vmem [shape: f32[1,128], index: 4, kind: input, shape index: {}]   ;;  %s6356_s5 = inlined_call_operand.hbm [shape: f32[1024,128], index: 5, kind: output, shape index: {}]  }
   0x1   :  { %6451 = sst [smem:[#allocation99_spill]] %s6352_s1 }
   0x2   :  { %10 = vsyncpa [#allocation5], 0 }
   0x3   :  { %12 = vsyncpa [#allocation5 + $0x1], 0  ;;  %s4077_s18 = smov 0   ;;  %s4079_s19 = smov 0  }
   0x4   :  { %s4081_s20 = smov 0   ;;  %s4083_s21 = smov 0  }
   0x5   :  { %s4085_s22 = smov 0   ;;  %s4087_s23 = smov 0  }
   0x6   :  { %s4089_s24 = smov 0   ;;  %s4091_s25 = smov 0  }
   0x7   :  { %s4093_s26 = smov 0   ;;  %s4095_s27 = smov 0  }
   0x8 LB: > { %6452 = sst [smem:[#allocation7_spill]] %s4020_s22  ;;  %s3190_s28 = sadd.s32 4294967295, %s4040_s27   ;;  %s4040_s27 = sphi %s4095_s27, %s18_s27   ;;  %s4036_s26 = sphi %s4093_s26, %s6858_s26   ;;  %s4032_s25 = sphi %s4091_s25, %s6857_s25   ;;  %s4028_s24 = sphi %s4089_s24, %s6856_s24   ;;  %s4024_s23 = sphi %s4087_s23, %s6855_s23   ;;  %s4020_s22 = sphi %s4085_s22, %s6854_s22   ;;  %s4016_s21 = sphi %s4083_s21, %s6853_s21   ;;  %s4012_s20 = sphi %s4081_s20, %s6861_s20   ;;  %s4008_s19 = sphi %s4079_s19, %s6860_s19   ;;  %s4004_s18 = sphi %s4077_s18, %s6859_s18  }
   0x9   : > { %6453 = sst [smem:[#allocation8_spill]] %s4032_s25  ;;  %s3191_s29 = sadd.s32 4294967294, %s4040_s27  }
   0xa   : > { %6454 = sst [smem:[#allocation9_spill]] %s4036_s26  ;;  %s27_s30 = sadd.s32 1, %s4032_s25 }
   0xb   : > { %s30_s6 = sadd.s32 1, %s4036_s26  ;;  %p28_p0 = scmp.ge.s32.totalorder %s27_s30, 2 }
   0xc   : > { %s63_s7 = sadd.s32 1, %s4020_s22  ;;  %p70_p1 = scmp.ne.s32.totalorder %s4020_s22, %s4016_s21 }
   0xd   : > { %p71_p2 = scmp.eq.s32.totalorder %s4040_s27, 0  ;;  %s6863_s30 = smov (%p28_p0, %s27_s30), 0 }
   0xe   : > { %6455 = sst [smem:[#allocation10_spill]] %s6863_s30  ;;  %s6865_s6 = smov (!%p28_p0, %s30_s6), %s4036_s26 }
   0xf   : > { %s60_s8 = ssub.s32 %s4032_s25, %s6863_s30  ;;  %p4140_p3 = por %p71_p2, %p70_p1 }
  0x10   : > { %p32_p4 = scmp.ge.s32.totalorder %s6865_s6, 4  ;;  %p61_p5 = scmp.eq.s32.totalorder %s60_s8, 0 }
  0x11   : > { %s162_s10 = sadd.s32 1, %s4012_s20  ;;  %p172_p6 = scmp.ne.s32.totalorder %s4012_s20, %s4008_s19 }
  0x12   : > { %s6867_s6 = smov (%p32_p4, %s6865_s6), 0  ;;  %p173_p7 = scmp.eq.s32.totalorder %s3190_s28, 7 }
  0x13   : > { %6457 = sst [smem:[#allocation11_spill]] %s6867_s6  ;;  %s159_s12 = ssub.s32 %s4036_s26, %s6867_s6 }
  0x14   : > { %s4150_s11 = scalar_select %p61_p5, %s4020_s22, %s63_s7  }
  0x15   : > { %p160_p8 = scmp.eq.s32.totalorder %s159_s12, 0  ;;  %p178_p9 = scmp.ne.s32.totalorder %s4008_s19, %s4004_s18 }
  0x16   : > { %6458 = sst [smem:[#allocation12_spill]] %s4150_s11  ;;  %p4156_p10 = por %p173_p7, %p172_p6 }
  0x17   : > { %p179_p11 = scmp.eq.s32.totalorder %s3191_s29, 7  ;;  %p3193_p13 = scmp.ge.s32.totalorder %s4040_s27, 8 }
  0x18   : > { %s4161_s14 = scalar_select %p160_p8, %s4012_s20, %s162_s10  }
  0x19   : > { %p4163_p12 = por %p179_p11, %p178_p9  ;;  %198 = sbr.rel (%p3193_p13) target bundleno = 58 (0x3a), region = 20 }
  0x20   : > { %210 = sbr.rel (!%p4140_p3) target bundleno = 58 (0x3a), region = 28  ;;  %s212_s16 = sand.u32 (%p4140_p3), 1, %s4020_s22  }
  0x21   : > { %s3277_s17 = sshll.u32 (%p4140_p3), %s4032_s25, 4  ;;  %s3194_s28 = sshll.u32 (%p4140_p3), %s212_s16, 8 }
  0x22   : > { %s6461_s1 = sld [smem:[#allocation99_spill]] (%p4140_p3)  ;;  %s4180_s9 = scalar_lea.vmem (%p4140_p3), [#allocation3], %s3194_s28 }
  0x28   : > { %s4175_s29 = scalar_lea.vmem %s6461_s1, %s3277_s17 }
  0x29   : > { %v230_v0 = vld [vmem:[%s4175_s29] sm:$0xff]  ;;  %v232_v1 = vld [vmem:[%s4175_s29 + $0x8] sm:$0xff] }
  0x2a   : > { %v234_v2 = vld [vmem:[%s4175_s29 + $0x20] sm:$0xff]  ;;  %231 = vst [vmem:[%s4180_s9] sm:$0xff] %v230_v0  ;;  %233 = vst [vmem:[%s4180_s9 + $0x8] sm:$0xff] %v232_v1  ;;  %v236_v3 = vld [vmem:[%s4175_s29 + $0x28] sm:$0xff] }
  0x2b   : > { %235 = vst [vmem:[%s4180_s9 + $0x10] sm:$0xff] %v234_v2  ;;  %v238_v4 = vld [vmem:[%s4175_s29 + $0x40] sm:$0xff]  ;;  %v240_v5 = vld [vmem:[%s4175_s29 + $0x48] sm:$0xff]  ;;  %237 = vst [vmem:[%s4180_s9 + $0x18] sm:$0xff] %v236_v3 }
  0x2c   : > { %239 = vst [vmem:[%s4180_s9 + $0x20] sm:$0xff] %v238_v4  ;;  %241 = vst [vmem:[%s4180_s9 + $0x28] sm:$0xff] %v240_v5  ;;  %v242_v6 = vld [vmem:[%s4175_s29 + $0x60] sm:$0xff]  ;;  %v244_v7 = vld [vmem:[%s4175_s29 + $0x68] sm:$0xff] }
  0x2d   : > { %v246_v8 = vld [vmem:[%s4175_s29 + $0x80] sm:$0xff]  ;;  %243 = vst [vmem:[%s4180_s9 + $0x30] sm:$0xff] %v242_v6  ;;  %245 = vst [vmem:[%s4180_s9 + $0x38] sm:$0xff] %v244_v7  ;;  %v248_v9 = vld [vmem:[%s4175_s29 + $0x88] sm:$0xff] }
  0x2e   : > { %247 = vst [vmem:[%s4180_s9 + $0x40] sm:$0xff] %v246_v8  ;;  %v250_v10 = vld [vmem:[%s4175_s29 + $0xa0] sm:$0xff]  ;;  %v252_v11 = vld [vmem:[%s4175_s29 + $0xa8] sm:$0xff]  ;;  %249 = vst [vmem:[%s4180_s9 + $0x48] sm:$0xff] %v248_v9 }
  0x2f   : > { %251 = vst [vmem:[%s4180_s9 + $0x50] sm:$0xff] %v250_v10  ;;  %253 = vst [vmem:[%s4180_s9 + $0x58] sm:$0xff] %v252_v11  ;;  %v254_v12 = vld [vmem:[%s4175_s29 + $0xc0] sm:$0xff]  ;;  %v256_v13 = vld [vmem:[%s4175_s29 + $0xc8] sm:$0xff] }
  0x30   : > { %v258_v14 = vld [vmem:[%s4175_s29 + $0xe0] sm:$0xff]  ;;  %255 = vst [vmem:[%s4180_s9 + $0x60] sm:$0xff] %v254_v12  ;;  %257 = vst [vmem:[%s4180_s9 + $0x68] sm:$0xff] %v256_v13  ;;  %v260_v15 = vld [vmem:[%s4175_s29 + $0xe8] sm:$0xff] }
  0x31   : > { %259 = vst [vmem:[%s4180_s9 + $0x70] sm:$0xff] %v258_v14  ;;  %v262_v16 = vld [vmem:[%s4175_s29 + $0x100] sm:$0xff]  ;;  %v264_v17 = vld [vmem:[%s4175_s29 + $0x108] sm:$0xff]  ;;  %261 = vst [vmem:[%s4180_s9 + $0x78] sm:$0xff] %v260_v15 }
  0x32   : > { %263 = vst [vmem:[%s4180_s9 + $0x80] sm:$0xff] %v262_v16  ;;  %265 = vst [vmem:[%s4180_s9 + $0x88] sm:$0xff] %v264_v17  ;;  %v266_v18 = vld [vmem:[%s4175_s29 + $0x120] sm:$0xff]  ;;  %v268_v19 = vld [vmem:[%s4175_s29 + $0x128] sm:$0xff] }
  0x33   : > { %v270_v20 = vld [vmem:[%s4175_s29 + $0x140] sm:$0xff]  ;;  %267 = vst [vmem:[%s4180_s9 + $0x90] sm:$0xff] %v266_v18  ;;  %269 = vst [vmem:[%s4180_s9 + $0x98] sm:$0xff] %v268_v19  ;;  %v272_v21 = vld [vmem:[%s4175_s29 + $0x148] sm:$0xff] }
  0x34   : > { %271 = vst [vmem:[%s4180_s9 + $0xa0] sm:$0xff] %v270_v20  ;;  %v274_v22 = vld [vmem:[%s4175_s29 + $0x160] sm:$0xff]  ;;  %v276_v23 = vld [vmem:[%s4175_s29 + $0x168] sm:$0xff]  ;;  %273 = vst [vmem:[%s4180_s9 + $0xa8] sm:$0xff] %v272_v21 }
  0x35   : > { %275 = vst [vmem:[%s4180_s9 + $0xb0] sm:$0xff] %v274_v22  ;;  %277 = vst [vmem:[%s4180_s9 + $0xb8] sm:$0xff] %v276_v23  ;;  %v278_v24 = vld [vmem:[%s4175_s29 + $0x180] sm:$0xff]  ;;  %v280_v25 = vld [vmem:[%s4175_s29 + $0x188] sm:$0xff] }
  0x36   : > { %v282_v26 = vld [vmem:[%s4175_s29 + $0x1a0] sm:$0xff]  ;;  %279 = vst [vmem:[%s4180_s9 + $0xc0] sm:$0xff] %v278_v24  ;;  %281 = vst [vmem:[%s4180_s9 + $0xc8] sm:$0xff] %v280_v25  ;;  %v284_v27 = vld [vmem:[%s4175_s29 + $0x1a8] sm:$0xff] }
  0x37   : > { %283 = vst [vmem:[%s4180_s9 + $0xd0] sm:$0xff] %v282_v26  ;;  %v286_v28 = vld [vmem:[%s4175_s29 + $0x1c0] sm:$0xff]  ;;  %v288_v29 = vld [vmem:[%s4175_s29 + $0x1c8] sm:$0xff]  ;;  %285 = vst [vmem:[%s4180_s9 + $0xd8] sm:$0xff] %v284_v27 }
  0x38   : > { %287 = vst [vmem:[%s4180_s9 + $0xe0] sm:$0xff] %v286_v28  ;;  %289 = vst [vmem:[%s4180_s9 + $0xe8] sm:$0xff] %v288_v29  ;;  %v290_v30 = vld [vmem:[%s4175_s29 + $0x1e0] sm:$0xff]  ;;  %v292_v31 = vld [vmem:[%s4175_s29 + $0x1e8] sm:$0xff] }
  0x39   : > { %291 = vst [vmem:[%s4180_s9 + $0xf0] sm:$0xff] %v290_v30  ;;  %293 = vst [vmem:[%s4180_s9 + $0xf8] sm:$0xff] %v292_v31 }
  0x3a PF: > { %p3197_p0 = scmp.ge.s32.totalorder %s4040_s27, 1  ;;  %p315_p1 = scmp.lt.s32.totalorder %s4040_s27, 9 }
  0x3c   : > { %p316_p2 = pnand %p3197_p0, %p315_p1 }
  0x3e   : > { %319 = sbr.rel (%p316_p2) target bundleno = 954 (0x3ba), region = 59 }
  0x45   : > { %s322_s10 = sand.u32 1, %s4016_s21   ;;  %s6358_s12 = sand.u32 1, %s4008_s19  }
  0x46   : > { %s3198_s16 = sshll.u32 %s322_s10, 8  ;;  %s3199_s17 = sshll.u32 %s6358_s12, 8 }
  0x47   : > { %s3200_s28 = sshll.u32 %s4028_s24, 5  ;;  %s3202_s7 = sshll.u32 %s4024_s23, 2 }
  0x48   : > { %p364_p3 = scmp.lt.s32.totalorder %s3200_s28, 127  ;;  %p371_p4 = scmp.lt.s32.totalorder %s3202_s7, 7 }
  0x49   : > { %s3203_s8 = sshll.u32 %s4024_s23, 6  ;;  %s4268_s22 = scalar_lea.vmem [#allocation3], %s3198_s16 }
  0x4a   : > { %s6869_s28 = smov (!%p364_p3, %s3200_s28), 127  ;;  %s6871_s7 = smov (!%p371_p4, %s3202_s7), 7 }
  0x4b   : > { %s3201_s29 = sshll.u32 %s6869_s28, 3  ;;  %p376_p5 = scmp.lt.s32.totalorder %s3203_s8, 127 }
  0x4c   : > { %s4257_s6 = scalar_lea.vmem %s6351_s0, %s3201_s29  ;;  %s373_s12 = scalar_lea.vmem %s6353_s2, %s6871_s7 }
  0x4d   : > { %s6873_s8 = smov (!%p376_p5, %s3203_s8), 127  ;;  %s4270_s28 = scalar_lea.vmem [#allocation4], %s3199_s17 }
  0x4e   : > { %s3204_s30 = sshll.u32 %s6873_s8, 2  ;;  %p3205_p6 = scmp.ne.s32.totalorder %s4024_s23, 0 }
  0x4f   : > { %s4266_s11 = scalar_lea.vmem %s6354_s3, %s3204_s30  ;;  %v4042_v32 = vmov (!%p3205_p6), 0.0  }
  0x50   : > { %386 = sbr.rel (%p3205_p6) target bundleno = 96 (0x60), region = 67  ;;  %387 = vst [vmem:[#allocation2] sm:$0xff] (!%p3205_p6), %v4042_v32  ;;  %388 = vst [vmem:[#allocation2 + $0x8] sm:$0xff] (!%p3205_p6), %v4042_v32 }
  0x51   : > { %389 = vst [vmem:[#allocation2 + $0x10] sm:$0xff] (!%p3205_p6), %v4042_v32  ;;  %390 = vst [vmem:[#allocation2 + $0x18] sm:$0xff] (!%p3205_p6), %v4042_v32 }
  0x52   : > { %391 = vst [vmem:[#allocation2 + $0x20] sm:$0xff] (!%p3205_p6), %v4042_v32  ;;  %392 = vst [vmem:[#allocation2 + $0x28] sm:$0xff] (!%p3205_p6), %v4042_v32 }
  0x53   : > { %393 = vst [vmem:[#allocation2 + $0x30] sm:$0xff] (!%p3205_p6), %v4042_v32  ;;  %394 = vst [vmem:[#allocation2 + $0x38] sm:$0xff] (!%p3205_p6), %v4042_v32 }
  0x54   : > { %395 = vst [vmem:[#allocation2 + $0x40] sm:$0xff] (!%p3205_p6), %v4042_v32  ;;  %396 = vst [vmem:[#allocation2 + $0x48] sm:$0xff] (!%p3205_p6), %v4042_v32 }
  0x55   : > { %397 = vst [vmem:[#allocation2 + $0x50] sm:$0xff] (!%p3205_p6), %v4042_v32  ;;  %398 = vst [vmem:[#allocation2 + $0x58] sm:$0xff] (!%p3205_p6), %v4042_v32 }
  0x56   : > { %399 = vst [vmem:[#allocation2 + $0x60] sm:$0xff] (!%p3205_p6), %v4042_v32  ;;  %400 = vst [vmem:[#allocation2 + $0x68] sm:$0xff] (!%p3205_p6), %v4042_v32 }
  0x57   : > { %401 = vst [vmem:[#allocation2 + $0x70] sm:$0xff] %v4042_v32  ;;  %402 = vst [vmem:[#allocation2 + $0x78] sm:$0xff] %v4042_v32 }
  0x58   : > { %403 = vst [vmem:[#allocation2 + $0x80] sm:$0xff] %v4042_v32  ;;  %404 = vst [vmem:[#allocation2 + $0x88] sm:$0xff] %v4042_v32 }
  0x59   : > { %405 = vst [vmem:[#allocation2 + $0x90] sm:$0xff] %v4042_v32  ;;  %406 = vst [vmem:[#allocation2 + $0x98] sm:$0xff] %v4042_v32 }
  0x5a   : > { %407 = vst [vmem:[#allocation2 + $0xa0] sm:$0xff] %v4042_v32  ;;  %408 = vst [vmem:[#allocation2 + $0xa8] sm:$0xff] %v4042_v32 }
  0x5b   : > { %409 = vst [vmem:[#allocation2 + $0xb0] sm:$0xff] %v4042_v32  ;;  %410 = vst [vmem:[#allocation2 + $0xb8] sm:$0xff] %v4042_v32 }
  0x5c   : > { %411 = vst [vmem:[#allocation2 + $0xc0] sm:$0xff] %v4042_v32  ;;  %412 = vst [vmem:[#allocation2 + $0xc8] sm:$0xff] %v4042_v32 }
  0x5d   : > { %413 = vst [vmem:[#allocation2 + $0xd0] sm:$0xff] %v4042_v32  ;;  %414 = vst [vmem:[#allocation2 + $0xd8] sm:$0xff] %v4042_v32 }
  0x5e   : > { %415 = vst [vmem:[#allocation2 + $0xe0] sm:$0xff] %v4042_v32  ;;  %416 = vst [vmem:[#allocation2 + $0xe8] sm:$0xff] %v4042_v32 }
  0x5f   : > { %417 = vst [vmem:[#allocation2 + $0xf0] sm:$0xff] %v4042_v32  ;;  %418 = vst [vmem:[#allocation2 + $0xf8] sm:$0xff] %v4042_v32 }
  0x60 PF: > { %v3594_v33 = vld [vmem:[%s4268_s22 + $0x4] ss:$16 sps:$4 sm:$0xff]   ;;  %v3596_v34 = vld [vmem:[%s4268_s22 + $0xc] ss:$16 sps:$4 sm:$0xff]   ;;  %v4043_v35 = vmov 0   ;;  %p3270_p7 = scmp.ne.s32.totalorder %s4024_s23, 1 }
  0x61   : > { %713 = vmatprep.mubr.bf16.mxu0 %v4043_v35  ;;  %906 = vmatprep.mubr.bf16.mxu1 %v4043_v35  ;;  %v3598_v36 = vld [vmem:[%s4268_s22] ss:$16 sps:$4 sm:$0xff]   ;;  %v3599_v37 = vld [vmem:[%s4268_s22 + $0x8] ss:$16 sps:$4 sm:$0xff]   ;;  %v3600_v38 = vld [vmem:[%s4268_s22 + $0x24] ss:$16 sps:$4 sm:$0xff]  }
  0x62   : > { %681 = vmatprep.subr.bf16.mxu0 %v3594_v33  ;;  %874 = vmatprep.subr.bf16.mxu1 %v3596_v34  ;;  %v3602_v39 = vld [vmem:[%s4268_s22 + $0x2c] ss:$16 sps:$4 sm:$0xff]   ;;  %v3604_v40 = vld [vmem:[%s4268_s22 + $0x20] ss:$16 sps:$4 sm:$0xff]   ;;  %v3605_v41 = vld [vmem:[%s4268_s22 + $0x28] ss:$16 sps:$4 sm:$0xff]  }
  0x63   : > { %682 = vmatpush1.bf16.msra.mxu0 %v3598_v36  ;;  %875 = vmatpush1.bf16.msra.mxu1 %v3599_v37  ;;  %v3606_v42 = vld [vmem:[%s4268_s22 + $0x44] ss:$16 sps:$4 sm:$0xff]   ;;  %v3608_v43 = vld [vmem:[%s4268_s22 + $0x4c] ss:$16 sps:$4 sm:$0xff]   ;;  %v3610_v44 = vld [vmem:[%s4268_s22 + $0x40] ss:$16 sps:$4 sm:$0xff]  }
  0x64   : > { %683 = vmatprep.subr.bf16.mxu0 %v3600_v38  ;;  %876 = vmatprep.subr.bf16.mxu1 %v3602_v39  ;;  %v3611_v45 = vld [vmem:[%s4268_s22 + $0x48] ss:$16 sps:$4 sm:$0xff]   ;;  %v3612_v46 = vld [vmem:[%s4268_s22 + $0x64] ss:$16 sps:$4 sm:$0xff]   ;;  %v3614_v47 = vld [vmem:[%s4268_s22 + $0x6c] ss:$16 sps:$4 sm:$0xff]  }
  0x65   : > { %v3616_v48 = vld [vmem:[%s4268_s22 + $0x60] ss:$16 sps:$4 sm:$0xff]   ;;  %v3617_v49 = vld [vmem:[%s4268_s22 + $0x68] ss:$16 sps:$4 sm:$0xff]   ;;  %v3618_v50 = vld [vmem:[%s4268_s22 + $0x84] ss:$16 sps:$4 sm:$0xff]  }
  0x66   : > { %v3620_v51 = vld [vmem:[%s4268_s22 + $0x8c] ss:$16 sps:$4 sm:$0xff]   ;;  %v3622_v52 = vld [vmem:[%s4268_s22 + $0x80] ss:$16 sps:$4 sm:$0xff]   ;;  %v3623_v53 = vld [vmem:[%s4268_s22 + $0x88] ss:$16 sps:$4 sm:$0xff]  }
  0x67   : > { %684 = vmatpush1.bf16.msra.mxu0 %v3604_v40  ;;  %877 = vmatpush1.bf16.msra.mxu1 %v3605_v41  ;;  %v3624_v54 = vld [vmem:[%s4268_s22 + $0xa4] ss:$16 sps:$4 sm:$0xff]   ;;  %v3626_v55 = vld [vmem:[%s4268_s22 + $0xac] ss:$16 sps:$4 sm:$0xff]   ;;  %v3628_v56 = vld [vmem:[%s4268_s22 + $0xa0] ss:$16 sps:$4 sm:$0xff]  }
  0x68   : > { %685 = vmatprep.subr.bf16.mxu0 %v3606_v42  ;;  %878 = vmatprep.subr.bf16.mxu1 %v3608_v43  ;;  %v3629_v57 = vld [vmem:[%s4268_s22 + $0xa8] ss:$16 sps:$4 sm:$0xff]   ;;  %v3630_v58 = vld [vmem:[%s4268_s22 + $0xc4] ss:$16 sps:$4 sm:$0xff]   ;;  %v3632_v59 = vld [vmem:[%s4268_s22 + $0xcc] ss:$16 sps:$4 sm:$0xff]  }
  0x69   : > { %v3634_v60 = vld [vmem:[%s4268_s22 + $0xc0] ss:$16 sps:$4 sm:$0xff]   ;;  %v3635_v61 = vld [vmem:[%s4268_s22 + $0xc8] ss:$16 sps:$4 sm:$0xff]   ;;  %v3636_v62 = vld [vmem:[%s4268_s22 + $0xe4] ss:$16 sps:$4 sm:$0xff]  }
  0x6a   : > { %v3638_v63 = vld [vmem:[%s4268_s22 + $0xec] ss:$16 sps:$4 sm:$0xff]   ;;  %v3640_v0 = vld [vmem:[%s4268_s22 + $0xe0] ss:$16 sps:$4 sm:$0xff]   ;;  %v3641_v1 = vld [vmem:[%s4268_s22 + $0xe8] ss:$16 sps:$4 sm:$0xff]  }
  0x6b   : > { %686 = vmatpush1.bf16.msra.mxu0 %v3610_v44  ;;  %879 = vmatpush1.bf16.msra.mxu1 %v3611_v45  ;;  %v419_v2 = vld [vmem:[%s4257_s6] sm:$0xff]  ;;  %v420_v3 = vld [vmem:[%s4257_s6 + $0x8] sm:$0xff]  ;;  %v421_v8 = vld [vmem:[%s4257_s6 + $0x10] sm:$0xff] }
  0x6c   : > { %687 = vmatprep.subr.bf16.mxu0 %v3612_v46  ;;  %880 = vmatprep.subr.bf16.mxu1 %v3614_v47  ;;  %v451_v4 = vpack.c.bf16 %v420_v3, %v419_v2  ;;  %v3642_v5 = vld [vmem:[%s4266_s11 + $0x40] sm:$0xff]   ;;  %v422_v9 = vld [vmem:[%s4257_s6 + $0x18] sm:$0xff]  ;;  %v3646_v11 = vld [vmem:[%s4266_s11 + $0x48] sm:$0xff]  }
  0x6d   : > { %v3643_v6 = vld [vmem:[%s4266_s11 + $0xc0] sm:$0xff]   ;;  %v3647_v12 = vld [vmem:[%s4266_s11 + $0xc8] sm:$0xff]   ;;  %v452_v14 = vpack.c.bf16 %v422_v9, %v421_v8  ;;  %v3650_v16 = vld [vmem:[%s4266_s11 + $0x50] sm:$0xff]  }
  0x6e   : > { %v3644_v7 = vld [vmem:[%s4266_s11] sm:$0xff]   ;;  %v3648_v13 = vld [vmem:[%s4266_s11 + $0x8] sm:$0xff]   ;;  %v3651_v17 = vld [vmem:[%s4266_s11 + $0xd0] sm:$0xff]  }
  0x6f   : > { %688 = vmatpush1.bf16.msra.mxu0 %v3616_v48  ;;  %881 = vmatpush1.bf16.msra.mxu1 %v3617_v49  ;;  %v3645_v10 = vld [vmem:[%s4266_s11 + $0x80] sm:$0xff]   ;;  %v3649_v15 = vld [vmem:[%s4266_s11 + $0x88] sm:$0xff]   ;;  %v3652_v20 = vld [vmem:[%s4266_s11 + $0x10] sm:$0xff]  }
  0x70   : > { %689 = vmatprep.subr.bf16.mxu0 %v3618_v50  ;;  %882 = vmatprep.subr.bf16.mxu1 %v3620_v51  ;;  %v423_v18 = vld [vmem:[%s4257_s6 + $0x20] sm:$0xff]  ;;  %v424_v19 = vld [vmem:[%s4257_s6 + $0x28] sm:$0xff]  ;;  %v3653_v21 = vld [vmem:[%s4266_s11 + $0x90] sm:$0xff]  }
  0x71   : > { %v3654_v22 = vld [vmem:[%s4266_s11 + $0x58] sm:$0xff]   ;;  %v453_v25 = vpack.c.bf16 %v424_v19, %v423_v18  ;;  %v3658_v27 = vld [vmem:[%s4266_s11 + $0x60] sm:$0xff]   ;;  %v425_v29 = vld [vmem:[%s4257_s6 + $0x30] sm:$0xff] }
  0x72   : > { %v3655_v23 = vld [vmem:[%s4266_s11 + $0xd8] sm:$0xff]   ;;  %v3659_v28 = vld [vmem:[%s4266_s11 + $0xe0] sm:$0xff]   ;;  %v3662_v33 = vld [vmem:[%s4266_s11 + $0x68] sm:$0xff]  }
  0x73   : > { %690 = vmatpush1.bf16.msra.mxu0 %v3622_v52  ;;  %883 = vmatpush1.bf16.msra.mxu1 %v3623_v53  ;;  %v3656_v24 = vld [vmem:[%s4266_s11 + $0x18] sm:$0xff]   ;;  %v3660_v31 = vld [vmem:[%s4266_s11 + $0x20] sm:$0xff]   ;;  %v3663_v34 = vld [vmem:[%s4266_s11 + $0xe8] sm:$0xff]  }
  0x74   : > { %691 = vmatprep.subr.bf16.mxu0 %v3624_v54  ;;  %884 = vmatprep.subr.bf16.mxu1 %v3626_v55  ;;  %v3657_v26 = vld [vmem:[%s4266_s11 + $0x98] sm:$0xff]   ;;  %v3661_v32 = vld [vmem:[%s4266_s11 + $0xa0] sm:$0xff]   ;;  %v3664_v36 = vld [vmem:[%s4266_s11 + $0x28] sm:$0xff]  }
  0x75   : > { %v426_v30 = vld [vmem:[%s4257_s6 + $0x38] sm:$0xff]  ;;  %v3665_v38 = vld [vmem:[%s4266_s11 + $0xa8] sm:$0xff]   ;;  %v427_v39 = vld [vmem:[%s4257_s6 + $0x40] sm:$0xff] }
  0x76   : > { %v454_v37 = vpack.c.bf16 %v426_v30, %v425_v29  ;;  %v428_v40 = vld [vmem:[%s4257_s6 + $0x48] sm:$0xff]  ;;  %v429_v42 = vld [vmem:[%s4257_s6 + $0x50] sm:$0xff]  ;;  %v430_v43 = vld [vmem:[%s4257_s6 + $0x58] sm:$0xff] }
  0x77   : > { %692 = vmatpush1.bf16.msra.mxu0 %v3628_v56  ;;  %885 = vmatpush1.bf16.msra.mxu1 %v3629_v57  ;;  %v455_v41 = vpack.c.bf16 %v428_v40, %v427_v39  ;;  %v456_v44 = vpack.c.bf16 %v430_v43, %v429_v42  ;;  %v431_v45 = vld [vmem:[%s4257_s6 + $0x60] sm:$0xff]  ;;  %v432_v46 = vld [vmem:[%s4257_s6 + $0x68] sm:$0xff]  ;;  %v433_v48 = vld [vmem:[%s4257_s6 + $0x70] sm:$0xff] }
  0x78   : > { %693 = vmatprep.subr.bf16.mxu0 %v3630_v58  ;;  %886 = vmatprep.subr.bf16.mxu1 %v3632_v59  ;;  %v457_v47 = vpack.c.bf16 %v432_v46, %v431_v45  ;;  %v434_v49 = vld [vmem:[%s4257_s6 + $0x78] sm:$0xff]  ;;  %v435_v51 = vld [vmem:[%s4257_s6 + $0x80] sm:$0xff]  ;;  %v436_v52 = vld [vmem:[%s4257_s6 + $0x88] sm:$0xff] }
  0x79   : > { %v458_v50 = vpack.c.bf16 %v434_v49, %v433_v48  ;;  %v459_v53 = vpack.c.bf16 %v436_v52, %v435_v51  ;;  %v437_v54 = vld [vmem:[%s4257_s6 + $0x90] sm:$0xff]  ;;  %v438_v55 = vld [vmem:[%s4257_s6 + $0x98] sm:$0xff]  ;;  %v439_v57 = vld [vmem:[%s4257_s6 + $0xa0] sm:$0xff] }
  0x7a   : > { %v460_v56 = vpack.c.bf16 %v438_v55, %v437_v54  ;;  %v440_v58 = vld [vmem:[%s4257_s6 + $0xa8] sm:$0xff]  ;;  %v445_v2 = vld [vmem:[%s4257_s6 + $0xd0] sm:$0xff]  ;;  %v446_v3 = vld [vmem:[%s4257_s6 + $0xd8] sm:$0xff] }
  0x7b   : > { %694 = vmatpush1.bf16.msra.mxu0 %v3634_v60  ;;  %887 = vmatpush1.bf16.msra.mxu1 %v3635_v61  ;;  %v461_v59 = vpack.c.bf16 %v440_v58, %v439_v57  ;;  %v441_v60 = vld [vmem:[%s4257_s6 + $0xb0] sm:$0xff]  ;;  %v442_v61 = vld [vmem:[%s4257_s6 + $0xb8] sm:$0xff] }
  0x7c   : > { %695 = vmatprep.subr.bf16.mxu0 %v3636_v62  ;;  %888 = vmatprep.subr.bf16.mxu1 %v3638_v63  ;;  %v462_v62 = vpack.c.bf16 %v442_v61, %v441_v60  ;;  %v443_v63 = vld [vmem:[%s4257_s6 + $0xc0] sm:$0xff]  ;;  %v449_v8 = vld [vmem:[%s4257_s6 + $0xf0] sm:$0xff]  ;;  %v450_v9 = vld [vmem:[%s4257_s6 + $0xf8] sm:$0xff] }
  0x7d   : > { %v3673_v18 = vld [vmem:[%s4266_s11 + $0xb8] sm:$0xff]  }
  0x7f   : > { %696 = vmatpush1.bf16.msra.mxu0 %v3640_v0  ;;  %889 = vmatpush1.bf16.msra.mxu1 %v3641_v1  ;;  %v444_v0 = vld [vmem:[%s4257_s6 + $0xc8] sm:$0xff] }
  0x80   : > { %3279 = vmatprep.subr.bf16.mxu0 %v3642_v5  ;;  %3391 = vmatprep.subr.bf16.mxu1 %v3643_v6  ;;  %v463_v1 = vpack.c.bf16 %v444_v0, %v443_v63  ;;  %v447_v5 = vld [vmem:[%s4257_s6 + $0xe0] sm:$0xff]  ;;  %v448_v6 = vld [vmem:[%s4257_s6 + $0xe8] sm:$0xff] }
  0x82   : > { %714 = vmatmul.mubr.bf16.vlgmr.msra.gmra.mrb[0].mxu0 %v451_v4  ;;  %907 = vmatmul.mubr.bf16.vlgmr.msra.gmra.mrb[0].mxu1 %v451_v4  ;;  %v464_v4 = vpack.c.bf16 %v446_v3, %v445_v2 }
  0x83   : > { %723 = vmatprep.mubr.bf16.mxu0 %v4043_v35  ;;  %916 = vmatprep.mubr.bf16.mxu1 %v4043_v35 }
  0x84   : > { %3280 = vmatpush3.bf16.msra.mxu0 %v3644_v7  ;;  %3392 = vmatpush3.bf16.msra.mxu1 %v3645_v10  ;;  %v465_v7 = vpack.c.bf16 %v448_v6, %v447_v5  ;;  %v3666_v10 = vld [vmem:[%s4266_s11 + $0x70] sm:$0xff]  }
  0x85   : > { %3281 = vmatprep.subr.bf16.mxu0 %v3646_v11  ;;  %3393 = vmatprep.subr.bf16.mxu1 %v3647_v12  ;;  %v3667_v11 = vld [vmem:[%s4266_s11 + $0xf0] sm:$0xff]  }
  0x86   : > { %v3668_v12 = vld [vmem:[%s4266_s11 + $0x30] sm:$0xff]  }
  0x88   : > { %3282 = vmatpush3.bf16.msra.mxu0 %v3648_v13  ;;  %3394 = vmatpush3.bf16.msra.mxu1 %v3649_v15  ;;  %v3669_v13 = vld [vmem:[%s4266_s11 + $0xb0] sm:$0xff]   ;;  %v3670_v15 = vld [vmem:[%s4266_s11 + $0x78] sm:$0xff]  }
  0x89   : > { %3283 = vmatprep.subr.bf16.mxu0 %v3650_v16  ;;  %3395 = vmatprep.subr.bf16.mxu1 %v3651_v17  ;;  %v3671_v16 = vld [vmem:[%s4266_s11 + $0xf8] sm:$0xff]  }
  0x8a   : > { %724 = vmatmul.mubr.bf16.gmra.mrb[4].mxu0 %v452_v14  ;;  %917 = vmatmul.mubr.bf16.gmra.mrb[4].mxu1 %v452_v14  ;;  %v466_v14 = vpack.c.bf16 %v450_v9, %v449_v8  ;;  %v3672_v17 = vld [vmem:[%s4266_s11 + $0x38] sm:$0xff]  }
  0x8b   : > { %733 = vmatprep.mubr.bf16.mxu0 %v4043_v35  ;;  %926 = vmatprep.mubr.bf16.mxu1 %v4043_v35 }
  0x8c   : > { %3284 = vmatpush3.bf16.msra.mxu0 %v3652_v20  ;;  %3396 = vmatpush3.bf16.msra.mxu1 %v3653_v21 }
  0x8d   : > { %3285 = vmatprep.subr.bf16.mxu0 %v3654_v22  ;;  %3397 = vmatprep.subr.bf16.mxu1 %v3655_v23  ;;  %v499_v22 = vld [vmem:[%s373_s12] sm:$0xf] }
  0x90   : > { %3286 = vmatpush3.bf16.msra.mxu0 %v3656_v24  ;;  %3398 = vmatpush3.bf16.msra.mxu1 %v3657_v26 }
  0x91   : > { %3287 = vmatprep.subr.bf16.mxu0 %v3658_v27  ;;  %3399 = vmatprep.subr.bf16.mxu1 %v3659_v28 }
  0x92   : > { %734 = vmatmul.mubr.bf16.gmra.mrb[8].mxu0 %v453_v25  ;;  %927 = vmatmul.mubr.bf16.gmra.mrb[8].mxu1 %v453_v25 }
  0x93   : > { %743 = vmatprep.mubr.bf16.mxu0 %v4043_v35  ;;  %936 = vmatprep.mubr.bf16.mxu1 %v4043_v35 }
  0x94   : > { %3288 = vmatpush3.bf16.msra.mxu0 %v3660_v31  ;;  %3400 = vmatpush3.bf16.msra.mxu1 %v3661_v32 }
  0x95   : > { %3289 = vmatprep.subr.bf16.mxu0 %v3662_v33  ;;  %3401 = vmatprep.subr.bf16.mxu1 %v3663_v34 }
  0x98   : > { %3290 = vmatpush3.bf16.msra.mxu0 %v3664_v36  ;;  %3402 = vmatpush3.bf16.msra.mxu1 %v3665_v38 }
  0x99   : > { %3291 = vmatprep.subr.bf16.mxu0 %v3666_v10  ;;  %3403 = vmatprep.subr.bf16.mxu1 %v3667_v11 }
  0x9a   : > { %744 = vmatmul.mubr.bf16.gmra.mrb[12].mxu0 %v454_v37  ;;  %937 = vmatmul.mubr.bf16.gmra.mrb[12].mxu1 %v454_v37 }
  0x9b   : > { %753 = vmatprep.mubr.bf16.mxu0 %v4043_v35  ;;  %946 = vmatprep.mubr.bf16.mxu1 %v4043_v35 }
  0x9c   : > { %3292 = vmatpush3.bf16.msra.mxu0 %v3668_v12  ;;  %3404 = vmatpush3.bf16.msra.mxu1 %v3669_v13 }
  0x9d   : > { %3293 = vmatprep.subr.bf16.mxu0 %v3670_v15  ;;  %3405 = vmatprep.subr.bf16.mxu1 %v3671_v16 }
  0xa0   : > { %3294 = vmatpush3.bf16.msra.mxu0 %v3672_v17  ;;  %3406 = vmatpush3.bf16.msra.mxu1 %v3673_v18 }
  0xa2   : > { %754 = vmatmul.mubr.bf16.gmra.mrb[16].mxu0 %v455_v41  ;;  %947 = vmatmul.mubr.bf16.gmra.mrb[16].mxu1 %v455_v41 }
  0xa3   : > { %763 = vmatprep.mubr.bf16.mxu0 %v4043_v35  ;;  %956 = vmatprep.mubr.bf16.mxu1 %v4043_v35 }
  0xaa   : > { %764 = vmatmul.mubr.bf16.gmra.mrb[20].mxu0 %v456_v44  ;;  %957 = vmatmul.mubr.bf16.gmra.mrb[20].mxu1 %v456_v44 }
  0xab   : > { %773 = vmatprep.mubr.bf16.mxu0 %v4043_v35  ;;  %966 = vmatprep.mubr.bf16.mxu1 %v4043_v35 }
  0xb2   : > { %774 = vmatmul.mubr.bf16.gmra.mrb[24].mxu0 %v457_v47  ;;  %967 = vmatmul.mubr.bf16.gmra.mrb[24].mxu1 %v457_v47 }
  0xb3   : > { %783 = vmatprep.mubr.bf16.mxu0 %v4043_v35  ;;  %976 = vmatprep.mubr.bf16.mxu1 %v4043_v35 }
  0xba   : > { %784 = vmatmul.mubr.bf16.gmra.mrb[28].mxu0 %v458_v50  ;;  %977 = vmatmul.mubr.bf16.gmra.mrb[28].mxu1 %v458_v50 }
  0xbb   : > { %793 = vmatprep.mubr.bf16.mxu0 %v4043_v35  ;;  %986 = vmatprep.mubr.bf16.mxu1 %v4043_v35 }
  0xc2   : > { %794 = vmatmul.mubr.bf16.gmra.mrb[32].mxu0 %v459_v53  ;;  %987 = vmatmul.mubr.bf16.gmra.mrb[32].mxu1 %v459_v53 }
  0xc3   : > { %803 = vmatprep.mubr.bf16.mxu0 %v4043_v35  ;;  %996 = vmatprep.mubr.bf16.mxu1 %v4043_v35 }
  0xca   : > { %804 = vmatmul.mubr.bf16.gmra.mrb[36].mxu0 %v460_v56  ;;  %997 = vmatmul.mubr.bf16.gmra.mrb[36].mxu1 %v460_v56 }
  0xcb   : > { %813 = vmatprep.mubr.bf16.mxu0 %v4043_v35  ;;  %1006 = vmatprep.mubr.bf16.mxu1 %v4043_v35 }
  0xd2   : > { %814 = vmatmul.mubr.bf16.gmra.mrb[40].mxu0 %v461_v59  ;;  %1007 = vmatmul.mubr.bf16.gmra.mrb[40].mxu1 %v461_v59 }
  0xd3   : > { %823 = vmatprep.mubr.bf16.mxu0 %v4043_v35  ;;  %1016 = vmatprep.mubr.bf16.mxu1 %v4043_v35 }
  0xda   : > { %824 = vmatmul.mubr.bf16.gmra.mrb[44].mxu0 %v462_v62  ;;  %1017 = vmatmul.mubr.bf16.gmra.mrb[44].mxu1 %v462_v62 }
  0xdb   : > { %833 = vmatprep.mubr.bf16.mxu0 %v4043_v35  ;;  %1026 = vmatprep.mubr.bf16.mxu1 %v4043_v35 }
  0xe2   : > { %834 = vmatmul.mubr.bf16.gmra.mrb[48].mxu0 %v463_v1  ;;  %1027 = vmatmul.mubr.bf16.gmra.mrb[48].mxu1 %v463_v1 }
  0xe3   : > { %843 = vmatprep.mubr.bf16.mxu0 %v4043_v35  ;;  %1036 = vmatprep.mubr.bf16.mxu1 %v4043_v35 }
  0xea   : > { %844 = vmatmul.mubr.bf16.gmra.mrb[52].mxu0 %v464_v4  ;;  %1037 = vmatmul.mubr.bf16.gmra.mrb[52].mxu1 %v464_v4 }
  0xeb   : > { %853 = vmatprep.mubr.bf16.mxu0 %v4043_v35  ;;  %1046 = vmatprep.mubr.bf16.mxu1 %v4043_v35 }
  0xf2   : > { %854 = vmatmul.mubr.bf16.gmra.mrb[56].mxu0 %v465_v7  ;;  %1047 = vmatmul.mubr.bf16.gmra.mrb[56].mxu1 %v465_v7 }
  0xf3   : > { %863 = vmatprep.mubr.bf16.mxu0 %v4043_v35  ;;  %1056 = vmatprep.mubr.bf16.mxu1 %v4043_v35  ;;  %v501_v35 = vlaneseq }
  0xf5   : > { %v502_v19 = vshrl.u32 %v501_v35, 7 }
  0xf7   : > { %v503_v20 = vsub.s32 0, %v502_v19  ;;  %v511_v21 = vsub.s32 2, %v502_v19  ;;  %v507_v23 = vsub.s32 1, %v502_v19  ;;  %v515_v24 = vsub.s32 3, %v502_v19 }
  0xf9   : > { %v4406_v25 = vrot.slane %v499_v22, %v503_v20  ;;  %v4408_v26 = vrot.slane %v499_v22, %v511_v21  ;;  %v4410_v27 = vrot.slane %v499_v22, %v507_v23  ;;  %v4412_v28 = vrot.slane %v499_v22, %v515_v24 }
  0xfa   : > { %864 = vmatmul.mubr.bf16.gmra.mrb[60].mxu0 %v466_v14  ;;  %1057 = vmatmul.mubr.bf16.gmra.mrb[60].mxu1 %v466_v14 }
 0x155   : > { %v715_v29 = vpop.f32.mrb[0].mxu0  ;;  %v908_v30 = vpop.f32.mrb[0].mxu1 }
 0x156   : > { %v4415_v31 = vadd.f32 %v715_v29, %v4406_v25  ;;  %v4418_v32 = vadd.f32 %v908_v30, %v4408_v26  ;;  %v717_v33 = vpop.f32.mrb[1].mxu0  ;;  %v910_v34 = vpop.f32.mrb[1].mxu1 }
 0x157   : > { %v4421_v36 = vadd.f32 %v717_v33, %v4410_v27  ;;  %v4424_v37 = vadd.f32 %v910_v34, %v4412_v28  ;;  %v719_v38 = vpop.f32.mrb[2].mxu0  ;;  %v912_v39 = vpop.f32.mrb[2].mxu1 }
 0x158   : > { %v1067_v40 = vmul.f32 %v4415_v31, %v4415_v31  ;;  %v1069_v41 = vmul.f32 %v4418_v32, %v4418_v32  ;;  %v4431_v42 = vadd.f32 %v719_v38, %v4406_v25  ;;  %v4434_v43 = vadd.f32 %v912_v39, %v4408_v26  ;;  %v721_v44 = vpop.f32.mrb[3].mxu0  ;;  %v914_v45 = vpop.f32.mrb[3].mxu1 }
 0x159   : > { %v1068_v46 = vmul.f32 %v4421_v36, %v4421_v36  ;;  %v1070_v47 = vmul.f32 %v4424_v37, %v4424_v37  ;;  %v4441_v48 = vadd.f32 %v721_v44, %v4410_v27  ;;  %v4444_v49 = vadd.f32 %v914_v45, %v4412_v28 }
 0x15a   : > { %v1195_v50 = vmul.f32 %v1067_v40, %v4415_v31  ;;  %v1197_v51 = vmul.f32 %v1069_v41, %v4418_v32  ;;  %v1071_v52 = vmul.f32 %v4431_v42, %v4431_v42  ;;  %v1073_v53 = vmul.f32 %v4434_v43, %v4434_v43 }
 0x15b   : > { %v1196_v54 = vmul.f32 %v1068_v46, %v4421_v36  ;;  %v1198_v55 = vmul.f32 %v1070_v47, %v4424_v37  ;;  %v1072_v56 = vmul.f32 %v4441_v48, %v4441_v48  ;;  %v1074_v57 = vmul.f32 %v4444_v49, %v4444_v49 }
 0x15c   : > { %v1323_v58 = vmul.f32 0.044715, %v1195_v50  ;;  %v1325_v59 = vmul.f32 0.044715, %v1197_v51  ;;  %v1199_v60 = vmul.f32 %v1071_v52, %v4431_v42  ;;  %v1201_v61 = vmul.f32 %v1073_v53, %v4434_v43 }
 0x15d   : > { %v1324_v62 = vmul.f32 0.044715, %v1196_v54  ;;  %v1326_v63 = vmul.f32 0.044715, %v1198_v55  ;;  %v1200_v0 = vmul.f32 %v1072_v56, %v4441_v48  ;;  %v1202_v1 = vmul.f32 %v1074_v57, %v4444_v49  ;;  %v725_v2 = vpop.f32.mrb[4].mxu0  ;;  %v918_v3 = vpop.f32.mrb[4].mxu1 }
 0x15e   : > { %v1451_v4 = vadd.f32 %v1323_v58, %v4415_v31  ;;  %v1453_v5 = vadd.f32 %v1325_v59, %v4418_v32  ;;  %v1327_v6 = vmul.f32 0.044715, %v1199_v60  ;;  %v1329_v7 = vmul.f32 0.044715, %v1201_v61  ;;  %v727_v8 = vpop.f32.mrb[5].mxu0  ;;  %v920_v9 = vpop.f32.mrb[5].mxu1 }
 0x15f   : > { %v1452_v10 = vadd.f32 %v1324_v62, %v4421_v36  ;;  %v1454_v11 = vadd.f32 %v1326_v63, %v4424_v37  ;;  %v1328_v12 = vmul.f32 0.044715, %v1200_v0  ;;  %v1330_v13 = vmul.f32 0.044715, %v1202_v1  ;;  %v729_v14 = vpop.f32.mrb[6].mxu0  ;;  %v922_v15 = vpop.f32.mrb[6].mxu1 }
 0x160   : > { %v1579_v16 = vmul.f32 0.7978846, %v1451_v4  ;;  %v1581_v17 = vmul.f32 0.7978846, %v1453_v5  ;;  %v1455_v18 = vadd.f32 %v1327_v6, %v4431_v42  ;;  %v1457_v35 = vadd.f32 %v1329_v7, %v4434_v43  ;;  %v731_v19 = vpop.f32.mrb[7].mxu0  ;;  %v924_v20 = vpop.f32.mrb[7].mxu1 }
 0x161   : > { %v1580_v21 = vmul.f32 0.7978846, %v1452_v10  ;;  %v1582_v22 = vmul.f32 0.7978846, %v1454_v11  ;;  %v1456_v23 = vadd.f32 %v1328_v12, %v4441_v48  ;;  %v1458_v24 = vadd.f32 %v1330_v13, %v4444_v49 }
 0x162   : > { %3674 = vtanh.f32 %v1579_v16  ;;  %v1583_v29 = vmul.f32 0.7978846, %v1455_v18  ;;  %v1585_v30 = vmul.f32 0.7978846, %v1457_v35  ;;  %v4471_v33 = vadd.f32 %v725_v2, %v4406_v25 }
 0x163   : > { %3676 = vtanh.f32 %v1581_v17  ;;  %v1584_v34 = vmul.f32 0.7978846, %v1456_v23  ;;  %v1586_v38 = vmul.f32 0.7978846, %v1458_v24  ;;  %v4474_v39 = vadd.f32 %v918_v3, %v4408_v26 }
 0x164   : > { %6462 = vst [vmem:[#allocation13_spill] sm:$0xff] %v4471_v33  ;;  %3678 = vtanh.f32 %v1580_v21  ;;  %v1075_v40 = vmul.f32 %v4471_v33, %v4471_v33  ;;  %v4479_v41 = vadd.f32 %v727_v8, %v4410_v27  ;;  %v4482_v44 = vadd.f32 %v920_v9, %v4412_v28 }
 0x165   : > { %6463 = vst [vmem:[#allocation14_spill] sm:$0xff] %v4474_v39  ;;  %3680 = vtanh.f32 %v1582_v22  ;;  %v1077_v45 = vmul.f32 %v4474_v39, %v4474_v39  ;;  %v4487_v46 = vadd.f32 %v729_v14, %v4406_v25  ;;  %v4490_v47 = vadd.f32 %v922_v15, %v4408_v26  ;;  %v4492_v50 = vpop.f32.mrb[8].mxu0  ;;  %v4494_v51 = vpop.f32.mrb[8].mxu1 }
 0x166   : > { %6464 = vst [vmem:[#allocation15_spill] sm:$0xff] %v4482_v44  ;;  %3682 = vtanh.f32 %v1583_v29  ;;  %v1203_v52 = vmul.f32 %v1075_v40, %v4471_v33  ;;  %v1076_v53 = vmul.f32 %v4479_v41, %v4479_v41  ;;  %v1078_v54 = vmul.f32 %v4482_v44, %v4482_v44  ;;  %v4501_v55 = vpop.f32.mrb[9].mxu0  ;;  %v4503_v56 = vpop.f32.mrb[9].mxu1 }
 0x167   : > { %6465 = vst [vmem:[#allocation16_spill] sm:$0xff] %v4487_v46  ;;  %6466 = vst [vmem:[#allocation17_spill] sm:$0xff] %v4490_v47  ;;  %3684 = vtanh.f32 %v1585_v30  ;;  %v1205_v57 = vmul.f32 %v1077_v45, %v4474_v39  ;;  %v1079_v58 = vmul.f32 %v4487_v46, %v4487_v46  ;;  %v1081_v59 = vmul.f32 %v4490_v47, %v4490_v47  ;;  %v4510_v60 = vpop.f32.mrb[10].mxu0  ;;  %v4512_v61 = vpop.f32.mrb[10].mxu1 }
 0x168   : > { %3686 = vtanh.f32 %v1584_v34  ;;  %v1331_v62 = vmul.f32 0.044715, %v1203_v52  ;;  %v1204_v63 = vmul.f32 %v1076_v53, %v4479_v41  ;;  %v1206_v0 = vmul.f32 %v1078_v54, %v4482_v44  ;;  %v4516_v1 = vpop.f32.mrb[11].mxu0  ;;  %v4518_v2 = vpop.f32.mrb[11].mxu1 }
 0x169   : > { %3688 = vtanh.f32 %v1586_v38  ;;  %v1333_v3 = vmul.f32 0.044715, %v1205_v57  ;;  %v1207_v4 = vmul.f32 %v1079_v58, %v4487_v46  ;;  %v1209_v5 = vmul.f32 %v1081_v59, %v4490_v47 }
 0x16a   : > { %v1459_v6 = vadd.f32 %v1331_v62, %v4471_v33  ;;  %v1332_v7 = vmul.f32 0.044715, %v1204_v63  ;;  %v1334_v8 = vmul.f32 0.044715, %v1206_v0  ;;  %v4524_v9 = vadd.f32 %v731_v19, %v4410_v27 }
 0x16b   : > { %v1461_v10 = vadd.f32 %v1333_v3, %v4474_v39  ;;  %v1335_v11 = vmul.f32 0.044715, %v1207_v4  ;;  %v1337_v12 = vmul.f32 0.044715, %v1209_v5  ;;  %v4528_v13 = vadd.f32 %v924_v20, %v4412_v28 }
 0x16c   : > { %6467 = vst [vmem:[#allocation18_spill] sm:$0xff] %v4524_v9  ;;  %v3675_v14 = vpop.eup %3674  ;;  %v1587_v15 = vmul.f32 0.7978846, %v1459_v6  ;;  %v1460_v16 = vadd.f32 %v1332_v7, %v4479_v41  ;;  %v1462_v17 = vadd.f32 %v1334_v8, %v4482_v44  ;;  %v1080_v18 = vmul.f32 %v4524_v9, %v4524_v9 }
 0x16d   : > { %6468 = vst [vmem:[#allocation19_spill] sm:$0xff] %v4528_v13  ;;  %v3677_v35 = vpop.eup %3676  ;;  %v1835_v21 = vadd.f32 1.0, %v3675_v14  ;;  %v1589_v19 = vmul.f32 0.7978846, %v1461_v10  ;;  %v1463_v22 = vadd.f32 %v1335_v11, %v4487_v46  ;;  %v1465_v23 = vadd.f32 %v1337_v12, %v4490_v47  ;;  %v4536_v24 = vpop.f32.mrb[12].mxu0 }
 0x16e   : > { %v4538_v20 = vpop.f32.mrb[12].mxu1  ;;  %v4540_v29 = vpop.eup %3678  ;;  %v1837_v30 = vadd.f32 1.0, %v3677_v35  ;;  %3690 = vtanh.f32 %v1587_v15  ;;  %v1588_v34 = vmul.f32 0.7978846, %v1460_v16  ;;  %v1590_v38 = vmul.f32 0.7978846, %v1462_v17 }
 0x16f   : > { %v4542_v40 = vpop.f32.mrb[13].mxu0  ;;  %v4544_v45 = vpop.eup %3680  ;;  %v1963_v52 = vmul.f32 0.5, %v1835_v21  ;;  %3692 = vtanh.f32 %v1589_v19  ;;  %v1591_v53 = vmul.f32 0.7978846, %v1463_v22  ;;  %v1593_v54 = vmul.f32 0.7978846, %v1465_v23 }
 0x170   : > { %v4546_v57 = vpop.f32.mrb[13].mxu1  ;;  %v3683_v58 = vpop.eup %3682  ;;  %v1965_v59 = vmul.f32 0.5, %v1837_v30  ;;  %3694 = vtanh.f32 %v1588_v34  ;;  %v1208_v62 = vmul.f32 %v1080_v18, %v4524_v9  ;;  %v1082_v63 = vmul.f32 %v4528_v13, %v4528_v13 }
 0x171   : > { %v4551_v0 = vpop.f32.mrb[14].mxu0  ;;  %v4553_v3 = vpop.f32.mrb[14].mxu1  ;;  %v4556_v5 = vmul.f32 %v1963_v52, %v4415_v31  ;;  %v1839_v6 = vadd.f32 1.0, %v3683_v58  ;;  %3696 = vtanh.f32 %v1590_v38  ;;  %v4560_v7 = vadd.f32 %v4492_v50, %v4406_v25 }
 0x172   : > { %v3685_v4 = vpop.eup %3684  ;;  %v4562_v8 = vpop.f32.mrb[15].mxu0  ;;  %v4569_v12 = vmul.f32 %v1965_v59, %v4418_v32  ;;  %3698 = vtanh.f32 %v1591_v53  ;;  %v1336_v15 = vmul.f32 0.044715, %v1208_v62  ;;  %v1210_v17 = vmul.f32 %v1082_v63, %v4528_v13 }
 0x173   : > { %6469 = vst [vmem:[#allocation20_spill] sm:$0xff] %v4560_v7  ;;  %v4564_v10 = vpop.f32.mrb[15].mxu1  ;;  %v4566_v11 = vpop.eup %3686  ;;  %v1841_v14 = vadd.f32 1.0, %v3685_v4  ;;  %v1967_v16 = vmul.f32 0.5, %v1839_v6  ;;  %3700 = vtanh.f32 %v1593_v54  ;;  %v1083_v50 = vmul.f32 %v4560_v7, %v4560_v7 }
 0x174   : > { %v4571_v31 = vpop.eup %3688  ;;  %v1464_v35 = vadd.f32 %v1336_v15, %v4524_v9  ;;  %v4579_v21 = vadd.f32 %v4494_v51, %v4408_v26  ;;  %v4583_v32 = vadd.f32 %v4501_v55, %v4410_v27  ;;  %v1338_v22 = vmul.f32 0.044715, %v1210_v17 }
 0x175   : > { %v1969_v18 = vmul.f32 0.5, %v1841_v14  ;;  %v4586_v19 = vmul.f32 %v1967_v16, %v4431_v42  ;;  %v1211_v23 = vmul.f32 %v1083_v50, %v4560_v7  ;;  %v4591_v30 = vadd.f32 %v4503_v56, %v4412_v28  ;;  %v4593_v34 = vpop.f32.mrb[16].mxu0  ;;  %v4595_v38 = vpop.f32.mrb[16].mxu1 }
 0x176   : > { %6470 = vst [vmem:[#allocation21_spill] sm:$0xff] %v4579_v21  ;;  %6471 = vst [vmem:[#allocation22_spill] sm:$0xff] %v4583_v32  ;;  %v1592_v52 = vmul.f32 0.7978846, %v1464_v35  ;;  %v1085_v55 = vmul.f32 %v4579_v21, %v4579_v21  ;;  %v1084_v42 = vmul.f32 %v4583_v32, %v4583_v32  ;;  %v4604_v53 = vpop.f32.mrb[17].mxu0  ;;  %v4606_v54 = vpop.f32.mrb[17].mxu1  ;;  %v1466_v58 = vadd.f32 %v1338_v22, %v4528_v13 }
 0x177   : > { %6472 = vst [vmem:[#allocation23_spill] sm:$0xff] %v4591_v30  ;;  %v4598_v51 = vmul.f32 %v1969_v18, %v4434_v43  ;;  %v1339_v59 = vmul.f32 0.044715, %v1211_v23  ;;  %v1086_v43 = vmul.f32 %v4591_v30, %v4591_v30  ;;  %v4613_v62 = vpop.f32.mrb[18].mxu0  ;;  %v4615_v63 = vpop.f32.mrb[18].mxu1  ;;  %v4633_v23 = vadd.f32 %v4510_v60, %v4406_v25 }
 0x178   : > { %v4617_v4 = vpop.eup %3690  ;;  %3702 = vtanh.f32 %v1592_v52  ;;  %v1213_v14 = vmul.f32 %v1085_v55, %v4579_v21  ;;  %v1212_v15 = vmul.f32 %v1084_v42, %v4583_v32  ;;  %v4623_v16 = vpop.f32.mrb[19].mxu0  ;;  %v1594_v18 = vmul.f32 0.7978846, %v1466_v58 }
 0x179   : > { %v4625_v17 = vpop.f32.mrb[19].mxu1  ;;  %v4627_v50 = vpop.eup %3692  ;;  %v1467_v35 = vadd.f32 %v1339_v59, %v4560_v7  ;;  %v1214_v22 = vmul.f32 %v1086_v43, %v4591_v30  ;;  %6474 = vst [vmem:[#allocation25_spill] sm:$0xff] %v4633_v23  ;;  %v4639_v42 = vadd.f32 %v4512_v61, %v4408_v26  ;;  %v4643_v56 = vadd.f32 %v4516_v1, %v4410_v27 }
 0x17a   : > { %6473 = vst [vmem:[#allocation24_spill] sm:$0xff] %v4627_v50  ;;  %v4635_v52 = vpop.eup %3694  ;;  %v1341_v55 = vmul.f32 0.044715, %v1213_v14  ;;  %v1340_v6 = vmul.f32 0.044715, %v1212_v15  ;;  %3704 = vtanh.f32 %v1594_v18  ;;  %v1087_v60 = vmul.f32 %v4633_v23, %v4633_v23 }
 0x17b   : > { %6475 = vst [vmem:[#allocation26_spill] sm:$0xff] %v4639_v42  ;;  %6476 = vst [vmem:[#allocation27_spill] sm:$0xff] %v4643_v56  ;;  %v4645_v58 = vpop.eup %3696  ;;  %v1595_v59 = vmul.f32 0.7978846, %v1467_v35  ;;  %v1342_v43 = vmul.f32 0.044715, %v1214_v22  ;;  %v1089_v61 = vmul.f32 %v4639_v42, %v4639_v42  ;;  %v1088_v1 = vmul.f32 %v4643_v56, %v4643_v56 }
 0x17c   : > { %v4649_v7 = vpop.eup %3698  ;;  %v1469_v14 = vadd.f32 %v1341_v55, %v4579_v21  ;;  %v1468_v15 = vadd.f32 %v1340_v6, %v4583_v32  ;;  %v1215_v35 = vmul.f32 %v1087_v60, %v4633_v23  ;;  %v4663_v22 = vadd.f32 %v4518_v2, %v4412_v28 }
 0x17d   : > { %6477 = vst [vmem:[#allocation28_spill] sm:$0xff] %v4649_v7  ;;  %v4657_v47 = vpop.eup %3700  ;;  %3706 = vtanh.f32 %v1595_v59  ;;  %v1470_v18 = vadd.f32 %v1342_v43, %v4591_v30  ;;  %v4665_v55 = vpop.f32.mrb[20].mxu0  ;;  %v1217_v39 = vmul.f32 %v1089_v61, %v4639_v42  ;;  %v1216_v46 = vmul.f32 %v1088_v1, %v4643_v56 }
 0x17e   : > { %6478 = vst [vmem:[#allocation29_spill] sm:$0xff] %v4657_v47  ;;  %6479 = vst [vmem:[#allocation30_spill] sm:$0xff] %v4663_v22  ;;  %v4667_v6 = vpop.f32.mrb[20].mxu1  ;;  %v1597_v21 = vmul.f32 0.7978846, %v1469_v14  ;;  %v4671_v33 = vpop.f32.mrb[21].mxu0  ;;  %v1090_v2 = vmul.f32 %v4663_v22, %v4663_v22  ;;  %v4679_v30 = vadd.f32 %v4536_v24, %v4406_v25  ;;  %v4687_v1 = vadd.f32 %v4538_v20, %v4408_v26 }
 0x17f   : > { %v1596_v32 = vmul.f32 0.7978846, %v1468_v15  ;;  %v4673_v59 = vpop.f32.mrb[21].mxu1  ;;  %v1598_v43 = vmul.f32 0.7978846, %v1470_v18  ;;  %v4681_v47 = vpop.f32.mrb[22].mxu0 }
 0x180   : > { %v1343_v60 = vmul.f32 0.044715, %v1215_v35  ;;  %6480 = vst [vmem:[#allocation31_spill] sm:$0xff] %v4679_v30  ;;  %v4683_v14 = vpop.f32.mrb[22].mxu1  ;;  %3708 = vtanh.f32 %v1597_v21  ;;  %v1345_v15 = vmul.f32 0.044715, %v1217_v39  ;;  %v1218_v24 = vmul.f32 %v1090_v2, %v4663_v22 }
 0x181   : > { %v1344_v61 = vmul.f32 0.044715, %v1216_v46  ;;  %6481 = vst [vmem:[#allocation32_spill] sm:$0xff] %v4687_v1  ;;  %v4689_v18 = vpop.f32.mrb[23].mxu0  ;;  %v4691_v35 = vpop.f32.mrb[23].mxu1  ;;  %3710 = vtanh.f32 %v1596_v32  ;;  %v1091_v13 = vmul.f32 %v4679_v30, %v4679_v30  ;;  %v1093_v20 = vmul.f32 %v4687_v1, %v4687_v1 }
 0x182   : > { %v1471_v50 = vadd.f32 %v1343_v60, %v4633_v23  ;;  %v4697_v7 = vpop.eup %3702  ;;  %3712 = vtanh.f32 %v1598_v43  ;;  %v1473_v39 = vadd.f32 %v1345_v15, %v4639_v42  ;;  %v1346_v44 = vmul.f32 0.044715, %v1218_v24 }
 0x183   : > { %v1472_v46 = vadd.f32 %v1344_v61, %v4643_v56  ;;  %v1219_v32 = vmul.f32 %v1091_v13, %v4679_v30  ;;  %v4706_v60 = vadd.f32 %v4542_v40, %v4410_v27  ;;  %v1221_v9 = vmul.f32 %v1093_v20, %v4687_v1 }
 0x184   : > { %v1599_v21 = vmul.f32 0.7978846, %v1471_v50  ;;  %v1601_v2 = vmul.f32 0.7978846, %v1473_v39  ;;  %v4711_v43 = vadd.f32 %v4546_v57, %v4412_v28  ;;  %v4713_v15 = vpop.eup %3704  ;;  %v1474_v50 = vadd.f32 %v1346_v44, %v4663_v22 }
 0x185   : > { %6482 = vst [vmem:[#allocation33_spill] sm:$0xff] %v4706_v60  ;;  %v1600_v23 = vmul.f32 0.7978846, %v1472_v46  ;;  %v1347_v61 = vmul.f32 0.044715, %v1219_v32  ;;  %v1092_v13 = vmul.f32 %v4706_v60, %v4706_v60  ;;  %v4718_v24 = vpop.f32.mrb[24].mxu0  ;;  %v4726_v57 = vadd.f32 %v4551_v0, %v4406_v25 }
 0x186   : > { %6483 = vst [vmem:[#allocation34_spill] sm:$0xff] %v4711_v43  ;;  %3714 = vtanh.f32 %v1599_v21  ;;  %v4720_v40 = vpop.f32.mrb[24].mxu1  ;;  %v1349_v39 = vmul.f32 0.044715, %v1221_v9  ;;  %v1094_v46 = vmul.f32 %v4711_v43, %v4711_v43  ;;  %v4728_v20 = vpop.f32.mrb[25].mxu0 }
 0x187   : > { %3716 = vtanh.f32 %v1601_v2  ;;  %6484 = vst [vmem:[#allocation35_spill] sm:$0xff] %v4726_v57  ;;  %6485 = vst [vmem:[#allocation36_spill] sm:$0xff] %v4728_v20  ;;  %v4730_v44 = vpop.f32.mrb[25].mxu1  ;;  %v4732_v21 = vpop.eup %3706  ;;  %v1602_v32 = vmul.f32 0.7978846, %v1474_v50  ;;  %v1475_v42 = vadd.f32 %v1347_v61, %v4679_v30  ;;  %v1220_v2 = vmul.f32 %v1092_v13, %v4706_v60 }
 0x188   : > { %6486 = vst [vmem:[#allocation37_spill] sm:$0xff] %v4732_v21  ;;  %3718 = vtanh.f32 %v1600_v23  ;;  %v4736_v9 = vpop.f32.mrb[26].mxu0  ;;  %v4738_v22 = vpop.f32.mrb[26].mxu1  ;;  %v1477_v56 = vadd.f32 %v1349_v39, %v4687_v1  ;;  %v1222_v0 = vmul.f32 %v1094_v46, %v4711_v43  ;;  %v1095_v20 = vmul.f32 %v4726_v57, %v4726_v57 }
 0x189   : > { %6487 = vst [vmem:[#allocation38_spill] sm:$0xff] %v4736_v9  ;;  %6488 = vst [vmem:[#allocation39_spill] sm:$0xff] %v4738_v22  ;;  %v4746_v21 = vadd.f32 %v4553_v3, %v4408_v26  ;;  %v4748_v23 = vpop.f32.mrb[27].mxu0  ;;  %v4750_v50 = vpop.f32.mrb[27].mxu1  ;;  %3720 = vtanh.f32 %v1602_v32  ;;  %v1603_v61 = vmul.f32 0.7978846, %v1475_v42  ;;  %v4754_v30 = vadd.f32 %v4562_v8, %v4410_v27 }
 0x18a   : > { %v1348_v13 = vmul.f32 0.044715, %v1220_v2  ;;  %v4756_v39 = vpop.eup %3708  ;;  %v1605_v46 = vmul.f32 0.7978846, %v1477_v56  ;;  %v1350_v1 = vmul.f32 0.044715, %v1222_v0  ;;  %v1223_v22 = vmul.f32 %v1095_v20, %v4726_v57 }
 0x18b   : > { %6489 = vst [vmem:[#allocation40_spill] sm:$0xff] %v4746_v21  ;;  %6490 = vst [vmem:[#allocation41_spill] sm:$0xff] %v4754_v30  ;;  %v1097_v3 = vmul.f32 %v4746_v21, %v4746_v21  ;;  %v4761_v9 = vpop.eup %3710  ;;  %3722 = vtanh.f32 %v1603_v61  ;;  %v1096_v42 = vmul.f32 %v4754_v30, %v4754_v30  ;;  %v4768_v8 = vadd.f32 %v4564_v10, %v4412_v28 }
 0x18c   : > { %6491 = vst [vmem:[#allocation42_spill] sm:$0xff] %v4756_v39  ;;  %6492 = vst [vmem:[#allocation43_spill] sm:$0xff] %v4761_v9  ;;  %v1476_v32 = vadd.f32 %v1348_v13, %v4706_v60  ;;  %v4770_v2 = vpop.eup %3712  ;;  %3724 = vtanh.f32 %v1605_v46  ;;  %v1478_v56 = vadd.f32 %v1350_v1, %v4711_v43  ;;  %v1351_v20 = vmul.f32 0.044715, %v1223_v22 }
 0x18d   : > { %6493 = vst [vmem:[#allocation44_spill] sm:$0xff] %v4768_v8  ;;  %v1225_v0 = vmul.f32 %v1097_v3, %v4746_v21  ;;  %v1224_v61 = vmul.f32 %v1096_v42, %v4754_v30  ;;  %v1098_v13 = vmul.f32 %v4768_v8, %v4768_v8  ;;  %v4779_v60 = vadd.f32 %v4593_v34, %v4406_v25  ;;  %v4781_v10 = vpop.f32.mrb[28].mxu0  ;;  %v4783_v9 = vpop.f32.mrb[28].mxu1 }
 0x18e   : > { %v1604_v39 = vmul.f32 0.7978846, %v1476_v32  ;;  %6495 = vst [vmem:[#allocation46_spill] sm:$0xff] %v4781_v10  ;;  %6496 = vst [vmem:[#allocation47_spill] sm:$0xff] %v4783_v9  ;;  %v1606_v46 = vmul.f32 0.7978846, %v1478_v56  ;;  %v1479_v1 = vadd.f32 %v1351_v20, %v4726_v57  ;;  %v4788_v3 = vadd.f32 %v4595_v38, %v4408_v26 }
 0x18f   : > { %6494 = vst [vmem:[#allocation45_spill] sm:$0xff] %v4779_v60  ;;  %v1353_v22 = vmul.f32 0.044715, %v1225_v0  ;;  %v4790_v32 = vpop.f32.mrb[29].mxu0  ;;  %v4792_v42 = vpop.f32.mrb[29].mxu1  ;;  %v1226_v10 = vmul.f32 %v1098_v13, %v4768_v8  ;;  %v1099_v56 = vmul.f32 %v4779_v60, %v4779_v60 }
 0x190   : > { %6497 = vst [vmem:[#allocation48_spill] sm:$0xff] %v4788_v3  ;;  %6498 = vst [vmem:[#allocation49_spill] sm:$0xff] %v4790_v32  ;;  %v4794_v43 = vpop.eup %3714  ;;  %3726 = vtanh.f32 %v1604_v39  ;;  %v1352_v34 = vmul.f32 0.044715, %v1224_v61  ;;  %v4799_v9 = vpop.f32.mrb[30].mxu0 }
 0x191   : > { %6499 = vst [vmem:[#allocation50_spill] sm:$0xff] %v4792_v42  ;;  %6500 = vst [vmem:[#allocation51_spill] sm:$0xff] %v4799_v9  ;;  %v4801_v20 = vpop.f32.mrb[30].mxu1  ;;  %v4803_v0 = vpop.eup %3716  ;;  %3728 = vtanh.f32 %v1606_v46  ;;  %v1607_v38 = vmul.f32 0.7978846, %v1479_v1  ;;  %v1481_v57 = vadd.f32 %v1353_v22, %v4746_v21  ;;  %v1101_v42 = vmul.f32 %v4788_v3, %v4788_v3 }
 0x192   : > { %6501 = vst [vmem:[#allocation52_spill] sm:$0xff] %v4801_v20  ;;  %v4808_v39 = vpop.f32.mrb[31].mxu0  ;;  %v4810_v61 = vpop.f32.mrb[31].mxu1  ;;  %v1480_v32 = vadd.f32 %v1352_v34, %v4754_v30  ;;  %v1354_v9 = vmul.f32 0.044715, %v1226_v10  ;;  %v1227_v20 = vmul.f32 %v1099_v56, %v4779_v60  ;;  %v4818_v46 = vadd.f32 %v4604_v53, %v4410_v27 }
 0x193   : > { %6502 = vst [vmem:[#allocation53_spill] sm:$0xff] %v4808_v39  ;;  %6503 = vst [vmem:[#allocation54_spill] sm:$0xff] %v4810_v61  ;;  %v4812_v13 = vpop.eup %3718  ;;  %3730 = vtanh.f32 %v1607_v38  ;;  %v1609_v1 = vmul.f32 0.7978846, %v1481_v57  ;;  %v1229_v22 = vmul.f32 %v1101_v42, %v4788_v3  ;;  %v4823_v21 = vadd.f32 %v4606_v54, %v4412_v28 }
 0x194   : > { %6504 = vst [vmem:[#allocation55_spill] sm:$0xff] %v4818_v46  ;;  %v4825_v61 = vpop.eup %3720  ;;  %v1608_v39 = vmul.f32 0.7978846, %v1480_v32  ;;  %v1482_v34 = vadd.f32 %v1354_v9, %v4768_v8  ;;  %v1355_v10 = vmul.f32 0.044715, %v1227_v20  ;;  %v1100_v56 = vmul.f32 %v4818_v46, %v4818_v46 }
 0x195   : > { %6505 = vst [vmem:[#allocation56_spill] sm:$0xff] %v4823_v21  ;;  %3732 = vtanh.f32 %v1609_v1  ;;  %v1357_v53 = vmul.f32 0.044715, %v1229_v22  ;;  %v1102_v57 = vmul.f32 %v4823_v21, %v4823_v21  ;;  %v4834_v42 = vadd.f32 %v4613_v62, %v4406_v25  ;;  %v4836_v54 = vpop.eup %3722  ;;  %v4840_v20 = vpop.f32.mrb[32].mxu0 }
 0x196   : > { %6507 = vst [vmem:[#allocation58_spill] sm:$0xff] %v4836_v54  ;;  %3734 = vtanh.f32 %v1608_v39  ;;  %v1610_v38 = vmul.f32 0.7978846, %v1482_v34  ;;  %v1483_v32 = vadd.f32 %v1355_v10, %v4779_v60  ;;  %v1228_v9 = vmul.f32 %v1100_v56, %v4818_v46  ;;  %6508 = vst [vmem:[#allocation59_spill] sm:$0xff] %v4840_v20  ;;  %v4842_v8 = vpop.f32.mrb[32].mxu1  ;;  %v4844_v1 = vpop.eup %3724 }
 0x197   : > { %6506 = vst [vmem:[#allocation57_spill] sm:$0xff] %v4834_v42  ;;  %6509 = vst [vmem:[#allocation60_spill] sm:$0xff] %v4842_v8  ;;  %v1485_v22 = vadd.f32 %v1357_v53, %v4788_v3  ;;  %v1230_v30 = vmul.f32 %v1102_v57, %v4823_v21  ;;  %v1103_v62 = vmul.f32 %v4834_v42, %v4834_v42  ;;  %v4854_v34 = vpop.f32.mrb[33].mxu0  ;;  %v4856_v10 = vpop.f32.mrb[33].mxu1 }
 0x198   : > { %6510 = vst [vmem:[#allocation61_spill] sm:$0xff] %v4844_v1  ;;  %v4852_v39 = vadd.f32 %v4615_v63, %v4408_v26  ;;  %6512 = vst [vmem:[#allocation63_spill] sm:$0xff] %v4854_v34  ;;  %3736 = vtanh.f32 %v1610_v38  ;;  %v1611_v56 = vmul.f32 0.7978846, %v1483_v32  ;;  %v1356_v60 = vmul.f32 0.044715, %v1228_v9 }
 0x199   : > { %6513 = vst [vmem:[#allocation64_spill] sm:$0xff] %v4856_v10  ;;  %v4860_v8 = vadd.f32 %v4623_v16, %v4410_v27  ;;  %v4862_v53 = vpop.f32.mrb[34].mxu0  ;;  %v4864_v57 = vpop.f32.mrb[34].mxu1  ;;  %v1613_v3 = vmul.f32 0.7978846, %v1485_v22  ;;  %v1231_v63 = vmul.f32 %v1103_v62, %v4834_v42 }
 0x19a   : > { %6511 = vst [vmem:[#allocation62_spill] sm:$0xff] %v4852_v39  ;;  %6514 = vst [vmem:[#allocation65_spill] sm:$0xff] %v4862_v53  ;;  %v1358_v20 = vmul.f32 0.044715, %v1230_v30  ;;  %v1105_v34 = vmul.f32 %v4852_v39, %v4852_v39  ;;  %v4869_v1 = vpop.f32.mrb[35].mxu0  ;;  %v4871_v38 = vpop.f32.mrb[35].mxu1  ;;  %3738 = vtanh.f32 %v1611_v56  ;;  %v1484_v16 = vadd.f32 %v1356_v60, %v4818_v46 }
 0x19b   : > { %6515 = vst [vmem:[#allocation66_spill] sm:$0xff] %v4864_v57  ;;  %6516 = vst [vmem:[#allocation67_spill] sm:$0xff] %v4869_v1  ;;  %v4873_v32 = vpop.eup %3726  ;;  %v1104_v9 = vmul.f32 %v4860_v8, %v4860_v8  ;;  %v4880_v30 = vadd.f32 %v4625_v17, %v4412_v28  ;;  %3740 = vtanh.f32 %v1613_v3  ;;  %v1359_v1 = vmul.f32 0.044715, %v1231_v63 }
 0x19c   : > { %6517 = vst [vmem:[#allocation68_spill] sm:$0xff] %v4871_v38  ;;  %v4882_v22 = vpop.eup %3728  ;;  %v1486_v62 = vadd.f32 %v1358_v20, %v4823_v21  ;;  %v1233_v38 = vmul.f32 %v1105_v34, %v4852_v39  ;;  %v1612_v57 = vmul.f32 0.7978846, %v1484_v16  ;;  %v1836_v46 = vadd.f32 1.0, %v4540_v29 }
 0x19d   : > { %v1232_v56 = vmul.f32 %v1104_v9, %v4860_v8  ;;  %v1106_v60 = vmul.f32 %v4880_v30, %v4880_v30  ;;  %v4890_v53 = vpop.eup %3730  ;;  %v1487_v10 = vadd.f32 %v1359_v1, %v4834_v42  ;;  %v1840_v3 = vadd.f32 1.0, %v4566_v11  ;;  %v4895_v16 = vpop.f32.mrb[36].mxu0 }
 0x19e   : > { %6518 = vst [vmem:[#allocation69_spill] sm:$0xff] %v4890_v53  ;;  %v1614_v17 = vmul.f32 0.7978846, %v1486_v62  ;;  %v1361_v54 = vmul.f32 0.044715, %v1233_v38  ;;  %3742 = vtanh.f32 %v1612_v57  ;;  %v1964_v63 = vmul.f32 0.5, %v1836_v46 }
 0x19f   : > { %v1360_v20 = vmul.f32 0.044715, %v1232_v56  ;;  %v1234_v34 = vmul.f32 %v1106_v60, %v4880_v30  ;;  %v4897_v9 = vpop.f32.mrb[36].mxu1  ;;  %v4899_v21 = vpop.eup %3732  ;;  %v1615_v29 = vmul.f32 0.7978846, %v1487_v10  ;;  %v1968_v53 = vmul.f32 0.5, %v1840_v3 }
 0x1a0   : > { %3744 = vtanh.f32 %v1614_v17  ;;  %v1489_v62 = vadd.f32 %v1361_v54, %v4852_v39  ;;  %v4902_v1 = vpop.f32.mrb[37].mxu0  ;;  %v4904_v38 = vpop.f32.mrb[37].mxu1  ;;  %v2092_v56 = vmul.f32 %v1964_v63, %v4421_v36  ;;  %v1838_v60 = vadd.f32 1.0, %v4544_v45 }
 0x1a1   : > { %6519 = vst [vmem:[#allocation70_spill] sm:$0xff] %v4904_v38  ;;  %v4906_v11 = vpop.eup %3734  ;;  %v1488_v57 = vadd.f32 %v1360_v20, %v4860_v8  ;;  %v1362_v46 = vmul.f32 0.044715, %v1234_v34  ;;  %v4911_v42 = vpop.f32.mrb[38].mxu0  ;;  %3746 = vtanh.f32 %v1615_v29  ;;  %v2096_v10 = vmul.f32 %v1968_v53, %v4441_v48 }
 0x1a2   : > { %v4913_v17 = vpop.f32.mrb[38].mxu1  ;;  %v1617_v54 = vmul.f32 0.7978846, %v1489_v62  ;;  %v1842_v3 = vadd.f32 1.0, %v4571_v31  ;;  %v4917_v38 = vpop.f32.mrb[39].mxu0  ;;  %v1966_v45 = vmul.f32 0.5, %v1838_v60  ;;  %v4926_v63 = vadd.f32 %v4665_v55, %v4406_v25 }
 0x1a3   : > { %6520 = vst [vmem:[#allocation71_spill] sm:$0xff] %v4917_v38  ;;  %v4919_v39 = vpop.f32.mrb[39].mxu1  ;;  %v4921_v20 = vpop.eup %3736  ;;  %v1616_v34 = vmul.f32 0.7978846, %v1488_v57  ;;  %v1490_v36 = vadd.f32 %v1362_v46, %v4880_v30  ;;  %v2252_v29 = vpack.c.bf16 %v2096_v10, %v2092_v56  ;;  %v4930_v48 = vadd.f32 %v4667_v6, %v4408_v26 }
 0x1a4   : > { %6521 = vst [vmem:[#allocation72_spill] sm:$0xff] %v4919_v39  ;;  %6522 = vst [vmem:[#allocation73_spill] sm:$0xff] %v4926_v63  ;;  %3748 = vtanh.f32 %v1617_v54  ;;  %v1970_v62 = vmul.f32 0.5, %v1842_v3  ;;  %v4932_v31 = vpop.eup %3738  ;;  %v2094_v57 = vmul.f32 %v1966_v45, %v4424_v37  ;;  %v1107_v46 = vmul.f32 %v4926_v63, %v4926_v63 }
 0x1a5   : > { %6523 = vst [vmem:[#allocation74_spill] sm:$0xff] %v4930_v48  ;;  %3750 = vtanh.f32 %v1616_v34  ;;  %v1618_v53 = vmul.f32 0.7978846, %v1490_v36  ;;  %v4937_v60 = vpop.eup %3740  ;;  %2603 = vmatprep.mubr.bf16.mxu0 %v2252_v29  ;;  %v1109_v56 = vmul.f32 %v4930_v48, %v4930_v48  ;;  %v4944_v6 = vadd.f32 %v4671_v33, %v4410_v27  ;;  %v4962_v33 = vpop.f32.mrb[40].mxu0 }
 0x1a6   : > { %v2098_v55 = vmul.f32 %v1970_v62, %v4444_v49  ;;  %v4948_v54 = vadd.f32 %v4673_v59, %v4412_v28  ;;  %v6525_v37 = vpack.c.bf16 %v4586_v19, %v4556_v5  ;;  %v1235_v10 = vmul.f32 %v1107_v46, %v4926_v63  ;;  %6528 = vst [vmem:[#allocation78_spill] sm:$0xff] %v4962_v33  ;;  %v4964_v34 = vpop.f32.mrb[40].mxu1  ;;  %v4971_v45 = vpop.f32.mrb[41].mxu0 }
 0x1a7   : > { %3752 = vtanh.f32 %v1618_v53  ;;  %v4956_v49 = vadd.f32 %v4681_v47, %v4406_v25  ;;  %v4960_v3 = vadd.f32 %v4683_v14, %v4408_v26  ;;  %6529 = vst [vmem:[#allocation79_spill] sm:$0xff] %v4964_v34  ;;  %v1237_v36 = vmul.f32 %v1109_v56, %v4930_v48  ;;  %6530 = vst [vmem:[#allocation80_spill] sm:$0xff] %v4971_v45  ;;  %v4973_v47 = vpop.f32.mrb[41].mxu1  ;;  %v4985_v46 = vpop.f32.mrb[42].mxu0 }
 0x1a8   : > { %6524 = vst [vmem:[#allocation75_spill] sm:$0xff] %v4948_v54  ;;  %2604 = vmatmul.mubr.bf16.vlgmr.msra.gmra.mrb[64].mxu0 %v6525_v37  ;;  %v2254_v59 = vpack.c.bf16 %v2098_v55, %v2094_v57  ;;  %v1108_v5 = vmul.f32 %v4944_v6, %v4944_v6  ;;  %v1110_v19 = vmul.f32 %v4948_v54, %v4948_v54  ;;  %6531 = vst [vmem:[#allocation81_spill] sm:$0xff] %v4973_v47  ;;  %v4975_v29 = vpop.eup %3742  ;;  %v4987_v55 = vpop.f32.mrb[42].mxu1 }
 0x1a9   : > { %6526 = vst [vmem:[#allocation76_spill] sm:$0xff] %v4956_v49  ;;  %6527 = vst [vmem:[#allocation77_spill] sm:$0xff] %v4960_v3  ;;  %v1363_v14 = vmul.f32 0.044715, %v1235_v10  ;;  %v1111_v62 = vmul.f32 %v4956_v49, %v4956_v49  ;;  %v1113_v53 = vmul.f32 %v4960_v3, %v4960_v3  ;;  %v4983_v57 = vadd.f32 %v4689_v18, %v4410_v27  ;;  %v4997_v34 = vpop.f32.mrb[43].mxu0  ;;  %v4999_v18 = vpop.f32.mrb[43].mxu1 }
 0x1aa   : > { %6532 = vst [vmem:[#allocation82_spill] sm:$0xff] %v4985_v46  ;;  %6533 = vst [vmem:[#allocation83_spill] sm:$0xff] %v4987_v55  ;;  %v4989_v56 = vpop.eup %3744  ;;  %2764 = vmatprep.mubr.bf16.mxu1 %v2254_v59  ;;  %v1365_v37 = vmul.f32 0.044715, %v1237_v36  ;;  %v1236_v10 = vmul.f32 %v1108_v5, %v4944_v6  ;;  %v1238_v47 = vmul.f32 %v1110_v19, %v4948_v54 }
 0x1ab   : > { %v4995_v45 = vadd.f32 %v4691_v35, %v4412_v28  ;;  %6535 = vst [vmem:[#allocation85_spill] sm:$0xff] %v4997_v34  ;;  %6536 = vst [vmem:[#allocation86_spill] sm:$0xff] %v4999_v18  ;;  %v6537_v46 = vpack.c.bf16 %v4598_v51, %v4569_v12  ;;  %v1491_v55 = vadd.f32 %v1363_v14, %v4926_v63  ;;  %v5009_v19 = vpop.eup %3746 }
 0x1ac   : > { %v1239_v59 = vmul.f32 %v1111_v62, %v4956_v49  ;;  %v1241_v36 = vmul.f32 %v1113_v53, %v4960_v3  ;;  %v1112_v5 = vmul.f32 %v4983_v57, %v4983_v57  ;;  %v1493_v35 = vadd.f32 %v1365_v37, %v4930_v48 }
 0x1ad   : > { %6534 = vst [vmem:[#allocation84_spill] sm:$0xff] %v4995_v45  ;;  %2765 = vmatmul.mubr.bf16.vlgmr.msra.gmra.mrb[64].mxu1 %v6537_v46  ;;  %v1364_v34 = vmul.f32 0.044715, %v1236_v10  ;;  %v1366_v33 = vmul.f32 0.044715, %v1238_v47  ;;  %v1114_v18 = vmul.f32 %v4995_v45, %v4995_v45 }
 0x1ae   : > { %v1619_v12 = vmul.f32 0.7978846, %v1491_v55  ;;  %v1367_v51 = vmul.f32 0.044715, %v1239_v59  ;;  %v1369_v46 = vmul.f32 0.044715, %v1241_v36  ;;  %v1240_v14 = vmul.f32 %v1112_v5, %v4983_v57  ;;  %v5015_v62 = vpop.eup %3748 }
 0x1af   : > { %v1621_v53 = vmul.f32 0.7978846, %v1493_v35  ;;  %v1492_v63 = vadd.f32 %v1364_v34, %v4944_v6  ;;  %v1494_v39 = vadd.f32 %v1366_v33, %v4948_v54  ;;  %v1242_v38 = vmul.f32 %v1114_v18, %v4995_v45  ;;  %v5020_v37 = vpop.eup %3750  ;;  %v5024_v59 = vpop.f32.mrb[44].mxu0 }
 0x1b0   : > { %3754 = vtanh.f32 %v1619_v12  ;;  %v1495_v47 = vadd.f32 %v1367_v51, %v4956_v49  ;;  %v1497_v55 = vadd.f32 %v1369_v46, %v4960_v3  ;;  %v1368_v10 = vmul.f32 0.044715, %v1240_v14  ;;  %6538 = vst [vmem:[#allocation87_spill] sm:$0xff] %v5024_v59  ;;  %v5026_v36 = vpop.f32.mrb[44].mxu1  ;;  %v5032_v51 = vpop.f32.mrb[45].mxu0  ;;  %v6551_v59 = vld [vmem:[#allocation29_spill] sm:$0xff] }
 0x1b1   : > { %6539 = vst [vmem:[#allocation88_spill] sm:$0xff] %v5026_v36  ;;  %3756 = vtanh.f32 %v1621_v53  ;;  %v1620_v5 = vmul.f32 0.7978846, %v1492_v63  ;;  %v1622_v35 = vmul.f32 0.7978846, %v1494_v39  ;;  %v5028_v48 = vpop.eup %3752  ;;  %v1844_v12 = vadd.f32 1.0, %v4635_v52 }
 0x1b2   : > { %v1370_v34 = vmul.f32 0.044715, %v1242_v38  ;;  %v1623_v33 = vmul.f32 0.7978846, %v1495_v47  ;;  %v1625_v18 = vmul.f32 0.7978846, %v1497_v55  ;;  %v1496_v54 = vadd.f32 %v1368_v10, %v4983_v57 }
 0x1b3   : > { %6540 = vst [vmem:[#allocation89_spill] sm:$0xff] %v5032_v51  ;;  %3758 = vtanh.f32 %v1620_v5  ;;  %v1848_v14 = vadd.f32 1.0, %v4697_v7  ;;  %v1846_v53 = vadd.f32 1.0, %v4645_v58  ;;  %v5037_v63 = vpop.f32.mrb[45].mxu1  ;;  %v5039_v39 = vpop.f32.mrb[46].mxu0  ;;  %v1972_v47 = vmul.f32 0.5, %v1844_v12 }
 0x1b4   : > { %v1498_v46 = vadd.f32 %v1370_v34, %v4995_v45  ;;  %6541 = vst [vmem:[#allocation90_spill] sm:$0xff] %v5037_v63  ;;  %6542 = vst [vmem:[#allocation91_spill] sm:$0xff] %v5039_v39  ;;  %3760 = vtanh.f32 %v1622_v35  ;;  %v1624_v38 = vmul.f32 0.7978846, %v1496_v54  ;;  %v1850_v55 = vadd.f32 1.0, %v4713_v15  ;;  %v5042_v10 = vpop.f32.mrb[46].mxu1 }
 0x1b5   : > { %6543 = vst [vmem:[#allocation92_spill] sm:$0xff] %v5042_v10  ;;  %v5044_v52 = vpop.f32.mrb[47].mxu0  ;;  %3762 = vtanh.f32 %v1623_v33  ;;  %v1976_v34 = vmul.f32 0.5, %v1848_v14  ;;  %v1974_v51 = vmul.f32 0.5, %v1846_v53  ;;  %v5046_v7 = vpop.f32.mrb[47].mxu1  ;;  %v2100_v58 = vmul.f32 %v1972_v47, %v4479_v41  ;;  %v6546_v54 = vld [vmem:[#allocation18_spill] sm:$0xff] }
 0x1b6   : > { %6544 = vst [vmem:[#allocation93_spill] sm:$0xff] %v5044_v52  ;;  %v1626_v5 = vmul.f32 0.7978846, %v1498_v46  ;;  %6545 = vst [vmem:[#allocation94_spill] sm:$0xff] %v5046_v7  ;;  %3764 = vtanh.f32 %v1625_v18  ;;  %v1978_v63 = vmul.f32 0.5, %v1850_v55  ;;  %v1843_v35 = vadd.f32 1.0, %v4617_v4 }
 0x1b7   : > { %3766 = vtanh.f32 %v1624_v38  ;;  %v2104_v12 = vmul.f32 %v1976_v34, %v6546_v54  ;;  %v6547_v15 = vld [vmem:[#allocation15_spill] sm:$0xff]  ;;  %v6548_v10 = vld [vmem:[#allocation28_spill] sm:$0xff]  ;;  %v1849_v41 = vadd.f32 1.0, %v6551_v59  ;;  %v5058_v4 = vadd.f32 %v4718_v24, %v4406_v25 }
 0x1b8   : > { %v2102_v39 = vmul.f32 %v1974_v51, %v6547_v15  ;;  %v1847_v36 = vadd.f32 1.0, %v6548_v10  ;;  %3768 = vtanh.f32 %v1626_v5  ;;  %v6549_v33 = vld [vmem:[#allocation19_spill] sm:$0xff]  ;;  %v1971_v14 = vmul.f32 0.5, %v1843_v35  ;;  %v6550_v53 = vld [vmem:[#allocation24_spill] sm:$0xff]  ;;  %v6553_v51 = vld [vmem:[#allocation13_spill] sm:$0xff] }
 0x1b9   : > { %v2106_v46 = vmul.f32 %v1978_v63, %v6549_v33  ;;  %v1845_v52 = vadd.f32 1.0, %v6550_v53  ;;  %v2256_v7 = vpack.c.bf16 %v2104_v12, %v2100_v58  ;;  %6552 = vst [vmem:[#allocation18_spill] sm:$0xff] %v5058_v4  ;;  %v5065_v63 = vadd.f32 %v4720_v40, %v4408_v26  ;;  %v6556_v58 = vld [vmem:[#allocation36_spill] sm:$0xff] }
 0x1ba   : > { %v1975_v18 = vmul.f32 0.5, %v1847_v36  ;;  %v5060_v38 = vpop.eup %3754  ;;  %v2099_v55 = vmul.f32 %v1971_v14, %v6553_v51  ;;  %v6555_v36 = vld [vmem:[#allocation16_spill] sm:$0xff]  ;;  %v1977_v59 = vmul.f32 0.5, %v1849_v41  ;;  %v1115_v24 = vmul.f32 %v5058_v4, %v5058_v4 }
 0x1bb   : > { %v2258_v47 = vpack.c.bf16 %v2106_v46, %v2102_v39  ;;  %v1973_v10 = vmul.f32 0.5, %v1845_v52  ;;  %6554 = vst [vmem:[#allocation15_spill] sm:$0xff] %v5065_v63  ;;  %v5067_v5 = vpop.eup %3756  ;;  %2611 = vmatprep.mubr.bf16.mxu0 %v2256_v7  ;;  %v5074_v35 = vadd.f32 %v6556_v58, %v4410_v27  ;;  %v6558_v39 = vld [vmem:[#allocation14_spill] sm:$0xff]  ;;  %v1117_v40 = vmul.f32 %v5065_v63, %v5065_v63  ;;  %v6562_v46 = vld [vmem:[#allocation17_spill] sm:$0xff] }
 0x1bc   : > { %v2103_v34 = vmul.f32 %v1975_v18, %v6555_v36  ;;  %v5081_v54 = vadd.f32 %v4730_v44, %v4412_v28  ;;  %v6560_v7 = vld [vmem:[#allocation38_spill] sm:$0xff]  ;;  %v2105_v14 = vmul.f32 %v1977_v59, %v6562_v46  ;;  %v1243_v53 = vmul.f32 %v1115_v24, %v5058_v4  ;;  %v5104_v36 = vpop.f32.mrb[48].mxu0 }
 0x1bd   : > { %6557 = vst [vmem:[#allocation28_spill] sm:$0xff] %v5074_v35  ;;  %2772 = vmatprep.mubr.bf16.mxu1 %v2258_v47  ;;  %v2101_v52 = vmul.f32 %v1973_v10, %v6558_v39  ;;  %v5085_v12 = vadd.f32 %v6560_v7, %v4406_v25  ;;  %v5087_v15 = vpop.eup %3758  ;;  %v1116_v18 = vmul.f32 %v5074_v35, %v5074_v35  ;;  %v6563_v10 = vld [vmem:[#allocation39_spill] sm:$0xff]  ;;  %6565 = vst [vmem:[#allocation13_spill] sm:$0xff] %v5104_v36 }
 0x1be   : > { %6559 = vst [vmem:[#allocation19_spill] sm:$0xff] %v5081_v54  ;;  %v2255_v33 = vpack.c.bf16 %v2103_v34, %v2099_v55  ;;  %v5093_v41 = vpop.eup %3760  ;;  %v1245_v47 = vmul.f32 %v1117_v40, %v5065_v63  ;;  %v1118_v44 = vmul.f32 %v5081_v54, %v5081_v54  ;;  %v5102_v55 = vadd.f32 %v6563_v10, %v4408_v26 }
 0x1bf   : > { %6561 = vst [vmem:[#allocation24_spill] sm:$0xff] %v5085_v12  ;;  %v1119_v51 = vmul.f32 %v5085_v12, %v5085_v12  ;;  %v5106_v34 = vpop.eup %3762  ;;  %v2257_v59 = vpack.c.bf16 %v2105_v14, %v2101_v52  ;;  %v1371_v24 = vmul.f32 0.044715, %v1243_v53  ;;  %v1244_v58 = vmul.f32 %v1116_v18, %v5074_v35 }
 0x1c0   : > { %6564 = vst [vmem:[#allocation29_spill] sm:$0xff] %v5102_v55  ;;  %2612 = vmatmul.mubr.bf16.gmra.mrb[68].mxu0 %v2255_v33  ;;  %v5111_v39 = vadd.f32 %v4748_v23, %v4410_v27  ;;  %v5113_v40 = vpop.eup %3764  ;;  %v1373_v7 = vmul.f32 0.044715, %v1245_v47  ;;  %v1246_v46 = vmul.f32 %v1118_v44, %v5081_v54  ;;  %v1121_v36 = vmul.f32 %v5102_v55, %v5102_v55 }
 0x1c1   : > { %6567 = vst [vmem:[#allocation36_spill] sm:$0xff] %v5113_v40  ;;  %v1247_v10 = vmul.f32 %v1119_v51, %v5085_v12  ;;  %v5119_v3 = vpop.eup %3766  ;;  %2773 = vmatmul.mubr.bf16.gmra.mrb[68].mxu1 %v2257_v59  ;;  %v1499_v52 = vadd.f32 %v1371_v24, %v5058_v4  ;;  %v1372_v33 = vmul.f32 0.044715, %v1244_v58  ;;  %v5126_v14 = vadd.f32 %v4750_v50, %v4412_v28  ;;  %v5136_v4 = vpop.f32.mrb[48].mxu1 }
 0x1c2   : > { %6566 = vst [vmem:[#allocation16_spill] sm:$0xff] %v5111_v39  ;;  %v1120_v23 = vmul.f32 %v5111_v39, %v5111_v39  ;;  %v5128_v53 = vpop.eup %3768  ;;  %v1501_v18 = vadd.f32 %v1373_v7, %v5065_v63  ;;  %v1374_v47 = vmul.f32 0.044715, %v1246_v46  ;;  %v1249_v51 = vmul.f32 %v1121_v36, %v5102_v55  ;;  %6569 = vst [vmem:[#allocation38_spill] sm:$0xff] %v5136_v4  ;;  %v5140_v46 = vpop.f32.mrb[49].mxu0 }
 0x1c3   : > { %6568 = vst [vmem:[#allocation14_spill] sm:$0xff] %v5126_v14  ;;  %v1375_v44 = vmul.f32 0.044715, %v1247_v10  ;;  %v1627_v49 = vmul.f32 0.7978846, %v1499_v52  ;;  %v1500_v59 = vadd.f32 %v1372_v33, %v5074_v35  ;;  %v1122_v58 = vmul.f32 %v5126_v14, %v5126_v14  ;;  %6570 = vst [vmem:[#allocation17_spill] sm:$0xff] %v5140_v46 }
 0x1c4   : > { %v1248_v24 = vmul.f32 %v1120_v23, %v5111_v39  ;;  %v1629_v50 = vmul.f32 0.7978846, %v1501_v18  ;;  %v1502_v45 = vadd.f32 %v1374_v47, %v5081_v54  ;;  %v1377_v7 = vmul.f32 0.044715, %v1249_v51  ;;  %v5143_v33 = vpop.f32.mrb[49].mxu1  ;;  %v5146_v18 = vpop.f32.mrb[50].mxu0 }
 0x1c5   : > { %v1503_v40 = vadd.f32 %v1375_v44, %v5085_v12  ;;  %3770 = vtanh.f32 %v1627_v49  ;;  %v1628_v36 = vmul.f32 0.7978846, %v1500_v59  ;;  %v1250_v52 = vmul.f32 %v1122_v58, %v5126_v14  ;;  %6571 = vst [vmem:[#allocation39_spill] sm:$0xff] %v5143_v33  ;;  %6572 = vst [vmem:[#allocation95_spill] sm:$0xff] %v5146_v18  ;;  %v6573_v51 = vld [vmem:[#allocation43_spill] sm:$0xff]  ;;  %v5150_v49 = vpop.f32.mrb[50].mxu1 }
 0x1c6   : > { %v1376_v10 = vmul.f32 0.044715, %v1248_v24  ;;  %3772 = vtanh.f32 %v1629_v50  ;;  %v1630_v23 = vmul.f32 0.7978846, %v1502_v45  ;;  %v1505_v4 = vadd.f32 %v1377_v7, %v5102_v55  ;;  %6574 = vst [vmem:[#allocation43_spill] sm:$0xff] %v5150_v49  ;;  %v5154_v45 = vpop.f32.mrb[51].mxu0 }
 0x1c7   : > { %v1631_v63 = vmul.f32 0.7978846, %v1503_v40  ;;  %3774 = vtanh.f32 %v1628_v36  ;;  %v1378_v44 = vmul.f32 0.044715, %v1250_v52  ;;  %v1852_v46 = vadd.f32 1.0, %v6573_v51  ;;  %6575 = vst [vmem:[#allocation96_spill] sm:$0xff] %v5154_v45 }
 0x1c8   : > { %v1504_v47 = vadd.f32 %v1376_v10, %v5111_v39  ;;  %3776 = vtanh.f32 %v1630_v23  ;;  %v1633_v59 = vmul.f32 0.7978846, %v1505_v4  ;;  %v1856_v24 = vadd.f32 1.0, %v4812_v13  ;;  %v5157_v36 = vpop.f32.mrb[51].mxu1  ;;  %v6577_v23 = vld [vmem:[#allocation22_spill] sm:$0xff]  ;;  %v6578_v49 = vld [vmem:[#allocation37_spill] sm:$0xff] }
 0x1c9   : > { %v1854_v58 = vadd.f32 1.0, %v4770_v2  ;;  %3778 = vtanh.f32 %v1631_v63  ;;  %v1506_v50 = vadd.f32 %v1378_v44, %v5126_v14  ;;  %v1980_v7 = vmul.f32 0.5, %v1852_v46  ;;  %6576 = vst [vmem:[#allocation97_spill] sm:$0xff] %v5157_v36  ;;  %v6579_v18 = vld [vmem:[#allocation27_spill] sm:$0xff] }
 0x1ca   : > { %v1632_v40 = vmul.f32 0.7978846, %v1504_v47  ;;  %3780 = vtanh.f32 %v1633_v59  ;;  %v1984_v10 = vmul.f32 0.5, %v1856_v24  ;;  %v1858_v52 = vadd.f32 1.0, %v4825_v61  ;;  %v6580_v47 = vld [vmem:[#allocation23_spill] sm:$0xff]  ;;  %v6581_v59 = vld [vmem:[#allocation42_spill] sm:$0xff] }
 0x1cb   : > { %v1982_v51 = vmul.f32 0.5, %v1854_v58  ;;  %v1634_v4 = vmul.f32 0.7978846, %v1506_v50  ;;  %v2108_v13 = vmul.f32 %v1980_v7, %v6577_v23  ;;  %v1851_v2 = vadd.f32 1.0, %v6578_v49  ;;  %v6583_v7 = vld [vmem:[#allocation46_spill] sm:$0xff] }
 0x1cc   : > { %3782 = vtanh.f32 %v1632_v40  ;;  %v2112_v45 = vmul.f32 %v1984_v10, %v6579_v18  ;;  %v1986_v63 = vmul.f32 0.5, %v1858_v52  ;;  %v1855_v46 = vadd.f32 1.0, %v4794_v43  ;;  %v6582_v40 = vld [vmem:[#allocation30_spill] sm:$0xff]  ;;  %v6586_v10 = vld [vmem:[#allocation20_spill] sm:$0xff] }
 0x1cd   : > { %v2110_v33 = vmul.f32 %v1982_v51, %v6580_v47  ;;  %3784 = vtanh.f32 %v1634_v4  ;;  %v1979_v44 = vmul.f32 0.5, %v1851_v2  ;;  %v1853_v24 = vadd.f32 1.0, %v6581_v59  ;;  %v6587_v4 = vld [vmem:[#allocation47_spill] sm:$0xff]  ;;  %v6591_v47 = vld [vmem:[#allocation49_spill] sm:$0xff] }
 0x1ce   : > { %v1857_v61 = vadd.f32 1.0, %v4803_v0  ;;  %v2260_v58 = vpack.c.bf16 %v2112_v45, %v2108_v13  ;;  %v2114_v50 = vmul.f32 %v1986_v63, %v6582_v40  ;;  %v1983_v36 = vmul.f32 0.5, %v1855_v46  ;;  %v6590_v45 = vld [vmem:[#allocation25_spill] sm:$0xff] }
 0x1cf   : > { %v5170_v49 = vadd.f32 %v6583_v7, %v4406_v25  ;;  %v5172_v18 = vpop.eup %3770  ;;  %v2107_v52 = vmul.f32 %v1979_v44, %v6586_v10  ;;  %v1981_v51 = vmul.f32 0.5, %v1853_v24  ;;  %v5177_v23 = vadd.f32 %v6587_v4, %v4408_v26  ;;  %v6592_v59 = vld [vmem:[#allocation21_spill] sm:$0xff] }
 0x1d0   : > { %6585 = vst [vmem:[#allocation37_spill] sm:$0xff] %v5172_v18  ;;  %v1985_v43 = vmul.f32 0.5, %v1857_v61  ;;  %v5179_v2 = vpop.eup %3772  ;;  %2619 = vmatprep.mubr.bf16.mxu0 %v2260_v58  ;;  %v2262_v0 = vpack.c.bf16 %v2114_v50, %v2110_v33  ;;  %v2111_v13 = vmul.f32 %v1983_v36, %v6590_v45  ;;  %v5186_v46 = vadd.f32 %v6591_v47, %v4410_v27  ;;  %v6593_v61 = vld [vmem:[#allocation26_spill] sm:$0xff] }
 0x1d1   : > { %6584 = vst [vmem:[#allocation22_spill] sm:$0xff] %v5170_v49  ;;  %6588 = vst [vmem:[#allocation27_spill] sm:$0xff] %v5177_v23  ;;  %v1123_v63 = vmul.f32 %v5170_v49, %v5170_v49  ;;  %v5188_v44 = vpop.eup %3774  ;;  %v2109_v24 = vmul.f32 %v1981_v51, %v6592_v59  ;;  %v1125_v7 = vmul.f32 %v5177_v23, %v5177_v23  ;;  %v6594_v33 = vld [vmem:[#allocation50_spill] sm:$0xff]  ;;  %v6596_v51 = vld [vmem:[#allocation51_spill] sm:$0xff] }
 0x1d2   : > { %6589 = vst [vmem:[#allocation23_spill] sm:$0xff] %v5179_v2  ;;  %v2113_v40 = vmul.f32 %v1985_v43, %v6593_v61  ;;  %v5196_v58 = vadd.f32 %v6594_v33, %v4412_v28  ;;  %v5198_v36 = vpop.eup %3776  ;;  %2780 = vmatprep.mubr.bf16.mxu1 %v2262_v0  ;;  %v2259_v50 = vpack.c.bf16 %v2111_v13, %v2107_v52  ;;  %v6599_v0 = vld [vmem:[#allocation52_spill] sm:$0xff]  ;;  %v5216_v13 = vpop.f32.mrb[52].mxu0 }
 0x1d3   : > { %v1251_v10 = vmul.f32 %v1123_v63, %v5170_v49  ;;  %v1124_v4 = vmul.f32 %v5186_v46, %v5186_v46  ;;  %v5205_v45 = vadd.f32 %v6596_v51, %v4406_v25  ;;  %v5207_v43 = vpop.eup %3778  ;;  %v1253_v59 = vmul.f32 %v1125_v7, %v5177_v23  ;;  %6601 = vst [vmem:[#allocation47_spill] sm:$0xff] %v5216_v13 }
 0x1d4   : > { %6595 = vst [vmem:[#allocation42_spill] sm:$0xff] %v5196_v58  ;;  %6598 = vst [vmem:[#allocation46_spill] sm:$0xff] %v5207_v43  ;;  %v2261_v47 = vpack.c.bf16 %v2113_v40, %v2109_v24  ;;  %v1126_v61 = vmul.f32 %v5196_v58, %v5196_v58  ;;  %v5214_v52 = vadd.f32 %v6599_v0, %v4408_v26  ;;  %v5218_v63 = vpop.eup %3780  ;;  %2620 = vmatmul.mubr.bf16.gmra.mrb[72].mxu0 %v2259_v50  ;;  %v6603_v40 = vld [vmem:[#allocation53_spill] sm:$0xff]  ;;  %v6605_v50 = vld [vmem:[#allocation54_spill] sm:$0xff] }
 0x1d5   : > { %6597 = vst [vmem:[#allocation30_spill] sm:$0xff] %v5205_v45  ;;  %6602 = vst [vmem:[#allocation25_spill] sm:$0xff] %v5218_v63  ;;  %v1379_v33 = vmul.f32 0.044715, %v1251_v10  ;;  %v1252_v51 = vmul.f32 %v1124_v4, %v5186_v46  ;;  %v1127_v24 = vmul.f32 %v5205_v45, %v5205_v45  ;;  %v5225_v7 = vadd.f32 %v6603_v40, %v4410_v27 }
 0x1d6   : > { %6600 = vst [vmem:[#allocation20_spill] sm:$0xff] %v5214_v52  ;;  %v5227_v55 = vpop.eup %3782  ;;  %2781 = vmatmul.mubr.bf16.gmra.mrb[72].mxu1 %v2261_v47  ;;  %v1381_v0 = vmul.f32 0.044715, %v1253_v59  ;;  %v1254_v12 = vmul.f32 %v1126_v61, %v5196_v58  ;;  %v1129_v13 = vmul.f32 %v5214_v52, %v5214_v52  ;;  %v5234_v10 = vadd.f32 %v6605_v50, %v4412_v28 }
 0x1d7   : > { %6604 = vst [vmem:[#allocation49_spill] sm:$0xff] %v5225_v7  ;;  %v1507_v4 = vadd.f32 %v1379_v33, %v5170_v49  ;;  %v1380_v14 = vmul.f32 0.044715, %v1252_v51  ;;  %v1255_v63 = vmul.f32 %v1127_v24, %v5205_v45  ;;  %v1128_v40 = vmul.f32 %v5225_v7, %v5225_v7  ;;  %v5240_v2 = vpop.eup %3784  ;;  %v5248_v24 = vpop.f32.mrb[52].mxu1 }
 0x1d8   : > { %6606 = vst [vmem:[#allocation21_spill] sm:$0xff] %v5234_v10  ;;  %v1509_v47 = vadd.f32 %v1381_v0, %v5177_v23  ;;  %v1382_v59 = vmul.f32 0.044715, %v1254_v12  ;;  %v1257_v61 = vmul.f32 %v1129_v13, %v5214_v52  ;;  %v1130_v54 = vmul.f32 %v5234_v10, %v5234_v10  ;;  %6607 = vst [vmem:[#allocation26_spill] sm:$0xff] %v5248_v24  ;;  %v5252_v12 = vpop.f32.mrb[53].mxu0  ;;  %v5255_v35 = vpop.f32.mrb[53].mxu1 }
 0x1d9   : > { %v1635_v50 = vmul.f32 0.7978846, %v1507_v4  ;;  %v1508_v43 = vadd.f32 %v1380_v14, %v5186_v46  ;;  %v1383_v33 = vmul.f32 0.044715, %v1255_v63  ;;  %v1256_v51 = vmul.f32 %v1128_v40, %v5225_v7  ;;  %6608 = vst [vmem:[#allocation50_spill] sm:$0xff] %v5252_v12  ;;  %6609 = vst [vmem:[#allocation51_spill] sm:$0xff] %v5255_v35 }
 0x1da   : > { %v1637_v49 = vmul.f32 0.7978846, %v1509_v47  ;;  %v1510_v39 = vadd.f32 %v1382_v59, %v5196_v58  ;;  %v1385_v18 = vmul.f32 0.044715, %v1257_v61  ;;  %v1258_v0 = vmul.f32 %v1130_v54, %v5234_v10  ;;  %v5258_v47 = vpop.f32.mrb[54].mxu0 }
 0x1db   : > { %3786 = vtanh.f32 %v1635_v50  ;;  %v1636_v13 = vmul.f32 0.7978846, %v1508_v43  ;;  %v1511_v23 = vadd.f32 %v1383_v33, %v5205_v45  ;;  %v1384_v4 = vmul.f32 0.044715, %v1256_v51  ;;  %6610 = vst [vmem:[#allocation52_spill] sm:$0xff] %v5258_v47  ;;  %v5262_v50 = vpop.f32.mrb[54].mxu1 }
 0x1dc   : > { %3788 = vtanh.f32 %v1637_v49  ;;  %v1638_v14 = vmul.f32 0.7978846, %v1510_v39  ;;  %v1513_v63 = vadd.f32 %v1385_v18, %v5214_v52  ;;  %v1386_v40 = vmul.f32 0.044715, %v1258_v0  ;;  %6611 = vst [vmem:[#allocation53_spill] sm:$0xff] %v5262_v50  ;;  %v5266_v39 = vpop.f32.mrb[55].mxu0 }
 0x1dd   : > { %3790 = vtanh.f32 %v1636_v13  ;;  %v1639_v59 = vmul.f32 0.7978846, %v1511_v23  ;;  %v1512_v54 = vadd.f32 %v1384_v4, %v5225_v7  ;;  %v1860_v61 = vadd.f32 1.0, %v4873_v32  ;;  %6612 = vst [vmem:[#allocation54_spill] sm:$0xff] %v5266_v39  ;;  %v5269_v23 = vpop.f32.mrb[55].mxu1  ;;  %v6615_v50 = vld [vmem:[#allocation58_spill] sm:$0xff] }
 0x1de   : > { %3792 = vtanh.f32 %v1638_v14  ;;  %v1641_v43 = vmul.f32 0.7978846, %v1513_v63  ;;  %v1514_v33 = vadd.f32 %v1386_v40, %v5234_v10  ;;  %v1864_v49 = vadd.f32 1.0, %v4906_v11  ;;  %6613 = vst [vmem:[#allocation98_spill] sm:$0xff] %v5269_v23  ;;  %v6614_v14 = vld [vmem:[#allocation33_spill] sm:$0xff] }
 0x1df   : > { %3794 = vtanh.f32 %v1639_v59  ;;  %v1640_v18 = vmul.f32 0.7978846, %v1512_v54  ;;  %v1988_v51 = vmul.f32 0.5, %v1860_v61  ;;  %v1862_v0 = vadd.f32 1.0, %v4882_v22  ;;  %v6616_v39 = vld [vmem:[#allocation41_spill] sm:$0xff]  ;;  %v6618_v22 = vld [vmem:[#allocation34_spill] sm:$0xff] }
 0x1e0   : > { %3796 = vtanh.f32 %v1641_v43  ;;  %v1642_v13 = vmul.f32 0.7978846, %v1514_v33  ;;  %v1992_v32 = vmul.f32 0.5, %v1864_v49  ;;  %v1866_v4 = vadd.f32 1.0, %v4921_v20  ;;  %v6617_v61 = vld [vmem:[#allocation69_spill] sm:$0xff] }
 0x1e1   : > { %3798 = vtanh.f32 %v1640_v18  ;;  %v2116_v63 = vmul.f32 %v1988_v51, %v6614_v14  ;;  %v1990_v40 = vmul.f32 0.5, %v1862_v0  ;;  %v1859_v11 = vadd.f32 1.0, %v6615_v50  ;;  %v6619_v43 = vld [vmem:[#allocation61_spill] sm:$0xff]  ;;  %v6620_v18 = vld [vmem:[#allocation44_spill] sm:$0xff]  ;;  %v6621_v0 = vld [vmem:[#allocation59_spill] sm:$0xff] }
 0x1e2   : > { %3800 = vtanh.f32 %v1642_v13  ;;  %v2120_v59 = vmul.f32 %v1992_v32, %v6616_v39  ;;  %v1994_v54 = vmul.f32 0.5, %v1866_v4  ;;  %v1863_v47 = vadd.f32 1.0, %v6617_v61  ;;  %v6624_v39 = vld [vmem:[#allocation31_spill] sm:$0xff] }
 0x1e3   : > { %v2118_v35 = vmul.f32 %v1990_v40, %v6618_v22  ;;  %v1987_v23 = vmul.f32 0.5, %v1859_v11  ;;  %v1861_v33 = vadd.f32 1.0, %v6619_v43  ;;  %v1865_v49 = vadd.f32 1.0, %v4899_v21  ;;  %v6625_v40 = vld [vmem:[#allocation60_spill] sm:$0xff] }
 0x1e4   : > { %v2264_v20 = vpack.c.bf16 %v2120_v59, %v2116_v63  ;;  %v2122_v12 = vmul.f32 %v1994_v54, %v6620_v18  ;;  %v1991_v51 = vmul.f32 0.5, %v1863_v47  ;;  %v5282_v50 = vadd.f32 %v6621_v0, %v4406_v25  ;;  %v6628_v63 = vld [vmem:[#allocation35_spill] sm:$0xff]  ;;  %v6630_v43 = vld [vmem:[#allocation32_spill] sm:$0xff] }
 0x1e5   : > { %v5284_v13 = vpop.eup %3786  ;;  %v2115_v32 = vmul.f32 %v1987_v23, %v6624_v39  ;;  %v1989_v4 = vmul.f32 0.5, %v1861_v33  ;;  %v1993_v14 = vmul.f32 0.5, %v1865_v49  ;;  %v5289_v11 = vadd.f32 %v6625_v40, %v4408_v26  ;;  %v6629_v54 = vld [vmem:[#allocation63_spill] sm:$0xff]  ;;  %v6631_v49 = vld [vmem:[#allocation40_spill] sm:$0xff] }
 0x1e6   : > { %6622 = vst [vmem:[#allocation33_spill] sm:$0xff] %v5282_v50  ;;  %6623 = vst [vmem:[#allocation58_spill] sm:$0xff] %v5284_v13  ;;  %v5291_v61 = vpop.eup %3788  ;;  %2627 = vmatprep.mubr.bf16.mxu0 %v2264_v20  ;;  %v2266_v21 = vpack.c.bf16 %v2122_v12, %v2118_v35  ;;  %v2119_v47 = vmul.f32 %v1991_v51, %v6628_v63  ;;  %v1131_v59 = vmul.f32 %v5282_v50, %v5282_v50  ;;  %v6632_v35 = vld [vmem:[#allocation64_spill] sm:$0xff] }
 0x1e7   : > { %6626 = vst [vmem:[#allocation41_spill] sm:$0xff] %v5289_v11  ;;  %6627 = vst [vmem:[#allocation69_spill] sm:$0xff] %v5291_v61  ;;  %v5298_v22 = vadd.f32 %v6629_v54, %v4410_v27  ;;  %v5300_v23 = vpop.eup %3790  ;;  %v2117_v33 = vmul.f32 %v1989_v4, %v6630_v43  ;;  %v2121_v18 = vmul.f32 %v1993_v14, %v6631_v49  ;;  %v6633_v4 = vld [vmem:[#allocation65_spill] sm:$0xff] }
 0x1e8   : > { %v1133_v0 = vmul.f32 %v5289_v11, %v5289_v11  ;;  %v5308_v12 = vadd.f32 %v6632_v35, %v4412_v28  ;;  %v5310_v20 = vpop.eup %3792  ;;  %2788 = vmatprep.mubr.bf16.mxu1 %v2266_v21  ;;  %v2263_v51 = vpack.c.bf16 %v2119_v47, %v2115_v32  ;;  %v1259_v39 = vmul.f32 %v1131_v59, %v5282_v50  ;;  %v6635_v21 = vld [vmem:[#allocation66_spill] sm:$0xff]  ;;  %v5328_v47 = vpop.f32.mrb[56].mxu0 }
 0x1e9   : > { %v1132_v40 = vmul.f32 %v5298_v22, %v5298_v22  ;;  %v5317_v63 = vadd.f32 %v6633_v4, %v4406_v25  ;;  %v5319_v14 = vpop.eup %3794  ;;  %v2265_v54 = vpack.c.bf16 %v2121_v18, %v2117_v33  ;;  %v5326_v32 = vadd.f32 %v6635_v21, %v4408_v26  ;;  %6636 = vst [vmem:[#allocation61_spill] sm:$0xff] %v5328_v47  ;;  %v6638_v18 = vld [vmem:[#allocation67_spill] sm:$0xff] }
 0x1ea   : > { %6634 = vst [vmem:[#allocation34_spill] sm:$0xff] %v5319_v14  ;;  %v1261_v43 = vmul.f32 %v1133_v0, %v5289_v11  ;;  %v1134_v49 = vmul.f32 %v5308_v12, %v5308_v12  ;;  %v5330_v59 = vpop.eup %3796  ;;  %2628 = vmatmul.mubr.bf16.gmra.mrb[76].mxu0 %v2263_v51  ;;  %v1387_v35 = vmul.f32 0.044715, %v1259_v39  ;;  %v5337_v0 = vadd.f32 %v6638_v18, %v4410_v27  ;;  %v6639_v51 = vld [vmem:[#allocation68_spill] sm:$0xff] }
 0x1eb   : > { %6637 = vst [vmem:[#allocation44_spill] sm:$0xff] %v5330_v59  ;;  %v1260_v4 = vmul.f32 %v1132_v40, %v5298_v22  ;;  %v1135_v33 = vmul.f32 %v5317_v63, %v5317_v63  ;;  %v5339_v24 = vpop.eup %3798  ;;  %2789 = vmatmul.mubr.bf16.gmra.mrb[76].mxu1 %v2265_v54  ;;  %v1137_v47 = vmul.f32 %v5326_v32, %v5326_v32 }
 0x1ec   : > { %v1389_v21 = vmul.f32 0.044715, %v1261_v43  ;;  %v1262_v52 = vmul.f32 %v1134_v49, %v5308_v12  ;;  %v5346_v39 = vadd.f32 %v6639_v51, %v4412_v28  ;;  %v5348_v40 = vpop.eup %3800  ;;  %v1515_v45 = vadd.f32 %v1387_v35, %v5282_v50 }
 0x1ed   : > { %v1388_v10 = vmul.f32 0.044715, %v1260_v4  ;;  %v1263_v18 = vmul.f32 %v1135_v33, %v5317_v63  ;;  %v1136_v54 = vmul.f32 %v5337_v0, %v5337_v0  ;;  %v1265_v59 = vmul.f32 %v1137_v47, %v5326_v32  ;;  %v5360_v4 = vpop.f32.mrb[56].mxu1 }
 0x1ee   : > { %v1517_v43 = vadd.f32 %v1389_v21, %v5289_v11  ;;  %v1390_v49 = vmul.f32 0.044715, %v1262_v52  ;;  %v1138_v61 = vmul.f32 %v5346_v39, %v5346_v39  ;;  %v1643_v51 = vmul.f32 0.7978846, %v1515_v45  ;;  %6640 = vst [vmem:[#allocation59_spill] sm:$0xff] %v5360_v4  ;;  %v5364_v52 = vpop.f32.mrb[57].mxu0 }
 0x1ef   : > { %v1516_v58 = vadd.f32 %v1388_v10, %v5298_v22  ;;  %v1391_v14 = vmul.f32 0.044715, %v1263_v18  ;;  %v1264_v35 = vmul.f32 %v1136_v54, %v5337_v0  ;;  %v1393_v7 = vmul.f32 0.044715, %v1265_v59  ;;  %6641 = vst [vmem:[#allocation31_spill] sm:$0xff] %v5364_v52  ;;  %v5367_v13 = vpop.f32.mrb[57].mxu1 }
 0x1f0   : > { %v1645_v33 = vmul.f32 0.7978846, %v1517_v43  ;;  %v1518_v50 = vadd.f32 %v1390_v49, %v5308_v12  ;;  %v1266_v21 = vmul.f32 %v1138_v61, %v5346_v39  ;;  %3802 = vtanh.f32 %v1643_v51  ;;  %6642 = vst [vmem:[#allocation60_spill] sm:$0xff] %v5367_v13  ;;  %v5370_v43 = vpop.f32.mrb[58].mxu0  ;;  %v5374_v51 = vpop.f32.mrb[58].mxu1 }
 0x1f1   : > { %v1644_v47 = vmul.f32 0.7978846, %v1516_v58  ;;  %v1519_v11 = vadd.f32 %v1391_v14, %v5317_v63  ;;  %v1392_v45 = vmul.f32 0.044715, %v1264_v35  ;;  %v1521_v18 = vadd.f32 %v1393_v7, %v5326_v32  ;;  %6643 = vst [vmem:[#allocation35_spill] sm:$0xff] %v5370_v43  ;;  %6644 = vst [vmem:[#allocation63_spill] sm:$0xff] %v5374_v51 }
 0x1f2   : > { %3804 = vtanh.f32 %v1645_v33  ;;  %v1646_v10 = vmul.f32 0.7978846, %v1518_v50  ;;  %v1394_v54 = vmul.f32 0.044715, %v1266_v21  ;;  %v1868_v49 = vadd.f32 1.0, %v4975_v29  ;;  %v5378_v50 = vpop.f32.mrb[59].mxu0 }
 0x1f3   : > { %3806 = vtanh.f32 %v1644_v47  ;;  %v1647_v59 = vmul.f32 0.7978846, %v1519_v11  ;;  %v1520_v61 = vadd.f32 %v1392_v45, %v5337_v0  ;;  %v1649_v58 = vmul.f32 0.7978846, %v1521_v18  ;;  %6645 = vst [vmem:[#allocation32_spill] sm:$0xff] %v5378_v50  ;;  %v5381_v11 = vpop.f32.mrb[59].mxu1 }
 0x1f4   : > { %3808 = vtanh.f32 %v1646_v10  ;;  %v1522_v14 = vadd.f32 %v1394_v54, %v5346_v39  ;;  %v1872_v35 = vadd.f32 1.0, %v5020_v37  ;;  %v1996_v33 = vmul.f32 0.5, %v1868_v49  ;;  %6646 = vst [vmem:[#allocation40_spill] sm:$0xff] %v5381_v11  ;;  %v6647_v10 = vld [vmem:[#allocation55_spill] sm:$0xff] }
 0x1f5   : > { %3810 = vtanh.f32 %v1647_v59  ;;  %v1648_v7 = vmul.f32 0.7978846, %v1520_v61  ;;  %v1870_v21 = vadd.f32 1.0, %v4989_v56  ;;  %v1874_v45 = vadd.f32 1.0, %v5028_v48  ;;  %v6648_v56 = vld [vmem:[#allocation56_spill] sm:$0xff] }
 0x1f6   : > { %3812 = vtanh.f32 %v1649_v58  ;;  %v1650_v47 = vmul.f32 0.7978846, %v1522_v14  ;;  %v2000_v29 = vmul.f32 0.5, %v1872_v35  ;;  %v2124_v18 = vmul.f32 %v1996_v33, %v6647_v10 }
 0x1f7   : > { %3814 = vtanh.f32 %v1648_v7  ;;  %v1998_v54 = vmul.f32 0.5, %v1870_v21  ;;  %v1867_v37 = vadd.f32 1.0, %v4932_v31  ;;  %v2002_v61 = vmul.f32 0.5, %v1874_v45 }
 0x1f8   : > { %3816 = vtanh.f32 %v1650_v47  ;;  %v2128_v59 = vmul.f32 %v2000_v29, %v4860_v8  ;;  %v1871_v49 = vadd.f32 1.0, %v5009_v19  ;;  %v1869_v58 = vadd.f32 1.0, %v4937_v60  ;;  %v6650_v8 = vld [vmem:[#allocation45_spill] sm:$0xff] }
 0x1f9   : > { %v2126_v50 = vmul.f32 %v1998_v54, %v6648_v56  ;;  %v1995_v11 = vmul.f32 0.5, %v1867_v37  ;;  %v1873_v14 = vadd.f32 1.0, %v5015_v62  ;;  %v2130_v35 = vmul.f32 %v2002_v61, %v4880_v30  ;;  %v6652_v30 = vld [vmem:[#allocation57_spill] sm:$0xff]  ;;  %v6654_v37 = vld [vmem:[#allocation62_spill] sm:$0xff] }
 0x1fa   : > { %v2268_v48 = vpack.c.bf16 %v2128_v59, %v2124_v18  ;;  %v1999_v7 = vmul.f32 0.5, %v1871_v49  ;;  %v5394_v31 = vadd.f32 %v4895_v16, %v4406_v25  ;;  %v5396_v33 = vpop.eup %3802  ;;  %v1997_v19 = vmul.f32 0.5, %v1869_v58  ;;  %v6653_v18 = vld [vmem:[#allocation48_spill] sm:$0xff] }
 0x1fb   : > { %v2123_v21 = vmul.f32 %v1995_v11, %v6650_v8  ;;  %v2001_v47 = vmul.f32 0.5, %v1873_v14  ;;  %v5401_v29 = vadd.f32 %v4897_v9, %v4408_v26  ;;  %v2270_v62 = vpack.c.bf16 %v2130_v35, %v2126_v50  ;;  %v6655_v50 = vld [vmem:[#allocation70_spill] sm:$0xff] }
 0x1fc   : > { %6649 = vst [vmem:[#allocation64_spill] sm:$0xff] %v5394_v31  ;;  %v5403_v60 = vpop.eup %3804  ;;  %2635 = vmatprep.mubr.bf16.mxu0 %v2268_v48  ;;  %v2127_v45 = vmul.f32 %v1999_v7, %v6652_v30  ;;  %v1139_v16 = vmul.f32 %v5394_v31, %v5394_v31  ;;  %v5410_v10 = vadd.f32 %v4902_v1, %v4410_v27 }
 0x1fd   : > { %6651 = vst [vmem:[#allocation65_spill] sm:$0xff] %v5401_v29  ;;  %v5412_v11 = vpop.eup %3806  ;;  %v2125_v54 = vmul.f32 %v1997_v19, %v6653_v18  ;;  %v2129_v9 = vmul.f32 %v2001_v47, %v6654_v37  ;;  %v1141_v59 = vmul.f32 %v5401_v29, %v5401_v29  ;;  %v5420_v61 = vadd.f32 %v6655_v50, %v4412_v28  ;;  %v5440_v19 = vpop.f32.mrb[60].mxu0 }
 0x1fe   : > { %v5422_v49 = vpop.eup %3808  ;;  %2796 = vmatprep.mubr.bf16.mxu1 %v2270_v62  ;;  %v2267_v56 = vpack.c.bf16 %v2127_v45, %v2123_v21  ;;  %v1267_v1 = vmul.f32 %v1139_v16, %v5394_v31  ;;  %v1140_v58 = vmul.f32 %v5410_v10, %v5410_v10  ;;  %v5429_v14 = vadd.f32 %v4911_v42, %v4406_v25  ;;  %v6659_v45 = vld [vmem:[#allocation71_spill] sm:$0xff] }
 0x1ff   : > { %v5431_v48 = vpop.eup %3810  ;;  %v2269_v35 = vpack.c.bf16 %v2129_v9, %v2125_v54  ;;  %v1269_v7 = vmul.f32 %v1141_v59, %v5401_v29  ;;  %v1142_v8 = vmul.f32 %v5420_v61, %v5420_v61  ;;  %v5438_v21 = vadd.f32 %v4913_v17, %v4408_v26  ;;  %6658 = vst [vmem:[#allocation68_spill] sm:$0xff] %v5440_v19  ;;  %v6660_v9 = vld [vmem:[#allocation72_spill] sm:$0xff] }
 0x200   : > { %6656 = vst [vmem:[#allocation66_spill] sm:$0xff] %v5429_v14  ;;  %v5442_v47 = vpop.eup %3812  ;;  %2636 = vmatmul.mubr.bf16.gmra.mrb[80].mxu0 %v2267_v56  ;;  %v1395_v62 = vmul.f32 0.044715, %v1267_v1  ;;  %v1268_v42 = vmul.f32 %v1140_v58, %v5410_v10  ;;  %v1143_v30 = vmul.f32 %v5429_v14, %v5429_v14  ;;  %v5449_v16 = vadd.f32 %v6659_v45, %v4410_v27 }
 0x201   : > { %6657 = vst [vmem:[#allocation67_spill] sm:$0xff] %v5438_v21  ;;  %v5451_v18 = vpop.eup %3814  ;;  %2797 = vmatmul.mubr.bf16.gmra.mrb[80].mxu1 %v2269_v35  ;;  %v1397_v17 = vmul.f32 0.044715, %v1269_v7  ;;  %v1270_v54 = vmul.f32 %v1142_v8, %v5420_v61  ;;  %v1145_v37 = vmul.f32 %v5438_v21, %v5438_v21  ;;  %v5458_v59 = vadd.f32 %v6660_v9, %v4412_v28 }
 0x202   : > { %v5460_v50 = vpop.eup %3816  ;;  %v1523_v56 = vadd.f32 %v1395_v62, %v5394_v31  ;;  %v1396_v1 = vmul.f32 0.044715, %v1268_v42  ;;  %v1271_v58 = vmul.f32 %v1143_v30, %v5429_v14  ;;  %v1144_v35 = vmul.f32 %v5449_v16, %v5449_v16  ;;  %v5472_v42 = vpop.f32.mrb[60].mxu1 }
 0x203   : > { %6661 = vst [vmem:[#allocation55_spill] sm:$0xff] %v5458_v59  ;;  %v1525_v7 = vadd.f32 %v1397_v17, %v5401_v29  ;;  %v1398_v8 = vmul.f32 0.044715, %v1270_v54  ;;  %v1273_v45 = vmul.f32 %v1145_v37, %v5438_v21  ;;  %v1146_v19 = vmul.f32 %v5458_v59, %v5458_v59  ;;  %6662 = vst [vmem:[#allocation56_spill] sm:$0xff] %v5472_v42  ;;  %v5476_v54 = vpop.f32.mrb[61].mxu0  ;;  %v5479_v4 = vpop.f32.mrb[61].mxu1 }
 0x204   : > { %v1651_v9 = vmul.f32 0.7978846, %v1523_v56  ;;  %v1524_v51 = vadd.f32 %v1396_v1, %v5410_v10  ;;  %v1399_v43 = vmul.f32 0.044715, %v1271_v58  ;;  %v1272_v62 = vmul.f32 %v1144_v35, %v5449_v16  ;;  %6663 = vst [vmem:[#allocation45_spill] sm:$0xff] %v5476_v54  ;;  %6664 = vst [vmem:[#allocation57_spill] sm:$0xff] %v5479_v4 }
 0x205   : > { %v1653_v30 = vmul.f32 0.7978846, %v1525_v7  ;;  %v1526_v13 = vadd.f32 %v1398_v8, %v5420_v61  ;;  %v1401_v52 = vmul.f32 0.044715, %v1273_v45  ;;  %v1274_v17 = vmul.f32 %v1146_v19, %v5458_v59  ;;  %v5482_v7 = vpop.f32.mrb[62].mxu0 }
 0x206   : > { %3818 = vtanh.f32 %v1651_v9  ;;  %v1652_v37 = vmul.f32 0.7978846, %v1524_v51  ;;  %v1527_v29 = vadd.f32 %v1399_v43, %v5429_v14  ;;  %v1400_v56 = vmul.f32 0.044715, %v1272_v62  ;;  %6665 = vst [vmem:[#allocation48_spill] sm:$0xff] %v5482_v7  ;;  %v5486_v9 = vpop.f32.mrb[62].mxu1 }
 0x207   : > { %3820 = vtanh.f32 %v1653_v30  ;;  %v1654_v1 = vmul.f32 0.7978846, %v1526_v13  ;;  %v1529_v58 = vadd.f32 %v1401_v52, %v5438_v21  ;;  %v1402_v35 = vmul.f32 0.044715, %v1274_v17  ;;  %6666 = vst [vmem:[#allocation62_spill] sm:$0xff] %v5486_v9  ;;  %v5490_v13 = vpop.f32.mrb[63].mxu0 }
 0x208   : > { %3822 = vtanh.f32 %v1652_v37  ;;  %v1655_v8 = vmul.f32 0.7978846, %v1527_v29  ;;  %v1528_v19 = vadd.f32 %v1400_v56, %v5449_v16  ;;  %v1876_v45 = vadd.f32 1.0, %v5087_v15  ;;  %6667 = vst [vmem:[#allocation70_spill] sm:$0xff] %v5490_v13  ;;  %v5493_v29 = vpop.f32.mrb[63].mxu1 }
 0x209   : > { %3824 = vtanh.f32 %v1654_v1  ;;  %v1657_v43 = vmul.f32 0.7978846, %v1529_v58  ;;  %v1530_v51 = vadd.f32 %v1402_v35, %v5458_v59  ;;  %v1880_v62 = vadd.f32 1.0, %v5119_v3  ;;  %6668 = vst [vmem:[#allocation71_spill] sm:$0xff] %v5493_v29 }
 0x20a   : > { %3826 = vtanh.f32 %v1655_v8  ;;  %v1656_v52 = vmul.f32 0.7978846, %v1528_v19  ;;  %v2004_v30 = vmul.f32 0.5, %v1876_v45  ;;  %v1878_v17 = vadd.f32 1.0, %v5093_v41  ;;  %v6669_v41 = vld [vmem:[#allocation75_spill] sm:$0xff] }
 0x20b   : > { %3828 = vtanh.f32 %v1657_v43  ;;  %v1658_v37 = vmul.f32 0.7978846, %v1530_v51  ;;  %v2008_v15 = vmul.f32 0.5, %v1880_v62  ;;  %v1882_v56 = vadd.f32 1.0, %v5128_v53  ;;  %v6670_v51 = vld [vmem:[#allocation36_spill] sm:$0xff] }
 0x20c   : > { %3830 = vtanh.f32 %v1656_v52  ;;  %v2132_v1 = vmul.f32 %v2004_v30, %v4944_v6  ;;  %v2006_v58 = vmul.f32 0.5, %v1878_v17  ;;  %v1875_v3 = vadd.f32 1.0, %v5060_v38  ;;  %v6671_v52 = vld [vmem:[#allocation84_spill] sm:$0xff]  ;;  %v6672_v30 = vld [vmem:[#allocation78_spill] sm:$0xff] }
 0x20d   : > { %3832 = vtanh.f32 %v1658_v37  ;;  %v2136_v35 = vmul.f32 %v2008_v15, %v4983_v57  ;;  %v2010_v8 = vmul.f32 0.5, %v1882_v56  ;;  %v1879_v19 = vadd.f32 1.0, %v5106_v34  ;;  %v6674_v57 = vld [vmem:[#allocation73_spill] sm:$0xff]  ;;  %v6675_v56 = vld [vmem:[#allocation79_spill] sm:$0xff] }
 0x20e   : > { %v2134_v45 = vmul.f32 %v2006_v58, %v6669_v41  ;;  %v2003_v29 = vmul.f32 0.5, %v1875_v3  ;;  %v1877_v43 = vadd.f32 1.0, %v5067_v5  ;;  %v1881_v62 = vadd.f32 1.0, %v6670_v51  ;;  %v6677_v3 = vld [vmem:[#allocation76_spill] sm:$0xff] }
 0x20f   : > { %v2272_v53 = vpack.c.bf16 %v2136_v35, %v2132_v1  ;;  %v2138_v13 = vmul.f32 %v2010_v8, %v6671_v52  ;;  %v2007_v6 = vmul.f32 0.5, %v1879_v19  ;;  %v5506_v38 = vadd.f32 %v6672_v30, %v4406_v25  ;;  %v6678_v19 = vld [vmem:[#allocation80_spill] sm:$0xff] }
 0x210   : > { %v5508_v17 = vpop.eup %3818  ;;  %v2131_v37 = vmul.f32 %v2003_v29, %v6674_v57  ;;  %v2005_v34 = vmul.f32 0.5, %v1877_v43  ;;  %v2009_v15 = vmul.f32 0.5, %v1881_v62  ;;  %v5513_v58 = vadd.f32 %v6675_v56, %v4408_v26  ;;  %v6680_v43 = vld [vmem:[#allocation74_spill] sm:$0xff]  ;;  %v6681_v62 = vld [vmem:[#allocation77_spill] sm:$0xff] }
 0x211   : > { %6673 = vst [vmem:[#allocation72_spill] sm:$0xff] %v5506_v38  ;;  %v5515_v5 = vpop.eup %3820  ;;  %2643 = vmatprep.mubr.bf16.mxu0 %v2272_v53  ;;  %v2274_v1 = vpack.c.bf16 %v2138_v13, %v2134_v45  ;;  %v2135_v35 = vmul.f32 %v2007_v6, %v6677_v3  ;;  %v1147_v8 = vmul.f32 %v5506_v38, %v5506_v38  ;;  %v6682_v13 = vld [vmem:[#allocation81_spill] sm:$0xff] }
 0x212   : > { %6676 = vst [vmem:[#allocation75_spill] sm:$0xff] %v5513_v58  ;;  %v5522_v41 = vadd.f32 %v6678_v19, %v4410_v27  ;;  %v5524_v29 = vpop.eup %3822  ;;  %v2133_v51 = vmul.f32 %v2005_v34, %v6680_v43  ;;  %v2137_v52 = vmul.f32 %v2009_v15, %v6681_v62  ;;  %v1149_v30 = vmul.f32 %v5513_v58, %v5513_v58  ;;  %v6684_v34 = vld [vmem:[#allocation82_spill] sm:$0xff] }
 0x213   : > { %v5532_v45 = vadd.f32 %v6682_v13, %v4412_v28  ;;  %v5534_v53 = vpop.eup %3824  ;;  %2804 = vmatprep.mubr.bf16.mxu1 %v2274_v1  ;;  %v2271_v6 = vpack.c.bf16 %v2135_v35, %v2131_v37  ;;  %v1275_v57 = vmul.f32 %v1147_v8, %v5506_v38  ;;  %v5541_v3 = vadd.f32 %v6684_v34, %v4406_v25  ;;  %v6686_v1 = vld [vmem:[#allocation83_spill] sm:$0xff] }
 0x214   : > { %6679 = vst [vmem:[#allocation36_spill] sm:$0xff] %v5522_v41  ;;  %v1148_v56 = vmul.f32 %v5522_v41, %v5522_v41  ;;  %v5543_v15 = vpop.eup %3826  ;;  %v2273_v19 = vpack.c.bf16 %v2137_v52, %v2133_v51  ;;  %v1277_v43 = vmul.f32 %v1149_v30, %v5513_v58  ;;  %v5550_v37 = vadd.f32 %v6686_v1, %v4408_v26  ;;  %v6689_v51 = vld [vmem:[#allocation85_spill] sm:$0xff] }
 0x215   : > { %6683 = vst [vmem:[#allocation84_spill] sm:$0xff] %v5532_v45  ;;  %6685 = vst [vmem:[#allocation78_spill] sm:$0xff] %v5541_v3  ;;  %v1150_v62 = vmul.f32 %v5532_v45, %v5532_v45  ;;  %v5552_v35 = vpop.eup %3828  ;;  %2644 = vmatmul.mubr.bf16.gmra.mrb[84].mxu0 %v2271_v6  ;;  %v1403_v8 = vmul.f32 0.044715, %v1275_v57  ;;  %v1151_v34 = vmul.f32 %v5541_v3, %v5541_v3  ;;  %v6691_v6 = vld [vmem:[#allocation86_spill] sm:$0xff] }
 0x216   : > { %6687 = vst [vmem:[#allocation73_spill] sm:$0xff] %v5550_v37  ;;  %6688 = vst [vmem:[#allocation79_spill] sm:$0xff] %v5552_v35  ;;  %v1276_v13 = vmul.f32 %v1148_v56, %v5522_v41  ;;  %v5559_v52 = vadd.f32 %v6689_v51, %v4410_v27  ;;  %v5561_v30 = vpop.eup %3830  ;;  %2805 = vmatmul.mubr.bf16.gmra.mrb[84].mxu1 %v2273_v19  ;;  %v1405_v9 = vmul.f32 0.044715, %v1277_v43 }
 0x217   : > { %v1278_v1 = vmul.f32 %v1150_v62, %v5532_v45  ;;  %v1153_v7 = vmul.f32 %v5550_v37, %v5550_v37  ;;  %v5568_v57 = vadd.f32 %v6691_v6, %v4412_v28  ;;  %v5570_v56 = vpop.eup %3832  ;;  %v1531_v4 = vadd.f32 %v1403_v8, %v5506_v38 }
 0x218   : > { %6690 = vst [vmem:[#allocation76_spill] sm:$0xff] %v5559_v52  ;;  %v1404_v54 = vmul.f32 0.044715, %v1276_v13  ;;  %v1279_v51 = vmul.f32 %v1151_v34, %v5541_v3  ;;  %v1152_v19 = vmul.f32 %v5559_v52, %v5559_v52  ;;  %v1533_v43 = vadd.f32 %v1405_v9, %v5513_v58 }
 0x219   : > { %6692 = vst [vmem:[#allocation80_spill] sm:$0xff] %v5568_v57  ;;  %v1406_v62 = vmul.f32 0.044715, %v1278_v1  ;;  %v1281_v42 = vmul.f32 %v1153_v7, %v5550_v37  ;;  %v1154_v21 = vmul.f32 %v5568_v57, %v5568_v57  ;;  %v1659_v6 = vmul.f32 0.7978846, %v1531_v4 }
 0x21a   : > { %v1532_v14 = vadd.f32 %v1404_v54, %v5522_v41  ;;  %v1407_v31 = vmul.f32 0.044715, %v1279_v51  ;;  %v1280_v8 = vmul.f32 %v1152_v19, %v5559_v52  ;;  %v1661_v13 = vmul.f32 0.7978846, %v1533_v43 }
 0x21b   : > { %v1534_v34 = vadd.f32 %v1406_v62, %v5532_v45  ;;  %v1409_v38 = vmul.f32 0.044715, %v1281_v42  ;;  %v1282_v59 = vmul.f32 %v1154_v21, %v5568_v57  ;;  %3834 = vtanh.f32 %v1659_v6 }
 0x21c   : > { %v1660_v9 = vmul.f32 0.7978846, %v1532_v14  ;;  %v1535_v1 = vadd.f32 %v1407_v31, %v5541_v3  ;;  %v1408_v7 = vmul.f32 0.044715, %v1280_v8  ;;  %3836 = vtanh.f32 %v1661_v13  ;;  %v6693_v8 = vld [vmem:[#allocation28_spill] sm:$0xff] }
 0x21d   : > { %v1662_v58 = vmul.f32 0.7978846, %v1534_v34  ;;  %v1537_v4 = vadd.f32 %v1409_v38, %v5550_v37  ;;  %v1410_v35 = vmul.f32 0.044715, %v1282_v59  ;;  %v1884_v19 = vadd.f32 1.0, %v5188_v44 }
 0x21e   : > { %3838 = vtanh.f32 %v1660_v9  ;;  %v1663_v54 = vmul.f32 0.7978846, %v1535_v1  ;;  %v1536_v51 = vadd.f32 %v1408_v7, %v5559_v52  ;;  %v1888_v14 = vadd.f32 1.0, %v5227_v55  ;;  %v6696_v1 = vld [vmem:[#allocation46_spill] sm:$0xff] }
 0x21f   : > { %3840 = vtanh.f32 %v1662_v58  ;;  %v1665_v42 = vmul.f32 0.7978846, %v1537_v4  ;;  %v1538_v21 = vadd.f32 %v1410_v35, %v5568_v57  ;;  %v2012_v43 = vmul.f32 0.5, %v1884_v19  ;;  %v6694_v58 = vld [vmem:[#allocation37_spill] sm:$0xff]  ;;  %v6695_v35 = vld [vmem:[#allocation16_spill] sm:$0xff]  ;;  %v6697_v4 = vld [vmem:[#allocation19_spill] sm:$0xff] }
 0x220   : > { %3842 = vtanh.f32 %v1663_v54  ;;  %v1664_v31 = vmul.f32 0.7978846, %v1536_v51  ;;  %v1886_v62 = vadd.f32 1.0, %v5198_v36  ;;  %v2016_v59 = vmul.f32 0.5, %v1888_v14  ;;  %v6698_v51 = vld [vmem:[#allocation23_spill] sm:$0xff]  ;;  %v6700_v14 = vld [vmem:[#allocation14_spill] sm:$0xff] }
 0x221   : > { %3844 = vtanh.f32 %v1665_v42  ;;  %v1666_v38 = vmul.f32 0.7978846, %v1538_v21  ;;  %v1890_v6 = vadd.f32 1.0, %v5240_v2  ;;  %v2140_v13 = vmul.f32 %v2012_v43, %v6693_v8  ;;  %v6699_v42 = vld [vmem:[#allocation25_spill] sm:$0xff] }
 0x222   : > { %3846 = vtanh.f32 %v1664_v31  ;;  %v2014_v44 = vmul.f32 0.5, %v1886_v62  ;;  %v1883_v34 = vadd.f32 1.0, %v6694_v58  ;;  %v2144_v9 = vmul.f32 %v2016_v59, %v6695_v35  ;;  %v6701_v62 = vld [vmem:[#allocation87_spill] sm:$0xff]  ;;  %v6704_v59 = vld [vmem:[#allocation18_spill] sm:$0xff] }
 0x223   : > { %3848 = vtanh.f32 %v1666_v38  ;;  %v2018_v55 = vmul.f32 0.5, %v1890_v6  ;;  %v1887_v7 = vadd.f32 1.0, %v6696_v1  ;;  %v1885_v19 = vadd.f32 1.0, %v6698_v51 }
 0x224   : > { %v2142_v54 = vmul.f32 %v2014_v44, %v6697_v4  ;;  %v2011_v36 = vmul.f32 0.5, %v1883_v34  ;;  %v1889_v21 = vadd.f32 1.0, %v6699_v42  ;;  %v2276_v2 = vpack.c.bf16 %v2144_v9, %v2140_v13  ;;  %v6705_v44 = vld [vmem:[#allocation88_spill] sm:$0xff]  ;;  %v6709_v4 = vld [vmem:[#allocation89_spill] sm:$0xff] }
 0x225   : > { %v2146_v31 = vmul.f32 %v2018_v55, %v6700_v14  ;;  %v2015_v43 = vmul.f32 0.5, %v1887_v7  ;;  %v5602_v8 = vadd.f32 %v6701_v62, %v4406_v25  ;;  %v5604_v38 = vpop.eup %3834  ;;  %v2013_v58 = vmul.f32 0.5, %v1885_v19  ;;  %v6708_v9 = vld [vmem:[#allocation24_spill] sm:$0xff]  ;;  %v6710_v19 = vld [vmem:[#allocation15_spill] sm:$0xff] }
 0x226   : > { %6703 = vst [vmem:[#allocation77_spill] sm:$0xff] %v5604_v38  ;;  %v2139_v6 = vmul.f32 %v2011_v36, %v6704_v59  ;;  %v2017_v35 = vmul.f32 0.5, %v1889_v21  ;;  %v5609_v34 = vadd.f32 %v6705_v44, %v4408_v26  ;;  %v5611_v1 = vpop.eup %3836  ;;  %2651 = vmatprep.mubr.bf16.mxu0 %v2276_v2  ;;  %v5618_v51 = vadd.f32 %v6709_v4, %v4410_v27  ;;  %v6711_v21 = vld [vmem:[#allocation29_spill] sm:$0xff] }
 0x227   : > { %6702 = vst [vmem:[#allocation74_spill] sm:$0xff] %v5602_v8  ;;  %6707 = vst [vmem:[#allocation82_spill] sm:$0xff] %v5611_v1  ;;  %v2278_v13 = vpack.c.bf16 %v2146_v31, %v2142_v54  ;;  %v2143_v55 = vmul.f32 %v2015_v43, %v6708_v9  ;;  %v1155_v7 = vmul.f32 %v5602_v8, %v5602_v8  ;;  %v6712_v54 = vld [vmem:[#allocation90_spill] sm:$0xff] }
 0x228   : > { %6706 = vst [vmem:[#allocation81_spill] sm:$0xff] %v5609_v34  ;;  %v5620_v36 = vpop.eup %3838  ;;  %v2141_v42 = vmul.f32 %v2013_v58, %v6710_v19  ;;  %v2145_v14 = vmul.f32 %v2017_v35, %v6711_v21  ;;  %v1157_v62 = vmul.f32 %v5609_v34, %v5609_v34  ;;  %v5628_v2 = vadd.f32 %v6712_v54, %v4412_v28  ;;  %v6714_v58 = vld [vmem:[#allocation91_spill] sm:$0xff] }
 0x229   : > { %v5630_v31 = vpop.eup %3840  ;;  %2812 = vmatprep.mubr.bf16.mxu1 %v2278_v13  ;;  %v2275_v43 = vpack.c.bf16 %v2143_v55, %v2139_v6  ;;  %v1283_v59 = vmul.f32 %v1155_v7, %v5602_v8  ;;  %v1156_v44 = vmul.f32 %v5618_v51, %v5618_v51  ;;  %v5637_v9 = vadd.f32 %v6714_v58, %v4406_v25  ;;  %v6717_v13 = vld [vmem:[#allocation92_spill] sm:$0xff] }
 0x22a   : > { %6713 = vst [vmem:[#allocation83_spill] sm:$0xff] %v5628_v2  ;;  %v5639_v35 = vpop.eup %3842  ;;  %v2277_v4 = vpack.c.bf16 %v2145_v14, %v2141_v42  ;;  %v1285_v19 = vmul.f32 %v1157_v62, %v5609_v34  ;;  %v1158_v21 = vmul.f32 %v5628_v2, %v5628_v2  ;;  %v5646_v6 = vadd.f32 %v6717_v13, %v4408_v26  ;;  %v6720_v42 = vld [vmem:[#allocation93_spill] sm:$0xff] }
 0x22b   : > { %6715 = vst [vmem:[#allocation85_spill] sm:$0xff] %v5637_v9  ;;  %6716 = vst [vmem:[#allocation86_spill] sm:$0xff] %v5639_v35  ;;  %v5648_v55 = vpop.eup %3844  ;;  %2652 = vmatmul.mubr.bf16.gmra.mrb[88].mxu0 %v2275_v43  ;;  %v1411_v7 = vmul.f32 0.044715, %v1283_v59  ;;  %v1284_v54 = vmul.f32 %v1156_v44, %v5618_v51  ;;  %v1159_v58 = vmul.f32 %v5637_v9, %v5637_v9  ;;  %v6722_v43 = vld [vmem:[#allocation94_spill] sm:$0xff] }
 0x22c   : > { %6718 = vst [vmem:[#allocation28_spill] sm:$0xff] %v5646_v6  ;;  %6719 = vst [vmem:[#allocation37_spill] sm:$0xff] %v5648_v55  ;;  %v5655_v14 = vadd.f32 %v6720_v42, %v4410_v27  ;;  %v5657_v62 = vpop.eup %3846  ;;  %2813 = vmatmul.mubr.bf16.gmra.mrb[88].mxu1 %v2277_v4  ;;  %v1413_v37 = vmul.f32 0.044715, %v1285_v19  ;;  %v1286_v13 = vmul.f32 %v1158_v21, %v5628_v2 }
 0x22d   : > { %v1161_v3 = vmul.f32 %v5646_v6, %v5646_v6  ;;  %v5664_v59 = vadd.f32 %v6722_v43, %v4412_v28  ;;  %v5666_v44 = vpop.eup %3848  ;;  %v1539_v57 = vadd.f32 %v1411_v7, %v5602_v8  ;;  %v1412_v55 = vmul.f32 0.044715, %v1284_v54 }
 0x22e   : > { %6721 = vst [vmem:[#allocation16_spill] sm:$0xff] %v5655_v14  ;;  %v1287_v42 = vmul.f32 %v1159_v58, %v5637_v9  ;;  %v1160_v4 = vmul.f32 %v5655_v14, %v5655_v14  ;;  %v1541_v19 = vadd.f32 %v1413_v37, %v5609_v34  ;;  %v1414_v21 = vmul.f32 0.044715, %v1286_v13 }
 0x22f   : > { %6723 = vst [vmem:[#allocation46_spill] sm:$0xff] %v5664_v59  ;;  %v1289_v1 = vmul.f32 %v1161_v3, %v5646_v6  ;;  %v1162_v45 = vmul.f32 %v5664_v59, %v5664_v59  ;;  %v1667_v43 = vmul.f32 0.7978846, %v1539_v57  ;;  %v1540_v35 = vadd.f32 %v1412_v55, %v5618_v51 }
 0x230   : > { %v1415_v52 = vmul.f32 0.044715, %v1287_v42  ;;  %v1288_v7 = vmul.f32 %v1160_v4, %v5655_v14  ;;  %v1669_v54 = vmul.f32 0.7978846, %v1541_v19  ;;  %v1542_v58 = vadd.f32 %v1414_v21, %v5628_v2 }
 0x231   : > { %v1417_v8 = vmul.f32 0.044715, %v1289_v1  ;;  %v1290_v38 = vmul.f32 %v1162_v45, %v5664_v59  ;;  %3850 = vtanh.f32 %v1667_v43  ;;  %v1668_v37 = vmul.f32 0.7978846, %v1540_v35 }
 0x232   : > { %v1543_v13 = vadd.f32 %v1415_v52, %v5637_v9  ;;  %v1416_v3 = vmul.f32 0.044715, %v1288_v7  ;;  %3852 = vtanh.f32 %v1669_v54  ;;  %v1670_v34 = vmul.f32 0.7978846, %v1542_v58 }
 0x233   : > { %v1545_v57 = vadd.f32 %v1417_v8, %v5646_v6  ;;  %v1418_v41 = vmul.f32 0.044715, %v1290_v38  ;;  %3854 = vtanh.f32 %v1668_v37  ;;  %v1892_v4 = vadd.f32 1.0, %v5300_v23  ;;  %v6726_v37 = vld [vmem:[#allocation34_spill] sm:$0xff] }
 0x234   : > { %v1671_v55 = vmul.f32 0.7978846, %v1543_v13  ;;  %v1544_v42 = vadd.f32 %v1416_v3, %v5655_v14  ;;  %3856 = vtanh.f32 %v1670_v34  ;;  %v1896_v35 = vadd.f32 1.0, %v5339_v24  ;;  %v6724_v34 = vld [vmem:[#allocation58_spill] sm:$0xff] }
 0x235   : > { %v1673_v1 = vmul.f32 0.7978846, %v1545_v57  ;;  %v1546_v45 = vadd.f32 %v1418_v41, %v5664_v59  ;;  %v2020_v19 = vmul.f32 0.5, %v1892_v4  ;;  %v1894_v21 = vadd.f32 1.0, %v5310_v20  ;;  %v6725_v41 = vld [vmem:[#allocation49_spill] sm:$0xff]  ;;  %v6727_v3 = vld [vmem:[#allocation42_spill] sm:$0xff] }
 0x236   : > { %3858 = vtanh.f32 %v1671_v55  ;;  %v1672_v52 = vmul.f32 0.7978846, %v1544_v42  ;;  %v2024_v38 = vmul.f32 0.5, %v1896_v35  ;;  %v1898_v43 = vadd.f32 1.0, %v5348_v40  ;;  %v6728_v55 = vld [vmem:[#allocation69_spill] sm:$0xff]  ;;  %v6729_v4 = vld [vmem:[#allocation44_spill] sm:$0xff] }
 0x237   : > { %3860 = vtanh.f32 %v1673_v1  ;;  %v1674_v8 = vmul.f32 0.7978846, %v1546_v45  ;;  %v2148_v7 = vmul.f32 %v2020_v19, %v5186_v46  ;;  %v2022_v23 = vmul.f32 0.5, %v1894_v21  ;;  %v6730_v45 = vld [vmem:[#allocation21_spill] sm:$0xff] }
 0x238   : > { %3862 = vtanh.f32 %v1672_v52  ;;  %v1891_v54 = vadd.f32 1.0, %v6724_v34  ;;  %v2152_v58 = vmul.f32 %v2024_v38, %v6725_v41  ;;  %v2026_v24 = vmul.f32 0.5, %v1898_v43  ;;  %v6731_v52 = vld [vmem:[#allocation13_spill] sm:$0xff] }
 0x239   : > { %3864 = vtanh.f32 %v1674_v8  ;;  %v1895_v13 = vadd.f32 1.0, %v6726_v37  ;;  %v2150_v57 = vmul.f32 %v2022_v23, %v6727_v3  ;;  %v1893_v42 = vadd.f32 1.0, %v6728_v55  ;;  %v6734_v8 = vld [vmem:[#allocation22_spill] sm:$0xff]  ;;  %v6740_v55 = vld [vmem:[#allocation27_spill] sm:$0xff] }
 0x23a   : > { %v2019_v20 = vmul.f32 0.5, %v1891_v54  ;;  %v1897_v1 = vadd.f32 1.0, %v6729_v4  ;;  %v2280_v40 = vpack.c.bf16 %v2152_v58, %v2148_v7  ;;  %v2154_v35 = vmul.f32 %v2026_v24, %v6730_v45  ;;  %v6735_v23 = vld [vmem:[#allocation38_spill] sm:$0xff]  ;;  %v6741_v4 = vld [vmem:[#allocation20_spill] sm:$0xff] }
 0x23b   : > { %v2023_v46 = vmul.f32 0.5, %v1895_v13  ;;  %v5698_v19 = vadd.f32 %v6731_v52, %v4406_v25  ;;  %v5700_v21 = vpop.eup %3850  ;;  %v2021_v43 = vmul.f32 0.5, %v1893_v42  ;;  %v5705_v54 = vadd.f32 %v6735_v23, %v4408_v26  ;;  %v6738_v58 = vld [vmem:[#allocation30_spill] sm:$0xff]  ;;  %v6739_v13 = vld [vmem:[#allocation17_spill] sm:$0xff] }
 0x23c   : > { %6733 = vst [vmem:[#allocation23_spill] sm:$0xff] %v5700_v21  ;;  %v2147_v38 = vmul.f32 %v2019_v20, %v6734_v8  ;;  %v2025_v34 = vmul.f32 0.5, %v1897_v1  ;;  %v5707_v41 = vpop.eup %3852  ;;  %2659 = vmatprep.mubr.bf16.mxu0 %v2280_v40  ;;  %v2282_v7 = vpack.c.bf16 %v2154_v35, %v2150_v57  ;;  %v5714_v3 = vadd.f32 %v6739_v13, %v4410_v27  ;;  %v6742_v57 = vld [vmem:[#allocation39_spill] sm:$0xff] }
 0x23d   : > { %6732 = vst [vmem:[#allocation19_spill] sm:$0xff] %v5698_v19  ;;  %6736 = vst [vmem:[#allocation25_spill] sm:$0xff] %v5705_v54  ;;  %v2151_v24 = vmul.f32 %v2023_v46, %v6738_v58  ;;  %v1163_v37 = vmul.f32 %v5698_v19, %v5698_v19  ;;  %v5716_v20 = vpop.eup %3854  ;;  %v2149_v42 = vmul.f32 %v2021_v43, %v6740_v55  ;;  %v6743_v43 = vld [vmem:[#allocation95_spill] sm:$0xff] }
 0x23e   : > { %6737 = vst [vmem:[#allocation14_spill] sm:$0xff] %v5707_v41  ;;  %v2153_v1 = vmul.f32 %v2025_v34, %v6741_v4  ;;  %v1165_v45 = vmul.f32 %v5705_v54, %v5705_v54  ;;  %v5724_v40 = vadd.f32 %v6742_v57, %v4412_v28  ;;  %v5726_v35 = vpop.eup %3856  ;;  %2820 = vmatprep.mubr.bf16.mxu1 %v2282_v7  ;;  %v6745_v7 = vld [vmem:[#allocation43_spill] sm:$0xff] }
 0x23f   : > { %v2279_v46 = vpack.c.bf16 %v2151_v24, %v2147_v38  ;;  %v1291_v52 = vmul.f32 %v1163_v37, %v5698_v19  ;;  %v1164_v8 = vmul.f32 %v5714_v3, %v5714_v3  ;;  %v5733_v23 = vadd.f32 %v6743_v43, %v4406_v25 }
 0x240   : > { %v5735_v34 = vpop.eup %3858  ;;  %v2281_v58 = vpack.c.bf16 %v2153_v1, %v2149_v42  ;;  %v1293_v13 = vmul.f32 %v1165_v45, %v5705_v54  ;;  %v1166_v55 = vmul.f32 %v5724_v40, %v5724_v40  ;;  %v5742_v38 = vadd.f32 %v6745_v7, %v4408_v26  ;;  %v6747_v42 = vld [vmem:[#allocation96_spill] sm:$0xff] }
 0x241   : > { %6744 = vst [vmem:[#allocation87_spill] sm:$0xff] %v5735_v34  ;;  %v5744_v24 = vpop.eup %3860  ;;  %2660 = vmatmul.mubr.bf16.gmra.mrb[92].mxu0 %v2279_v46  ;;  %v1419_v37 = vmul.f32 0.044715, %v1291_v52  ;;  %v1292_v4 = vmul.f32 %v1164_v8, %v5714_v3  ;;  %v1167_v57 = vmul.f32 %v5733_v23, %v5733_v23  ;;  %v5751_v1 = vadd.f32 %v6747_v42, %v4410_v27  ;;  %v6748_v46 = vld [vmem:[#allocation97_spill] sm:$0xff] }
 0x242   : > { %6746 = vst [vmem:[#allocation18_spill] sm:$0xff] %v5744_v24  ;;  %v5753_v45 = vpop.eup %3862  ;;  %2821 = vmatmul.mubr.bf16.gmra.mrb[92].mxu1 %v2281_v58  ;;  %v1421_v43 = vmul.f32 0.044715, %v1293_v13  ;;  %v1294_v7 = vmul.f32 %v1166_v55, %v5724_v40  ;;  %v1169_v6 = vmul.f32 %v5742_v38, %v5742_v38  ;;  %v5760_v52 = vadd.f32 %v6748_v46, %v4412_v28 }
 0x243   : > { %v5762_v8 = vpop.eup %3864  ;;  %v1547_v9 = vadd.f32 %v1419_v37, %v5698_v19  ;;  %v1420_v59 = vmul.f32 0.044715, %v1292_v4  ;;  %v1295_v42 = vmul.f32 %v1167_v57, %v5733_v23  ;;  %v1168_v58 = vmul.f32 %v5751_v1, %v5751_v1 }
 0x244   : > { %v1549_v13 = vadd.f32 %v1421_v43, %v5705_v54  ;;  %v1422_v55 = vmul.f32 0.044715, %v1294_v7  ;;  %v1297_v24 = vmul.f32 %v1169_v6, %v5742_v38  ;;  %v1170_v41 = vmul.f32 %v5760_v52, %v5760_v52 }
 0x245   : > { %v1675_v46 = vmul.f32 0.7978846, %v1547_v9  ;;  %v1548_v2 = vadd.f32 %v1420_v59, %v5714_v3  ;;  %v1423_v34 = vmul.f32 0.044715, %v1295_v42  ;;  %v1296_v37 = vmul.f32 %v1168_v58, %v5751_v1 }
 0x246   : > { %v1677_v4 = vmul.f32 0.7978846, %v1549_v13  ;;  %v1550_v57 = vadd.f32 %v1422_v55, %v5724_v40  ;;  %v1425_v19 = vmul.f32 0.044715, %v1297_v24  ;;  %v1298_v14 = vmul.f32 %v1170_v41, %v5760_v52 }
 0x247   : > { %3866 = vtanh.f32 %v1675_v46  ;;  %v1676_v43 = vmul.f32 0.7978846, %v1548_v2  ;;  %v1551_v7 = vadd.f32 %v1423_v34, %v5733_v23  ;;  %v1424_v6 = vmul.f32 0.044715, %v1296_v37 }
 0x248   : > { %3868 = vtanh.f32 %v1677_v4  ;;  %v1678_v54 = vmul.f32 0.7978846, %v1550_v57  ;;  %v1553_v9 = vadd.f32 %v1425_v19, %v5742_v38  ;;  %v1426_v21 = vmul.f32 0.044715, %v1298_v14 }
 0x249   : > { %3870 = vtanh.f32 %v1676_v43  ;;  %v1679_v59 = vmul.f32 0.7978846, %v1551_v7  ;;  %v1552_v42 = vadd.f32 %v1424_v6, %v5751_v1  ;;  %v1900_v58 = vadd.f32 1.0, %v5412_v11 }
 0x24a   : > { %3872 = vtanh.f32 %v1678_v54  ;;  %v1681_v24 = vmul.f32 0.7978846, %v1553_v9  ;;  %v1554_v41 = vadd.f32 %v1426_v21, %v5760_v52  ;;  %v1904_v2 = vadd.f32 1.0, %v5451_v18  ;;  %v6749_v9 = vld [vmem:[#allocation47_spill] sm:$0xff] }
 0x24b   : > { %3874 = vtanh.f32 %v1679_v59  ;;  %v1680_v34 = vmul.f32 0.7978846, %v1552_v42  ;;  %v2028_v13 = vmul.f32 0.5, %v1900_v58  ;;  %v1902_v55 = vadd.f32 1.0, %v5422_v49 }
 0x24c   : > { %3876 = vtanh.f32 %v1681_v24  ;;  %v1682_v19 = vmul.f32 0.7978846, %v1554_v41  ;;  %v2032_v14 = vmul.f32 0.5, %v1904_v2  ;;  %v1906_v46 = vadd.f32 1.0, %v5460_v50  ;;  %v6754_v2 = vld [vmem:[#allocation50_spill] sm:$0xff] }
 0x24d   : > { %3878 = vtanh.f32 %v1680_v34  ;;  %v2156_v37 = vmul.f32 %v2028_v13, %v5298_v22  ;;  %v2030_v11 = vmul.f32 0.5, %v1902_v55  ;;  %v1899_v54 = vadd.f32 1.0, %v5396_v33  ;;  %v6755_v55 = vld [vmem:[#allocation41_spill] sm:$0xff] }
 0x24e   : > { %3880 = vtanh.f32 %v1682_v19  ;;  %v2160_v21 = vmul.f32 %v2032_v14, %v5337_v0  ;;  %v2034_v18 = vmul.f32 0.5, %v1906_v46  ;;  %v1903_v4 = vadd.f32 1.0, %v5431_v48  ;;  %v6751_v0 = vld [vmem:[#allocation33_spill] sm:$0xff] }
 0x24f   : > { %v2158_v57 = vmul.f32 %v2030_v11, %v5308_v12  ;;  %v2027_v49 = vmul.f32 0.5, %v1899_v54  ;;  %v1901_v43 = vadd.f32 1.0, %v5403_v60  ;;  %v1905_v7 = vadd.f32 1.0, %v5442_v47  ;;  %v6752_v12 = vld [vmem:[#allocation26_spill] sm:$0xff] }
 0x250   : > { %v2284_v50 = vpack.c.bf16 %v2160_v21, %v2156_v37  ;;  %v2162_v6 = vmul.f32 %v2034_v18, %v5346_v39  ;;  %v2031_v22 = vmul.f32 0.5, %v1903_v4  ;;  %v5794_v33 = vadd.f32 %v6749_v9, %v4406_v25  ;;  %v6756_v37 = vld [vmem:[#allocation51_spill] sm:$0xff]  ;;  %v6757_v4 = vld [vmem:[#allocation52_spill] sm:$0xff] }
 0x251   : > { %v5796_v59 = vpop.eup %3866  ;;  %v2155_v42 = vmul.f32 %v2027_v49, %v6751_v0  ;;  %v2029_v48 = vmul.f32 0.5, %v1901_v43  ;;  %v2033_v58 = vmul.f32 0.5, %v1905_v7  ;;  %v5801_v24 = vadd.f32 %v6752_v12, %v4408_v26 }
 0x252   : > { %6750 = vst [vmem:[#allocation88_spill] sm:$0xff] %v5794_v33  ;;  %v5803_v60 = vpop.eup %3868  ;;  %2667 = vmatprep.mubr.bf16.mxu0 %v2284_v50  ;;  %v2286_v47 = vpack.c.bf16 %v2162_v6, %v2158_v57  ;;  %v2159_v39 = vmul.f32 %v2031_v22, %v5317_v63  ;;  %v1171_v41 = vmul.f32 %v5794_v33, %v5794_v33  ;;  %v6759_v50 = vld [vmem:[#allocation53_spill] sm:$0xff] }
 0x253   : > { %6753 = vst [vmem:[#allocation24_spill] sm:$0xff] %v5801_v24  ;;  %v5810_v34 = vadd.f32 %v6754_v2, %v4410_v27  ;;  %v5812_v13 = vpop.eup %3870  ;;  %v2157_v19 = vmul.f32 %v2029_v48, %v6755_v55  ;;  %v2161_v14 = vmul.f32 %v2033_v58, %v5326_v32  ;;  %v1173_v46 = vmul.f32 %v5801_v24, %v5801_v24  ;;  %v6761_v48 = vld [vmem:[#allocation54_spill] sm:$0xff] }
 0x254   : > { %v5820_v11 = vadd.f32 %v6756_v37, %v4412_v28  ;;  %v5822_v63 = vpop.eup %3872  ;;  %2828 = vmatprep.mubr.bf16.mxu1 %v2286_v47  ;;  %v2283_v54 = vpack.c.bf16 %v2159_v39, %v2155_v42  ;;  %v1299_v21 = vmul.f32 %v1171_v41, %v5794_v33  ;;  %v5829_v57 = vadd.f32 %v6757_v4, %v4406_v25  ;;  %v6762_v2 = vld [vmem:[#allocation98_spill] sm:$0xff] }
 0x255   : > { %v1172_v18 = vmul.f32 %v5810_v34, %v5810_v34  ;;  %v5831_v32 = vpop.eup %3874  ;;  %v2285_v49 = vpack.c.bf16 %v2161_v14, %v2157_v19  ;;  %v1301_v43 = vmul.f32 %v1173_v46, %v5801_v24  ;;  %v5838_v6 = vadd.f32 %v6759_v50, %v4408_v26 }
 0x256   : > { %6758 = vst [vmem:[#allocation89_spill] sm:$0xff] %v5829_v57  ;;  %v1174_v7 = vmul.f32 %v5820_v11, %v5820_v11  ;;  %v5840_v22 = vpop.eup %3876  ;;  %2668 = vmatmul.mubr.bf16.gmra.mrb[96].mxu0 %v2283_v54  ;;  %v1427_v9 = vmul.f32 0.044715, %v1299_v21  ;;  %v1175_v42 = vmul.f32 %v5829_v57, %v5829_v57  ;;  %v5847_v58 = vadd.f32 %v6761_v48, %v4410_v27 }
 0x257   : > { %6760 = vst [vmem:[#allocation15_spill] sm:$0xff] %v5838_v6  ;;  %v1300_v0 = vmul.f32 %v1172_v18, %v5810_v34  ;;  %v5849_v12 = vpop.eup %3878  ;;  %2829 = vmatmul.mubr.bf16.gmra.mrb[96].mxu1 %v2285_v49  ;;  %v1429_v47 = vmul.f32 0.044715, %v1301_v43  ;;  %v1177_v41 = vmul.f32 %v5838_v6, %v5838_v6  ;;  %v5856_v55 = vadd.f32 %v6762_v2, %v4412_v28 }
 0x258   : > { %v1302_v39 = vmul.f32 %v1174_v7, %v5820_v11  ;;  %v5858_v19 = vpop.eup %3880  ;;  %v1555_v14 = vadd.f32 %v1427_v9, %v5794_v33  ;;  %v1303_v37 = vmul.f32 %v1175_v42, %v5829_v57  ;;  %v1176_v54 = vmul.f32 %v5847_v58, %v5847_v58 }
 0x259   : > { %6763 = vst [vmem:[#allocation29_spill] sm:$0xff] %v5856_v55  ;;  %v1428_v46 = vmul.f32 0.044715, %v1300_v0  ;;  %v1557_v21 = vadd.f32 %v1429_v47, %v5801_v24  ;;  %v1305_v4 = vmul.f32 %v1177_v41, %v5838_v6  ;;  %v1178_v49 = vmul.f32 %v5856_v55, %v5856_v55 }
 0x25a   : > { %v1430_v18 = vmul.f32 0.044715, %v1302_v39  ;;  %v1683_v43 = vmul.f32 0.7978846, %v1555_v14  ;;  %v1431_v50 = vmul.f32 0.044715, %v1303_v37  ;;  %v1304_v9 = vmul.f32 %v1176_v54, %v5847_v58 }
 0x25b   : > { %v1556_v7 = vadd.f32 %v1428_v46, %v5810_v34  ;;  %v1685_v0 = vmul.f32 0.7978846, %v1557_v21  ;;  %v1433_v48 = vmul.f32 0.044715, %v1305_v4  ;;  %v1306_v2 = vmul.f32 %v1178_v49, %v5856_v55 }
 0x25c   : > { %v1558_v42 = vadd.f32 %v1430_v18, %v5820_v11  ;;  %3882 = vtanh.f32 %v1683_v43  ;;  %v1559_v39 = vadd.f32 %v1431_v50, %v5829_v57  ;;  %v1432_v41 = vmul.f32 0.044715, %v1304_v9 }
 0x25d   : > { %v1684_v47 = vmul.f32 0.7978846, %v1556_v7  ;;  %3884 = vtanh.f32 %v1685_v0  ;;  %v1561_v14 = vadd.f32 %v1433_v48, %v5838_v6  ;;  %v1434_v33 = vmul.f32 0.044715, %v1306_v2 }
 0x25e   : > { %v1686_v24 = vmul.f32 0.7978846, %v1558_v42  ;;  %v1687_v46 = vmul.f32 0.7978846, %v1559_v39  ;;  %v1560_v37 = vadd.f32 %v1432_v41, %v5847_v58  ;;  %v1908_v54 = vadd.f32 1.0, %v5524_v29  ;;  %v6764_v39 = vld [vmem:[#allocation79_spill] sm:$0xff] }
 0x25f   : > { %3886 = vtanh.f32 %v1684_v47  ;;  %v1689_v21 = vmul.f32 0.7978846, %v1561_v14  ;;  %v1562_v18 = vadd.f32 %v1434_v33, %v5856_v55  ;;  %v1912_v4 = vadd.f32 1.0, %v5561_v30  ;;  %v6765_v14 = vld [vmem:[#allocation55_spill] sm:$0xff] }
 0x260   : > { %3888 = vtanh.f32 %v1686_v24  ;;  %v1688_v49 = vmul.f32 0.7978846, %v1560_v37  ;;  %v2036_v43 = vmul.f32 0.5, %v1908_v54  ;;  %v1910_v7 = vadd.f32 1.0, %v5534_v53  ;;  %v6766_v37 = vld [vmem:[#allocation61_spill] sm:$0xff] }
 0x261   : > { %3890 = vtanh.f32 %v1687_v46  ;;  %v1690_v50 = vmul.f32 0.7978846, %v1562_v18  ;;  %v2040_v9 = vmul.f32 0.5, %v1912_v4  ;;  %v1914_v0 = vadd.f32 1.0, %v5570_v56 }
 0x262   : > { %3892 = vtanh.f32 %v1689_v21  ;;  %v2164_v42 = vmul.f32 %v2036_v43, %v5410_v10  ;;  %v2038_v29 = vmul.f32 0.5, %v1910_v7  ;;  %v1907_v24 = vadd.f32 1.0, %v5508_v17  ;;  %v6771_v43 = vld [vmem:[#allocation66_spill] sm:$0xff] }
 0x263   : > { %3894 = vtanh.f32 %v1688_v49  ;;  %v2168_v33 = vmul.f32 %v2040_v9, %v5449_v16  ;;  %v2042_v30 = vmul.f32 0.5, %v1914_v0  ;;  %v1911_v48 = vadd.f32 1.0, %v5543_v15  ;;  %v6768_v16 = vld [vmem:[#allocation64_spill] sm:$0xff]  ;;  %v6772_v9 = vld [vmem:[#allocation31_spill] sm:$0xff] }
 0x264   : > { %3896 = vtanh.f32 %v1690_v50  ;;  %v2166_v2 = vmul.f32 %v2038_v29, %v5420_v61  ;;  %v2035_v53 = vmul.f32 0.5, %v1907_v24  ;;  %v1909_v47 = vadd.f32 1.0, %v5515_v5  ;;  %v6769_v61 = vld [vmem:[#allocation59_spill] sm:$0xff]  ;;  %v6773_v29 = vld [vmem:[#allocation65_spill] sm:$0xff] }
 0x265   : > { %v1913_v41 = vadd.f32 1.0, %v6764_v39  ;;  %v2288_v56 = vpack.c.bf16 %v2168_v33, %v2164_v42  ;;  %v2170_v46 = vmul.f32 %v2042_v30, %v6765_v14  ;;  %v2039_v10 = vmul.f32 0.5, %v1911_v48  ;;  %v6774_v33 = vld [vmem:[#allocation67_spill] sm:$0xff] }
 0x266   : > { %v5890_v17 = vadd.f32 %v6766_v37, %v4406_v25  ;;  %v5892_v54 = vpop.eup %3882  ;;  %v2163_v21 = vmul.f32 %v2035_v53, %v6768_v16  ;;  %v2037_v15 = vmul.f32 0.5, %v1909_v47  ;;  %v5897_v4 = vadd.f32 %v6769_v61, %v4408_v26  ;;  %v6777_v14 = vld [vmem:[#allocation35_spill] sm:$0xff] }
 0x267   : > { %v2041_v18 = vmul.f32 0.5, %v1913_v41  ;;  %v5899_v5 = vpop.eup %3884  ;;  %2675 = vmatprep.mubr.bf16.mxu0 %v2288_v56  ;;  %v2290_v49 = vpack.c.bf16 %v2170_v46, %v2166_v2  ;;  %v2167_v7 = vmul.f32 %v2039_v10, %v6771_v43  ;;  %v5906_v0 = vadd.f32 %v6772_v9, %v4410_v27  ;;  %v6775_v2 = vld [vmem:[#allocation60_spill] sm:$0xff] }
 0x268   : > { %6767 = vst [vmem:[#allocation90_spill] sm:$0xff] %v5890_v17  ;;  %6770 = vst [vmem:[#allocation91_spill] sm:$0xff] %v5897_v4  ;;  %v1179_v50 = vmul.f32 %v5890_v17, %v5890_v17  ;;  %v2165_v24 = vmul.f32 %v2037_v15, %v6773_v29  ;;  %v1181_v48 = vmul.f32 %v5897_v4, %v5897_v4 }
 0x269   : > { %v5908_v42 = vpop.eup %3886  ;;  %v2169_v30 = vmul.f32 %v2041_v18, %v6774_v33  ;;  %v5916_v53 = vadd.f32 %v6775_v2, %v4412_v28  ;;  %2836 = vmatprep.mubr.bf16.mxu1 %v2290_v49  ;;  %v2287_v39 = vpack.c.bf16 %v2167_v7, %v2163_v21  ;;  %v1180_v56 = vmul.f32 %v5906_v0, %v5906_v0  ;;  %v6779_v18 = vld [vmem:[#allocation63_spill] sm:$0xff] }
 0x26a   : > { %v5918_v47 = vpop.eup %3888  ;;  %v1307_v41 = vmul.f32 %v1179_v50, %v5890_v17  ;;  %v5925_v46 = vadd.f32 %v6777_v14, %v4406_v25  ;;  %v1309_v16 = vmul.f32 %v1181_v48, %v5897_v4  ;;  %v5934_v21 = vadd.f32 %v6779_v18, %v4408_v26  ;;  %v6782_v50 = vld [vmem:[#allocation32_spill] sm:$0xff] }
 0x26b   : > { %6776 = vst [vmem:[#allocation92_spill] sm:$0xff] %v5916_v53  ;;  %v5927_v10 = vpop.eup %3890  ;;  %v2289_v37 = vpack.c.bf16 %v2169_v30, %v2165_v24  ;;  %v1182_v15 = vmul.f32 %v5916_v53, %v5916_v53  ;;  %2676 = vmatmul.mubr.bf16.gmra.mrb[100].mxu0 %v2287_v39  ;;  %v1308_v43 = vmul.f32 %v1180_v56, %v5906_v0  ;;  %v6783_v48 = vld [vmem:[#allocation40_spill] sm:$0xff] }
 0x26c   : > { %6778 = vst [vmem:[#allocation93_spill] sm:$0xff] %v5925_v46  ;;  %6780 = vst [vmem:[#allocation94_spill] sm:$0xff] %v5934_v21  ;;  %v5936_v61 = vpop.eup %3892  ;;  %v1435_v49 = vmul.f32 0.044715, %v1307_v41  ;;  %v1183_v7 = vmul.f32 %v5925_v46, %v5925_v46  ;;  %v5943_v9 = vadd.f32 %v6782_v50, %v4410_v27  ;;  %v1437_v24 = vmul.f32 0.044715, %v1309_v16 }
 0x26d   : > { %6781 = vst [vmem:[#allocation58_spill] sm:$0xff] %v5936_v61  ;;  %v5945_v29 = vpop.eup %3894  ;;  %2837 = vmatmul.mubr.bf16.gmra.mrb[100].mxu1 %v2289_v37  ;;  %v1310_v33 = vmul.f32 %v1182_v15, %v5916_v53  ;;  %v1185_v30 = vmul.f32 %v5934_v21, %v5934_v21  ;;  %v5952_v2 = vadd.f32 %v6783_v48, %v4412_v28  ;;  %v1436_v56 = vmul.f32 0.044715, %v1308_v43 }
 0x26e   : > { %v5954_v39 = vpop.eup %3896  ;;  %v1563_v41 = vadd.f32 %v1435_v49, %v5890_v17  ;;  %v1311_v14 = vmul.f32 %v1183_v7, %v5925_v46  ;;  %v1184_v37 = vmul.f32 %v5943_v9, %v5943_v9  ;;  %v1565_v16 = vadd.f32 %v1437_v24, %v5897_v4 }
 0x26f   : > { %6784 = vst [vmem:[#allocation49_spill] sm:$0xff] %v5952_v2  ;;  %v1438_v15 = vmul.f32 0.044715, %v1310_v33  ;;  %v1313_v18 = vmul.f32 %v1185_v30, %v5934_v21  ;;  %v1186_v50 = vmul.f32 %v5952_v2, %v5952_v2  ;;  %v1564_v6 = vadd.f32 %v1436_v56, %v5906_v0 }
 0x270   : > { %v1691_v48 = vmul.f32 0.7978846, %v1563_v41  ;;  %v1439_v57 = vmul.f32 0.044715, %v1311_v14  ;;  %v1312_v49 = vmul.f32 %v1184_v37, %v5943_v9  ;;  %v1693_v43 = vmul.f32 0.7978846, %v1565_v16 }
 0x271   : > { %v1566_v7 = vadd.f32 %v1438_v15, %v5916_v53  ;;  %v1441_v17 = vmul.f32 0.044715, %v1313_v18  ;;  %v1314_v55 = vmul.f32 %v1186_v50, %v5952_v2  ;;  %v1692_v24 = vmul.f32 0.7978846, %v1564_v6 }
 0x272   : > { %3898 = vtanh.f32 %v1691_v48  ;;  %v1567_v33 = vadd.f32 %v1439_v57, %v5925_v46  ;;  %v1440_v30 = vmul.f32 0.044715, %v1312_v49  ;;  %v1916_v37 = vadd.f32 1.0, %v5620_v36  ;;  %v6785_v49 = vld [vmem:[#allocation36_spill] sm:$0xff] }
 0x273   : > { %3900 = vtanh.f32 %v1693_v43  ;;  %v1694_v4 = vmul.f32 0.7978846, %v1566_v7  ;;  %v1569_v41 = vadd.f32 %v1441_v17, %v5934_v21  ;;  %v1442_v61 = vmul.f32 0.044715, %v1314_v55 }
 0x274   : > { %3902 = vtanh.f32 %v1692_v24  ;;  %v1695_v56 = vmul.f32 0.7978846, %v1567_v33  ;;  %v1568_v14 = vadd.f32 %v1440_v30, %v5943_v9  ;;  %v1920_v6 = vadd.f32 1.0, %v5657_v62  ;;  %v6788_v33 = vld [vmem:[#allocation86_spill] sm:$0xff] }
 0x275   : > { %3904 = vtanh.f32 %v1694_v4  ;;  %v1697_v16 = vmul.f32 0.7978846, %v1569_v41  ;;  %v1570_v15 = vadd.f32 %v1442_v61, %v5952_v2  ;;  %v2044_v18 = vmul.f32 0.5, %v1916_v37  ;;  %v6786_v4 = vld [vmem:[#allocation77_spill] sm:$0xff]  ;;  %v6787_v61 = vld [vmem:[#allocation76_spill] sm:$0xff] }
 0x276   : > { %3906 = vtanh.f32 %v1695_v56  ;;  %v1696_v57 = vmul.f32 0.7978846, %v1568_v14  ;;  %v1918_v50 = vadd.f32 1.0, %v5630_v31  ;;  %v2048_v55 = vmul.f32 0.5, %v1920_v6  ;;  %v6789_v41 = vld [vmem:[#allocation84_spill] sm:$0xff]  ;;  %v6790_v14 = vld [vmem:[#allocation82_spill] sm:$0xff] }
 0x277   : > { %3908 = vtanh.f32 %v1697_v16  ;;  %v1698_v17 = vmul.f32 0.7978846, %v1570_v15  ;;  %v1922_v48 = vadd.f32 1.0, %v5666_v44  ;;  %v2172_v43 = vmul.f32 %v2044_v18, %v6785_v49  ;;  %v6791_v16 = vld [vmem:[#allocation37_spill] sm:$0xff]  ;;  %v6792_v6 = vld [vmem:[#allocation80_spill] sm:$0xff] }
 0x278   : > { %3910 = vtanh.f32 %v1696_v57  ;;  %v2046_v36 = vmul.f32 0.5, %v1918_v50  ;;  %v1915_v7 = vadd.f32 1.0, %v6786_v4  ;;  %v2176_v24 = vmul.f32 %v2048_v55, %v6787_v61  ;;  %v6793_v50 = vld [vmem:[#allocation68_spill] sm:$0xff] }
 0x279   : > { %3912 = vtanh.f32 %v1698_v17  ;;  %v2050_v62 = vmul.f32 0.5, %v1922_v48  ;;  %v1919_v30 = vadd.f32 1.0, %v6788_v33  ;;  %v1917_v37 = vadd.f32 1.0, %v6790_v14  ;;  %v6795_v55 = vld [vmem:[#allocation72_spill] sm:$0xff] }
 0x27a   : > { %v2174_v56 = vmul.f32 %v2046_v36, %v6789_v41  ;;  %v2043_v31 = vmul.f32 0.5, %v1915_v7  ;;  %v1921_v15 = vadd.f32 1.0, %v6791_v16  ;;  %v2292_v44 = vpack.c.bf16 %v2176_v24, %v2172_v43  ;;  %v6796_v36 = vld [vmem:[#allocation56_spill] sm:$0xff]  ;;  %v6799_v24 = vld [vmem:[#allocation78_spill] sm:$0xff]  ;;  %v6800_v41 = vld [vmem:[#allocation45_spill] sm:$0xff] }
 0x27b   : > { %v2178_v57 = vmul.f32 %v2050_v62, %v6792_v6  ;;  %v2047_v18 = vmul.f32 0.5, %v1919_v30  ;;  %v5986_v49 = vadd.f32 %v6793_v50, %v4406_v25  ;;  %v2045_v4 = vmul.f32 0.5, %v1917_v37  ;;  %v6801_v37 = vld [vmem:[#allocation75_spill] sm:$0xff] }
 0x27c   : > { %v5988_v17 = vpop.eup %3898  ;;  %v2171_v48 = vmul.f32 %v2043_v31, %v6795_v55  ;;  %v2049_v61 = vmul.f32 0.5, %v1921_v15  ;;  %v5993_v7 = vadd.f32 %v6796_v36, %v4408_v26  ;;  %2683 = vmatprep.mubr.bf16.mxu0 %v2292_v44  ;;  %v6002_v14 = vadd.f32 %v6800_v41, %v4410_v27  ;;  %v6802_v15 = vld [vmem:[#allocation73_spill] sm:$0xff] }
 0x27d   : > { %6794 = vst [vmem:[#allocation34_spill] sm:$0xff] %v5986_v49  ;;  %v5995_v33 = vpop.eup %3900  ;;  %v2294_v43 = vpack.c.bf16 %v2178_v57, %v2174_v56  ;;  %v2175_v62 = vmul.f32 %v2047_v18, %v6799_v24  ;;  %v1187_v30 = vmul.f32 %v5986_v49, %v5986_v49  ;;  %v2173_v16 = vmul.f32 %v2045_v4, %v6801_v37  ;;  %v6803_v56 = vld [vmem:[#allocation57_spill] sm:$0xff]  ;;  %v6804_v4 = vld [vmem:[#allocation48_spill] sm:$0xff] }
 0x27e   : > { %6797 = vst [vmem:[#allocation42_spill] sm:$0xff] %v5993_v7  ;;  %6798 = vst [vmem:[#allocation69_spill] sm:$0xff] %v5995_v33  ;;  %v6004_v31 = vpop.eup %3902  ;;  %v2177_v6 = vmul.f32 %v2049_v61, %v6802_v15  ;;  %v1189_v50 = vmul.f32 %v5993_v7, %v5993_v7  ;;  %v6012_v44 = vadd.f32 %v6803_v56, %v4412_v28 }
 0x27f   : > { %v6014_v57 = vpop.eup %3904  ;;  %2844 = vmatprep.mubr.bf16.mxu1 %v2294_v43  ;;  %v2291_v18 = vpack.c.bf16 %v2175_v62, %v2171_v48  ;;  %v1315_v55 = vmul.f32 %v1187_v30, %v5986_v49  ;;  %v1188_v36 = vmul.f32 %v6002_v14, %v6002_v14  ;;  %v6021_v24 = vadd.f32 %v6804_v4, %v4406_v25  ;;  %v6805_v43 = vld [vmem:[#allocation62_spill] sm:$0xff]  ;;  %v6032_v62 = vpop.f32.mrb[64].mxu0 }
 0x280   : > { %v6023_v61 = vpop.eup %3906  ;;  %v2293_v41 = vpack.c.bf16 %v2177_v6, %v2173_v16  ;;  %v1317_v37 = vmul.f32 %v1189_v50, %v5993_v7  ;;  %v1190_v15 = vmul.f32 %v6012_v44, %v6012_v44  ;;  %v6030_v48 = vadd.f32 %v6805_v43, %v4408_v26  ;;  %6807 = vst [vmem:[#allocation21_spill] sm:$0xff] %v6032_v62  ;;  %v6809_v6 = vld [vmem:[#allocation70_spill] sm:$0xff]  ;;  %v6043_v4 = vpop.f32.mrb[65].mxu0 }
 0x281   : > { %v6034_v30 = vpop.eup %3908  ;;  %2684 = vmatmul.mubr.bf16.gmra.mrb[104].mxu0 %v2291_v18  ;;  %v1443_v56 = vmul.f32 0.044715, %v1315_v55  ;;  %v1316_v25 = vmul.f32 %v1188_v36, %v6002_v14  ;;  %v1191_v16 = vmul.f32 %v6021_v24, %v6021_v24  ;;  %v6041_v50 = vadd.f32 %v6809_v6, %v4410_v27  ;;  %6810 = vst [vmem:[#allocation22_spill] sm:$0xff] %v6043_v4  ;;  %v6811_v55 = vld [vmem:[#allocation71_spill] sm:$0xff]  ;;  %v6054_v62 = vpop.f32.mrb[66].mxu0 }
 0x282   : > { %6806 = vst [vmem:[#allocation44_spill] sm:$0xff] %v6030_v48  ;;  %6808 = vst [vmem:[#allocation13_spill] sm:$0xff] %v6034_v30  ;;  %v6045_v21 = vpop.eup %3910  ;;  %2845 = vmatmul.mubr.bf16.gmra.mrb[104].mxu1 %v2293_v41  ;;  %v1445_v26 = vmul.f32 0.044715, %v1317_v37  ;;  %v1318_v43 = vmul.f32 %v1190_v15, %v6012_v44  ;;  %v1193_v18 = vmul.f32 %v6030_v48, %v6030_v48  ;;  %v6062_v37 = vpop.f32.mrb[67].mxu0 }
 0x283   : > { %v6052_v36 = vadd.f32 %v6811_v55, %v4412_v28  ;;  %6812 = vst [vmem:[#allocation38_spill] sm:$0xff] %v6054_v62  ;;  %v6056_v46 = vpop.eup %3912  ;;  %v1571_v27 = vadd.f32 %v1443_v56, %v5986_v49  ;;  %v1444_v6 = vmul.f32 0.044715, %v1316_v25  ;;  %v1319_v4 = vmul.f32 %v1191_v16, %v6021_v24  ;;  %6813 = vst [vmem:[#allocation30_spill] sm:$0xff] %v6062_v37  ;;  %v6068_v62 = vpop.f32.mrb[64].mxu1 }
 0x284   : > { %v1192_v41 = vmul.f32 %v6041_v50, %v6041_v50  ;;  %v1573_v15 = vadd.f32 %v1445_v26, %v5993_v7  ;;  %v1446_v2 = vmul.f32 0.044715, %v1318_v43  ;;  %v1321_v28 = vmul.f32 %v1193_v18, %v6030_v48  ;;  %6814 = vst [vmem:[#allocation17_spill] sm:$0xff] %v6068_v62  ;;  %v6072_v49 = vpop.f32.mrb[65].mxu1 }
 0x285   : > { %v1194_v55 = vmul.f32 %v6052_v36, %v6052_v36  ;;  %v1699_v30 = vmul.f32 0.7978846, %v1571_v27  ;;  %v1572_v56 = vadd.f32 %v1444_v6, %v6002_v14  ;;  %v1447_v25 = vmul.f32 0.044715, %v1319_v4  ;;  %v6076_v18 = vpop.f32.mrb[66].mxu1 }
 0x286   : > { %v1320_v16 = vmul.f32 %v1192_v41, %v6041_v50  ;;  %v1701_v33 = vmul.f32 0.7978846, %v1573_v15  ;;  %v1574_v37 = vadd.f32 %v1446_v2, %v6012_v44  ;;  %v1449_v26 = vmul.f32 0.044715, %v1321_v28  ;;  %v6079_v53 = vpop.f32.mrb[67].mxu1 }
 0x287   : > { %v1322_v43 = vmul.f32 %v1194_v55, %v6052_v36  ;;  %3914 = vtanh.f32 %v1699_v30  ;;  %v1700_v7 = vmul.f32 0.7978846, %v1572_v56  ;;  %v1575_v62 = vadd.f32 %v1447_v25, %v6021_v24  ;;  %6815 = vst [vmem:[#allocation27_spill] sm:$0xff] %v6079_v53 }
 0x288   : > { %v1448_v27 = vmul.f32 0.044715, %v1320_v16  ;;  %3916 = vtanh.f32 %v1701_v33  ;;  %v1702_v4 = vmul.f32 0.7978846, %v1574_v37  ;;  %v1577_v6 = vadd.f32 %v1449_v26, %v6030_v48 }
 0x289   : > { %v1450_v41 = vmul.f32 0.044715, %v1322_v43  ;;  %3918 = vtanh.f32 %v1700_v7  ;;  %v1703_v15 = vmul.f32 0.7978846, %v1575_v62  ;;  %v1924_v28 = vadd.f32 1.0, %v5716_v20  ;;  %v6816_v43 = vld [vmem:[#allocation23_spill] sm:$0xff] }
 0x28a   : > { %v1576_v2 = vadd.f32 %v1448_v27, %v6041_v50  ;;  %3920 = vtanh.f32 %v1702_v4  ;;  %v1705_v55 = vmul.f32 0.7978846, %v1577_v6  ;;  %v1928_v56 = vadd.f32 1.0, %v5753_v45  ;;  %v6817_v4 = vld [vmem:[#allocation16_spill] sm:$0xff] }
 0x28b   : > { %v1578_v30 = vadd.f32 %v1450_v41, %v6052_v36  ;;  %3922 = vtanh.f32 %v1703_v15  ;;  %v2052_v16 = vmul.f32 0.5, %v1924_v28  ;;  %v1926_v33 = vadd.f32 1.0, %v5726_v35  ;;  %v6818_v41 = vld [vmem:[#allocation87_spill] sm:$0xff] }
 0x28c   : > { %v1704_v25 = vmul.f32 0.7978846, %v1576_v2  ;;  %3924 = vtanh.f32 %v1705_v55  ;;  %v2056_v26 = vmul.f32 0.5, %v1928_v56  ;;  %v1930_v7 = vadd.f32 1.0, %v5762_v8  ;;  %v6819_v2 = vld [vmem:[#allocation83_spill] sm:$0xff]  ;;  %v6820_v55 = vld [vmem:[#allocation14_spill] sm:$0xff] }
 0x28d   : > { %v1706_v37 = vmul.f32 0.7978846, %v1578_v30  ;;  %v2180_v62 = vmul.f32 %v2052_v16, %v5618_v51  ;;  %v2054_v20 = vmul.f32 0.5, %v1926_v33  ;;  %v1923_v27 = vadd.f32 1.0, %v6816_v43  ;;  %v6821_v56 = vld [vmem:[#allocation18_spill] sm:$0xff] }
 0x28e   : > { %3926 = vtanh.f32 %v1704_v25  ;;  %v2184_v6 = vmul.f32 %v2056_v26, %v6817_v4  ;;  %v2058_v45 = vmul.f32 0.5, %v1930_v7  ;;  %v1927_v15 = vadd.f32 1.0, %v6818_v41  ;;  %v6822_v25 = vld [vmem:[#allocation46_spill] sm:$0xff]  ;;  %v6824_v41 = vld [vmem:[#allocation85_spill] sm:$0xff] }
 0x28f   : > { %3928 = vtanh.f32 %v1706_v37  ;;  %v2182_v28 = vmul.f32 %v2054_v20, %v6819_v2  ;;  %v2051_v35 = vmul.f32 0.5, %v1923_v27  ;;  %v1925_v30 = vadd.f32 1.0, %v6820_v55  ;;  %v6823_v37 = vld [vmem:[#allocation74_spill] sm:$0xff]  ;;  %v6826_v55 = vld [vmem:[#allocation28_spill] sm:$0xff] }
 0x290   : > { %v1929_v48 = vadd.f32 1.0, %v6821_v56  ;;  %v2296_v8 = vpack.c.bf16 %v2184_v6, %v2180_v62  ;;  %v2186_v53 = vmul.f32 %v2058_v45, %v6822_v25  ;;  %v2055_v51 = vmul.f32 0.5, %v1927_v15 }
 0x291   : > { %v1932_v16 = vadd.f32 1.0, %v5812_v13  ;;  %v6097_v33 = vpop.eup %3914  ;;  %v2179_v26 = vmul.f32 %v2051_v35, %v6823_v37  ;;  %v2053_v7 = vmul.f32 0.5, %v1925_v30  ;;  %v1936_v4 = vadd.f32 1.0, %v5849_v12  ;;  %v6825_v13 = vld [vmem:[#allocation81_spill] sm:$0xff] }
 0x292   : > { %v2057_v43 = vmul.f32 0.5, %v1929_v48  ;;  %v6101_v20 = vpop.eup %3916  ;;  %2691 = vmatprep.mubr.bf16.mxu0 %v2296_v8  ;;  %v2298_v27 = vpack.c.bf16 %v2186_v53, %v2182_v28  ;;  %v2183_v2 = vmul.f32 %v2055_v51, %v6824_v41  ;;  %v1934_v6 = vadd.f32 1.0, %v5822_v63 }
 0x293   : > { %v2060_v62 = vmul.f32 0.5, %v1932_v16  ;;  %v6105_v45 = vpop.eup %3918  ;;  %v2181_v15 = vmul.f32 %v2053_v7, %v6825_v13  ;;  %v2064_v35 = vmul.f32 0.5, %v1936_v4  ;;  %v1938_v48 = vadd.f32 1.0, %v5858_v19 }
 0x294   : > { %v2185_v56 = vmul.f32 %v2057_v43, %v6826_v55  ;;  %v6110_v30 = vpop.eup %3920  ;;  %2852 = vmatprep.mubr.bf16.mxu1 %v2298_v27  ;;  %v2295_v12 = vpack.c.bf16 %v2183_v2, %v2179_v26  ;;  %v2062_v28 = vmul.f32 0.5, %v1934_v6  ;;  %v1931_v8 = vadd.f32 1.0, %v5796_v59 }
 0x295   : > { %v2188_v53 = vmul.f32 %v2060_v62, %v5714_v3  ;;  %v6114_v25 = vpop.eup %3922  ;;  %v2192_v51 = vmul.f32 %v2064_v35, %v5751_v1  ;;  %v2066_v16 = vmul.f32 0.5, %v1938_v48  ;;  %v1935_v37 = vadd.f32 1.0, %v5831_v32  ;;  %v6127_v32 = vpop.f32.mrb[68].mxu0  ;;  %v6827_v62 = vld [vmem:[#allocation19_spill] sm:$0xff]  ;;  %v6828_v48 = vld [vmem:[#allocation25_spill] sm:$0xff] }
 0x296   : > { %v2297_v63 = vpack.c.bf16 %v2185_v56, %v2181_v15  ;;  %v6118_v7 = vpop.eup %3924  ;;  %2692 = vmatmul.mubr.bf16.gmra.mrb[108].mxu0 %v2295_v12  ;;  %v2190_v19 = vmul.f32 %v2062_v28, %v5724_v40  ;;  %v2059_v43 = vmul.f32 0.5, %v1931_v8  ;;  %v1933_v26 = vadd.f32 1.0, %v5803_v60 }
 0x297   : > { %v1937_v3 = vadd.f32 1.0, %v5840_v22  ;;  %v2300_v59 = vpack.c.bf16 %v2192_v51, %v2188_v53  ;;  %v2194_v27 = vmul.f32 %v2066_v16, %v5760_v52  ;;  %v2063_v1 = vmul.f32 0.5, %v1935_v37  ;;  %v6133_v22 = vpop.f32.mrb[69].mxu0 }
 0x298   : > { %v6123_v4 = vpop.eup %3926  ;;  %2853 = vmatmul.mubr.bf16.gmra.mrb[108].mxu1 %v2297_v63  ;;  %v1940_v41 = vadd.f32 1.0, %v5908_v42  ;;  %v2187_v40 = vmul.f32 %v2059_v43, %v6827_v62  ;;  %v2061_v6 = vmul.f32 0.5, %v1933_v26  ;;  %v1944_v60 = vadd.f32 1.0, %v5945_v29  ;;  %v6137_v42 = vpop.f32.mrb[68].mxu1 }
 0x299   : > { %v6129_v2 = vpop.eup %3928  ;;  %v2065_v13 = vmul.f32 0.5, %v1937_v3  ;;  %2699 = vmatprep.mubr.bf16.mxu0 %v2300_v59  ;;  %v2302_v15 = vpack.c.bf16 %v2194_v27, %v2190_v19  ;;  %v2191_v55 = vmul.f32 %v2063_v1, %v5733_v23  ;;  %v1942_v56 = vadd.f32 1.0, %v5918_v47  ;;  %v6139_v35 = vpop.f32.mrb[70].mxu0  ;;  %v6829_v1 = vld [vmem:[#allocation58_spill] sm:$0xff] }
 0x29a   : > { %v2068_v52 = vmul.f32 0.5, %v1940_v41  ;;  %v2189_v12 = vmul.f32 %v2061_v6, %v6828_v48  ;;  %v2072_v28 = vmul.f32 0.5, %v1944_v60  ;;  %v1946_v29 = vadd.f32 1.0, %v5954_v39  ;;  %v6144_v8 = vpop.f32.mrb[69].mxu1  ;;  %v6146_v63 = vpop.f32.mrb[71].mxu0  ;;  %v6833_v48 = vld [vmem:[#allocation24_spill] sm:$0xff] }
 0x29b   : > { %v2193_v53 = vmul.f32 %v2065_v13, %v5742_v38  ;;  %2860 = vmatprep.mubr.bf16.mxu1 %v2302_v15  ;;  %v2299_v23 = vpack.c.bf16 %v2191_v55, %v2187_v40  ;;  %v2070_v47 = vmul.f32 0.5, %v1942_v56  ;;  %v1939_v16 = vadd.f32 1.0, %v5892_v54  ;;  %v6150_v37 = vpop.f32.mrb[70].mxu1  ;;  %v6830_v54 = vld [vmem:[#allocation29_spill] sm:$0xff] }
 0x29c   : > { %v2196_v51 = vmul.f32 %v2068_v52, %v5810_v34  ;;  %v2200_v43 = vmul.f32 %v2072_v28, %v5847_v58  ;;  %v2074_v38 = vmul.f32 0.5, %v1946_v29  ;;  %v1943_v26 = vadd.f32 1.0, %v5927_v10  ;;  %v6154_v39 = vpop.f32.mrb[71].mxu1  ;;  %v6831_v58 = vld [vmem:[#allocation88_spill] sm:$0xff]  ;;  %v6832_v55 = vld [vmem:[#allocation89_spill] sm:$0xff] }
 0x29d   : > { %v2301_v19 = vpack.c.bf16 %v2193_v53, %v2189_v12  ;;  %v2198_v3 = vmul.f32 %v2070_v47, %v5820_v11  ;;  %v2067_v59 = vmul.f32 0.5, %v1939_v16  ;;  %v1941_v27 = vadd.f32 1.0, %v5899_v5  ;;  %v6834_v53 = vld [vmem:[#allocation15_spill] sm:$0xff] }
 0x29e   : > { %v1945_v34 = vadd.f32 1.0, %v6829_v1  ;;  %2700 = vmatmul.mubr.bf16.gmra.mrb[112].mxu0 %v2299_v23  ;;  %v2304_v41 = vpack.c.bf16 %v2200_v43, %v2196_v51  ;;  %v2202_v62 = vmul.f32 %v2074_v38, %v6830_v54  ;;  %v2071_v40 = vmul.f32 0.5, %v1943_v26  ;;  %v6835_v38 = vld [vmem:[#allocation92_spill] sm:$0xff]  ;;  %v6837_v1 = vld [vmem:[#allocation13_spill] sm:$0xff] }
 0x29f   : > { %v1948_v6 = vadd.f32 1.0, %v6004_v31  ;;  %v2195_v13 = vmul.f32 %v2067_v59, %v6831_v58  ;;  %v2069_v10 = vmul.f32 0.5, %v1941_v27  ;;  %v1952_v15 = vadd.f32 1.0, %v6045_v21  ;;  %v6836_v59 = vld [vmem:[#allocation69_spill] sm:$0xff] }
 0x2a0   : > { %2861 = vmatmul.mubr.bf16.gmra.mrb[112].mxu1 %v2301_v19  ;;  %v2073_v60 = vmul.f32 0.5, %v1945_v34  ;;  %2707 = vmatprep.mubr.bf16.mxu0 %v2304_v41  ;;  %v2306_v11 = vpack.c.bf16 %v2202_v62, %v2198_v3  ;;  %v2199_v5 = vmul.f32 %v2071_v40, %v6832_v55  ;;  %v1950_v56 = vadd.f32 1.0, %v6014_v57  ;;  %v6838_v41 = vld [vmem:[#allocation49_spill] sm:$0xff] }
 0x2a1   : > { %v2076_v52 = vmul.f32 0.5, %v1948_v6  ;;  %v2197_v12 = vmul.f32 %v2069_v10, %v6833_v48  ;;  %v2080_v29 = vmul.f32 0.5, %v1952_v15  ;;  %v1954_v31 = vadd.f32 1.0, %v6056_v46 }
 0x2a2   : > { %v2201_v28 = vmul.f32 %v2073_v60, %v6834_v53  ;;  %2868 = vmatprep.mubr.bf16.mxu1 %v2306_v11  ;;  %v2303_v23 = vpack.c.bf16 %v2199_v5, %v2195_v13  ;;  %v2078_v47 = vmul.f32 0.5, %v1950_v56  ;;  %v1947_v21 = vadd.f32 1.0, %v5988_v17  ;;  %v6839_v17 = vld [vmem:[#allocation90_spill] sm:$0xff]  ;;  %v6840_v13 = vld [vmem:[#allocation93_spill] sm:$0xff]  ;;  %v6841_v11 = vld [vmem:[#allocation91_spill] sm:$0xff] }
 0x2a3   : > { %v2204_v51 = vmul.f32 %v2076_v52, %v5906_v0  ;;  %v2208_v19 = vmul.f32 %v2080_v29, %v5943_v9  ;;  %v2082_v43 = vmul.f32 0.5, %v1954_v31  ;;  %v1951_v57 = vadd.f32 1.0, %v6023_v61  ;;  %v6842_v5 = vld [vmem:[#allocation94_spill] sm:$0xff] }
 0x2a4   : > { %v2305_v16 = vpack.c.bf16 %v2201_v28, %v2197_v12  ;;  %v2206_v26 = vmul.f32 %v2078_v47, %v6835_v38  ;;  %v2075_v3 = vmul.f32 0.5, %v1947_v21  ;;  %v1949_v27 = vadd.f32 1.0, %v6836_v59  ;;  %v6845_v38 = vld [vmem:[#allocation34_spill] sm:$0xff] }
 0x2a5   : > { %v1953_v46 = vadd.f32 1.0, %v6837_v1  ;;  %v2308_v34 = vpack.c.bf16 %v2208_v19, %v2204_v51  ;;  %v2210_v54 = vmul.f32 %v2082_v43, %v6838_v41  ;;  %v2079_v0 = vmul.f32 0.5, %v1951_v57  ;;  %v6843_v19 = vld [vmem:[#allocation21_spill] sm:$0xff]  ;;  %v6844_v43 = vld [vmem:[#allocation22_spill] sm:$0xff]  ;;  %v6849_v41 = vld [vmem:[#allocation27_spill] sm:$0xff] }
 0x2a6   : > { %v1956_v62 = vadd.f32 1.0, %v6105_v45  ;;  %2708 = vmatmul.mubr.bf16.gmra.mrb[116].mxu0 %v2303_v23  ;;  %v2203_v40 = vmul.f32 %v2075_v3, %v6839_v17  ;;  %v2077_v9 = vmul.f32 0.5, %v1949_v27  ;;  %v1960_v61 = vadd.f32 1.0, %v6123_v4  ;;  %v2219_v1 = vld [vmem:[#allocation2] sm:$0xff]  ;;  %v6850_v17 = vld [vmem:[#allocation42_spill] sm:$0xff] }
 0x2a7   : > { %v2081_v6 = vmul.f32 0.5, %v1953_v46  ;;  %2715 = vmatprep.mubr.bf16.mxu0 %v2308_v34  ;;  %v2310_v58 = vpack.c.bf16 %v2210_v54, %v2206_v26  ;;  %v2207_v10 = vmul.f32 %v2079_v0, %v6840_v13  ;;  %v1958_v15 = vadd.f32 1.0, %v6110_v30  ;;  %v3307_v57 = vpop.f32.mrb[72].mxu0  ;;  %v6848_v46 = vld [vmem:[#allocation30_spill] sm:$0xff] }
 0x2a8   : > { %2869 = vmatmul.mubr.bf16.gmra.mrb[116].mxu1 %v2305_v16  ;;  %v2084_v60 = vmul.f32 0.5, %v1956_v62  ;;  %v2205_v55 = vmul.f32 %v2077_v9, %v6841_v11  ;;  %v2088_v45 = vmul.f32 0.5, %v1960_v61  ;;  %v1962_v56 = vadd.f32 1.0, %v6129_v2  ;;  %v3308_v27 = vpop.f32.mrb[73].mxu0  ;;  %v2220_v61 = vld [vmem:[#allocation2 + $0x8] sm:$0xff] }
 0x2a9   : > { %v2209_v52 = vmul.f32 %v2081_v6, %v6842_v5  ;;  %2876 = vmatprep.mubr.bf16.mxu1 %v2310_v58  ;;  %v2307_v48 = vpack.c.bf16 %v2207_v10, %v2203_v40  ;;  %v2086_v4 = vmul.f32 0.5, %v1958_v15  ;;  %v1955_v53 = vadd.f32 1.0, %v6097_v33  ;;  %v3419_v59 = vpop.f32.mrb[72].mxu1  ;;  %v3310_v62 = vpop.f32.mrb[74].mxu0  ;;  %v2221_v5 = vld [vmem:[#allocation2 + $0x10] sm:$0xff] }
 0x2aa   : > { %v2212_v12 = vmul.f32 %v2084_v60, %v6002_v14  ;;  %v2216_v29 = vmul.f32 %v2088_v45, %v6041_v50  ;;  %v2090_v31 = vmul.f32 0.5, %v1962_v56  ;;  %v1959_v30 = vadd.f32 1.0, %v6114_v25  ;;  %v6846_v25 = vld [vmem:[#allocation17_spill] sm:$0xff]  ;;  %v3420_v0 = vpop.f32.mrb[73].mxu1  ;;  %v3311_v13 = vpop.f32.mrb[75].mxu0 }
 0x2ab   : > { %v2309_v28 = vpack.c.bf16 %v2209_v52, %v2205_v55  ;;  %v2214_v23 = vmul.f32 %v2086_v4, %v6012_v44  ;;  %v2083_v51 = vmul.f32 0.5, %v1955_v53  ;;  %v1957_v47 = vadd.f32 1.0, %v6101_v20  ;;  %v3422_v58 = vpop.f32.mrb[74].mxu1 }
 0x2ac   : > { %v1961_v2 = vadd.f32 1.0, %v6118_v7  ;;  %v2312_v21 = vpack.c.bf16 %v2216_v29, %v2212_v12  ;;  %v2218_v16 = vmul.f32 %v2090_v31, %v6052_v36  ;;  %v2087_v14 = vmul.f32 0.5, %v1959_v30  ;;  %v6847_v36 = vld [vmem:[#allocation38_spill] sm:$0xff]  ;;  %v3423_v15 = vpop.f32.mrb[75].mxu1  ;;  %v2222_v12 = vld [vmem:[#allocation2 + $0x18] sm:$0xff] }
 0x2ad   : > { %v3297_v33 = vadd.f32 %v6844_v43, %v6843_v19  ;;  %v2211_v50 = vmul.f32 %v2083_v51, %v6845_v38  ;;  %v2085_v26 = vmul.f32 0.5, %v1957_v47  ;;  %v3409_v44 = vadd.f32 %v6072_v49, %v6846_v25  ;;  %v6851_v49 = vld [vmem:[#allocation44_spill] sm:$0xff]  ;;  %v2224_v31 = vld [vmem:[#allocation2 + $0x28] sm:$0xff]  ;;  %v2225_v43 = vld [vmem:[#allocation2 + $0x30] sm:$0xff] }
 0x2ae   : > { %v2089_v3 = vmul.f32 0.5, %v1961_v2  ;;  %2716 = vmatmul.mubr.bf16.gmra.mrb[120].mxu0 %v2307_v48  ;;  %v2314_v20 = vpack.c.bf16 %v2218_v16, %v2214_v23  ;;  %v2215_v7 = vmul.f32 %v2087_v14, %v6021_v24  ;;  %v3300_v34 = vadd.f32 %v6848_v46, %v6847_v36 }
 0x2af   : > { %v3412_v54 = vadd.f32 %v6849_v41, %v6076_v18  ;;  %2723 = vmatprep.mubr.bf16.mxu0 %v2312_v21  ;;  %v2213_v40 = vmul.f32 %v2085_v26, %v6850_v17  ;;  %v2767_v6 = vadd.f32 %v3409_v44, %v3297_v33  ;;  %v3303_v60 = vadd.f32 %v6133_v22, %v6127_v32  ;;  %v2223_v22 = vld [vmem:[#allocation2 + $0x20] sm:$0xff]  ;;  %v2226_v26 = vld [vmem:[#allocation2 + $0x38] sm:$0xff] }
 0x2b0   : > { %2877 = vmatmul.mubr.bf16.gmra.mrb[120].mxu1 %v2309_v28  ;;  %v2217_v9 = vmul.f32 %v2089_v3, %v6851_v49  ;;  %v2311_v24 = vpack.c.bf16 %v2215_v7, %v2211_v50  ;;  %v3415_v18 = vadd.f32 %v6144_v8, %v6137_v42  ;;  %v3306_v52 = vadd.f32 %v6146_v63, %v6139_v35  ;;  %v2228_v49 = vld [vmem:[#allocation2 + $0x48] sm:$0xff] }
 0x2b1   : > { %2884 = vmatprep.mubr.bf16.mxu1 %v2314_v20  ;;  %v2770_v10 = vadd.f32 %v3412_v54, %v3300_v34  ;;  %v2893_v55 = vadd.f32 %v2767_v6, %v2219_v1  ;;  %v3418_v45 = vadd.f32 %v6154_v39, %v6150_v37  ;;  %v3309_v4 = vadd.f32 %v3308_v27, %v3307_v57  ;;  %v2227_v54 = vld [vmem:[#allocation2 + $0x40] sm:$0xff] }
 0x2b2   : > { %v2313_v11 = vpack.c.bf16 %v2217_v9, %v2213_v40  ;;  %v2775_v48 = vadd.f32 %v3415_v18, %v3303_v60  ;;  %v3421_v53 = vadd.f32 %v3420_v0, %v3419_v59  ;;  %v3312_v28 = vadd.f32 %v3311_v13, %v3310_v62 }
 0x2b3   : > { %v2894_v56 = vadd.f32 %v2770_v10, %v2220_v61  ;;  %2925 = vst [vmem:[#allocation2] sm:$0xff] %v2893_v55  ;;  %v2778_v32 = vadd.f32 %v3418_v45, %v3306_v52  ;;  %v3424_v42 = vadd.f32 %v3423_v15, %v3422_v58 }
 0x2b4   : > { %v2895_v8 = vadd.f32 %v2775_v48, %v2221_v5  ;;  %v2783_v29 = vadd.f32 %v3421_v53, %v3309_v4  ;;  %v2229_v5 = vld [vmem:[#allocation2 + $0x50] sm:$0xff] }
 0x2b5   : > { %2926 = vst [vmem:[#allocation2 + $0x8] sm:$0xff] %v2894_v56  ;;  %v2896_v30 = vadd.f32 %v2778_v32, %v2222_v12  ;;  %v2786_v23 = vadd.f32 %v3424_v42, %v3312_v28  ;;  %v2230_v12 = vld [vmem:[#allocation2 + $0x58] sm:$0xff] }
 0x2b6   : > { %2724 = vmatmul.mubr.bf16.gmra.mrb[124].mxu0 %v2311_v24  ;;  %2927 = vst [vmem:[#allocation2 + $0x10] sm:$0xff] %v2895_v8  ;;  %v2897_v35 = vadd.f32 %v2783_v29, %v2223_v22 }
 0x2b7   : > { %2928 = vst [vmem:[#allocation2 + $0x18] sm:$0xff] %v2896_v30  ;;  %v2898_v63 = vadd.f32 %v2786_v23, %v2224_v31 }
 0x2b8   : > { %2885 = vmatmul.mubr.bf16.gmra.mrb[124].mxu1 %v2313_v11  ;;  %2929 = vst [vmem:[#allocation2 + $0x20] sm:$0xff] %v2897_v35 }
 0x2b9   : > { %2930 = vst [vmem:[#allocation2 + $0x28] sm:$0xff] %v2898_v63  ;;  %v2231_v63 = vld [vmem:[#allocation2 + $0x60] sm:$0xff] }
 0x2bd   : > { %v3313_v37 = vpop.f32.mrb[76].mxu0 }
 0x2be   : > { %v3425_v39 = vpop.f32.mrb[76].mxu1  ;;  %v3314_v51 = vpop.f32.mrb[77].mxu0 }
 0x2bf   : > { %v3315_v47 = vadd.f32 %v3314_v51, %v3313_v37  ;;  %v3426_v2 = vpop.f32.mrb[77].mxu1  ;;  %v3316_v21 = vpop.f32.mrb[78].mxu0 }
 0x2c0   : > { %v3427_v16 = vadd.f32 %v3426_v2, %v3425_v39  ;;  %v3428_v14 = vpop.f32.mrb[78].mxu1  ;;  %v3317_v19 = vpop.f32.mrb[79].mxu0  ;;  %v2232_v2 = vld [vmem:[#allocation2 + $0x68] sm:$0xff] }
 0x2c1   : > { %v3318_v33 = vadd.f32 %v3317_v19, %v3316_v21  ;;  %v3429_v57 = vpop.f32.mrb[79].mxu1 }
 0x2c2   : > { %v2791_v38 = vadd.f32 %v3427_v16, %v3315_v47  ;;  %v3430_v50 = vadd.f32 %v3429_v57, %v3428_v14 }
 0x2c4   : > { %v2899_v3 = vadd.f32 %v2791_v38, %v2225_v43  ;;  %v2794_v25 = vadd.f32 %v3430_v50, %v3318_v33 }
 0x2c6   : > { %2931 = vst [vmem:[#allocation2 + $0x30] sm:$0xff] %v2899_v3  ;;  %v2900_v44 = vadd.f32 %v2794_v25, %v2226_v26 }
 0x2c8   : > { %2932 = vst [vmem:[#allocation2 + $0x38] sm:$0xff] %v2900_v44  ;;  %v2233_v44 = vld [vmem:[#allocation2 + $0x70] sm:$0xff] }
 0x2d3   : > { %v3319_v59 = vpop.f32.mrb[80].mxu0 }
 0x2d4   : > { %v3431_v27 = vpop.f32.mrb[80].mxu1  ;;  %v3320_v20 = vpop.f32.mrb[81].mxu0 }
 0x2d5   : > { %v3321_v7 = vadd.f32 %v3320_v20, %v3319_v59  ;;  %v3432_v1 = vpop.f32.mrb[81].mxu1  ;;  %v3322_v36 = vpop.f32.mrb[82].mxu0 }
 0x2d6   : > { %v3433_v46 = vadd.f32 %v3432_v1, %v3431_v27  ;;  %v3434_v34 = vpop.f32.mrb[82].mxu1  ;;  %v3323_v41 = vpop.f32.mrb[83].mxu0  ;;  %v2234_v1 = vld [vmem:[#allocation2 + $0x78] sm:$0xff] }
 0x2d7   : > { %v3324_v0 = vadd.f32 %v3323_v41, %v3322_v36  ;;  %v3435_v62 = vpop.f32.mrb[83].mxu1 }
 0x2d8   : > { %v2799_v17 = vadd.f32 %v3433_v46, %v3321_v7  ;;  %v3436_v40 = vadd.f32 %v3435_v62, %v3434_v34 }
 0x2da   : > { %v2901_v9 = vadd.f32 %v2799_v17, %v2227_v54  ;;  %v2802_v6 = vadd.f32 %v3436_v40, %v3324_v0 }
 0x2dc   : > { %2933 = vst [vmem:[#allocation2 + $0x40] sm:$0xff] %v2901_v9  ;;  %v2902_v61 = vadd.f32 %v2802_v6, %v2228_v49 }
 0x2de   : > { %2934 = vst [vmem:[#allocation2 + $0x48] sm:$0xff] %v2902_v61  ;;  %v2235_v61 = vld [vmem:[#allocation2 + $0x80] sm:$0xff] }
 0x2e8   : > { %v3325_v58 = vpop.f32.mrb[84].mxu0 }
 0x2e9   : > { %v3437_v13 = vpop.f32.mrb[84].mxu1  ;;  %v3326_v24 = vpop.f32.mrb[85].mxu0 }
 0x2ea   : > { %v3327_v10 = vadd.f32 %v3326_v24, %v3325_v58  ;;  %v3438_v60 = vpop.f32.mrb[85].mxu1  ;;  %v3328_v18 = vpop.f32.mrb[86].mxu0 }
 0x2eb   : > { %v3439_v15 = vadd.f32 %v3438_v60, %v3437_v13  ;;  %v3440_v11 = vpop.f32.mrb[86].mxu1  ;;  %v3329_v55 = vpop.f32.mrb[87].mxu0  ;;  %v2236_v60 = vld [vmem:[#allocation2 + $0x88] sm:$0xff] }
 0x2ec   : > { %v3330_v52 = vadd.f32 %v3329_v55, %v3328_v18  ;;  %v3441_v45 = vpop.f32.mrb[87].mxu1 }
 0x2ed   : > { %v2807_v56 = vadd.f32 %v3439_v15, %v3327_v10  ;;  %v3442_v48 = vadd.f32 %v3441_v45, %v3440_v11 }
 0x2ef   : > { %v2903_v4 = vadd.f32 %v2807_v56, %v2229_v5  ;;  %v2810_v53 = vadd.f32 %v3442_v48, %v3330_v52 }
 0x2f1   : > { %2935 = vst [vmem:[#allocation2 + $0x50] sm:$0xff] %v2903_v4  ;;  %v2904_v32 = vadd.f32 %v2810_v53, %v2230_v12 }
 0x2f3   : > { %2936 = vst [vmem:[#allocation2 + $0x58] sm:$0xff] %v2904_v32  ;;  %v2237_v32 = vld [vmem:[#allocation2 + $0x90] sm:$0xff] }
 0x2fe   : > { %v3331_v22 = vpop.f32.mrb[88].mxu0 }
 0x2ff   : > { %v3443_v28 = vpop.f32.mrb[88].mxu1  ;;  %v3332_v42 = vpop.f32.mrb[89].mxu0 }
 0x300   : > { %v3333_v8 = vadd.f32 %v3332_v42, %v3331_v22  ;;  %v3444_v29 = vpop.f32.mrb[89].mxu1  ;;  %v3334_v31 = vpop.f32.mrb[90].mxu0 }
 0x301   : > { %v3445_v30 = vadd.f32 %v3444_v29, %v3443_v28  ;;  %v3446_v23 = vpop.f32.mrb[90].mxu1  ;;  %v3335_v35 = vpop.f32.mrb[91].mxu0  ;;  %v2238_v29 = vld [vmem:[#allocation2 + $0x98] sm:$0xff] }
 0x302   : > { %v3336_v37 = vadd.f32 %v3335_v35, %v3334_v31  ;;  %v3447_v39 = vpop.f32.mrb[91].mxu1 }
 0x303   : > { %v2815_v51 = vadd.f32 %v3445_v30, %v3333_v8  ;;  %v3448_v47 = vadd.f32 %v3447_v39, %v3446_v23 }
 0x305   : > { %v2905_v21 = vadd.f32 %v2815_v51, %v2231_v63  ;;  %v2818_v16 = vadd.f32 %v3448_v47, %v3336_v37 }
 0x307   : > { %2937 = vst [vmem:[#allocation2 + $0x60] sm:$0xff] %v2905_v21  ;;  %v2906_v14 = vadd.f32 %v2818_v16, %v2232_v2 }
 0x309   : > { %2938 = vst [vmem:[#allocation2 + $0x68] sm:$0xff] %v2906_v14  ;;  %v2239_v14 = vld [vmem:[#allocation2 + $0xa0] sm:$0xff] }
 0x314   : > { %v3337_v19 = vpop.f32.mrb[92].mxu0 }
 0x315   : > { %v3449_v43 = vpop.f32.mrb[92].mxu1  ;;  %v3338_v33 = vpop.f32.mrb[93].mxu0 }
 0x316   : > { %v3339_v57 = vadd.f32 %v3338_v33, %v3337_v19  ;;  %v3450_v38 = vpop.f32.mrb[93].mxu1  ;;  %v3340_v50 = vpop.f32.mrb[94].mxu0 }
 0x317   : > { %v3451_v26 = vadd.f32 %v3450_v38, %v3449_v43  ;;  %v3452_v3 = vpop.f32.mrb[94].mxu1  ;;  %v3341_v25 = vpop.f32.mrb[95].mxu0  ;;  %v2240_v38 = vld [vmem:[#allocation2 + $0xa8] sm:$0xff] }
 0x318   : > { %v3342_v59 = vadd.f32 %v3341_v25, %v3340_v50  ;;  %v3453_v27 = vpop.f32.mrb[95].mxu1 }
 0x319   : > { %v2823_v20 = vadd.f32 %v3451_v26, %v3339_v57  ;;  %v3454_v7 = vadd.f32 %v3453_v27, %v3452_v3 }
 0x31b   : > { %v2907_v36 = vadd.f32 %v2823_v20, %v2233_v44  ;;  %v2826_v46 = vadd.f32 %v3454_v7, %v3342_v59 }
 0x31d   : > { %2939 = vst [vmem:[#allocation2 + $0x70] sm:$0xff] %v2907_v36  ;;  %v2908_v34 = vadd.f32 %v2826_v46, %v2234_v1 }
 0x31f   : > { %2940 = vst [vmem:[#allocation2 + $0x78] sm:$0xff] %v2908_v34  ;;  %v2241_v34 = vld [vmem:[#allocation2 + $0xb0] sm:$0xff] }
 0x329   : > { %v3343_v41 = vpop.f32.mrb[96].mxu0 }
 0x32a   : > { %v3455_v54 = vpop.f32.mrb[96].mxu1  ;;  %v3344_v0 = vpop.f32.mrb[97].mxu0 }
 0x32b   : > { %v3345_v62 = vadd.f32 %v3344_v0, %v3343_v41  ;;  %v3456_v17 = vpop.f32.mrb[97].mxu1  ;;  %v3346_v40 = vpop.f32.mrb[98].mxu0 }
 0x32c   : > { %v3457_v49 = vadd.f32 %v3456_v17, %v3455_v54  ;;  %v3458_v9 = vpop.f32.mrb[98].mxu1  ;;  %v3347_v6 = vpop.f32.mrb[99].mxu0  ;;  %v2242_v17 = vld [vmem:[#allocation2 + $0xb8] sm:$0xff] }
 0x32d   : > { %v3348_v58 = vadd.f32 %v3347_v6, %v3346_v40  ;;  %v3459_v13 = vpop.f32.mrb[99].mxu1 }
 0x32e   : > { %v2831_v24 = vadd.f32 %v3457_v49, %v3345_v62  ;;  %v3460_v10 = vadd.f32 %v3459_v13, %v3458_v9 }
 0x330   : > { %v2909_v18 = vadd.f32 %v2831_v24, %v2235_v61  ;;  %v2834_v15 = vadd.f32 %v3460_v10, %v3348_v58 }
 0x332   : > { %2941 = vst [vmem:[#allocation2 + $0x80] sm:$0xff] %v2909_v18  ;;  %v2910_v11 = vadd.f32 %v2834_v15, %v2236_v60 }
 0x334   : > { %2942 = vst [vmem:[#allocation2 + $0x88] sm:$0xff] %v2910_v11  ;;  %v2243_v11 = vld [vmem:[#allocation2 + $0xc0] sm:$0xff] }
 0x33e   : > { %v3349_v55 = vpop.f32.mrb[100].mxu0 }
 0x33f   : > { %v3350_v52 = vpop.f32.mrb[101].mxu0 }
 0x340   : > { %v3461_v5 = vpop.f32.mrb[100].mxu1  ;;  %v3351_v45 = vadd.f32 %v3350_v52, %v3349_v55  ;;  %v3352_v48 = vpop.f32.mrb[102].mxu0 }
 0x341   : > { %v3462_v56 = vpop.f32.mrb[101].mxu1  ;;  %v3353_v53 = vpop.f32.mrb[103].mxu0 }
 0x342   : > { %v3463_v12 = vadd.f32 %v3462_v56, %v3461_v5  ;;  %v3464_v4 = vpop.f32.mrb[102].mxu1  ;;  %v3354_v22 = vadd.f32 %v3353_v53, %v3352_v48  ;;  %v2244_v56 = vld [vmem:[#allocation2 + $0xc8] sm:$0xff] }
 0x343   : > { %v3465_v28 = vpop.f32.mrb[103].mxu1 }
 0x344   : > { %v2839_v42 = vadd.f32 %v3463_v12, %v3351_v45  ;;  %v3466_v8 = vadd.f32 %v3465_v28, %v3464_v4 }
 0x346   : > { %v2911_v31 = vadd.f32 %v2839_v42, %v2237_v32  ;;  %v2842_v30 = vadd.f32 %v3466_v8, %v3354_v22 }
 0x348   : > { %2943 = vst [vmem:[#allocation2 + $0x90] sm:$0xff] %v2911_v31  ;;  %v2912_v23 = vadd.f32 %v2842_v30, %v2238_v29 }
 0x34a   : > { %2944 = vst [vmem:[#allocation2 + $0x98] sm:$0xff] %v2912_v23  ;;  %v2245_v23 = vld [vmem:[#allocation2 + $0xd0] sm:$0xff] }
 0x354   : > { %v3355_v35 = vpop.f32.mrb[104].mxu0 }
 0x355   : > { %v3467_v63 = vpop.f32.mrb[104].mxu1  ;;  %v3356_v37 = vpop.f32.mrb[105].mxu0 }
 0x356   : > { %v3357_v39 = vadd.f32 %v3356_v37, %v3355_v35  ;;  %v3468_v51 = vpop.f32.mrb[105].mxu1  ;;  %v3358_v47 = vpop.f32.mrb[106].mxu0 }
 0x357   : > { %v3469_v2 = vadd.f32 %v3468_v51, %v3467_v63  ;;  %v3470_v21 = vpop.f32.mrb[106].mxu1  ;;  %v3359_v16 = vpop.f32.mrb[107].mxu0  ;;  %v2246_v51 = vld [vmem:[#allocation2 + $0xd8] sm:$0xff] }
 0x358   : > { %v3360_v19 = vadd.f32 %v3359_v16, %v3358_v47  ;;  %v3471_v43 = vpop.f32.mrb[107].mxu1 }
 0x359   : > { %v2847_v33 = vadd.f32 %v3469_v2, %v3357_v39  ;;  %v3472_v57 = vadd.f32 %v3471_v43, %v3470_v21 }
 0x35b   : > { %v2913_v50 = vadd.f32 %v2847_v33, %v2239_v14  ;;  %v2850_v26 = vadd.f32 %v3472_v57, %v3360_v19 }
 0x35d   : > { %2945 = vst [vmem:[#allocation2 + $0xa0] sm:$0xff] %v2913_v50  ;;  %v2914_v3 = vadd.f32 %v2850_v26, %v2240_v38 }
 0x35f   : > { %2946 = vst [vmem:[#allocation2 + $0xa8] sm:$0xff] %v2914_v3  ;;  %v2247_v3 = vld [vmem:[#allocation2 + $0xe0] sm:$0xff] }
 0x369   : > { %v3361_v25 = vpop.f32.mrb[108].mxu0 }
 0x36a   : > { %v3362_v59 = vpop.f32.mrb[109].mxu0 }
 0x36b   : > { %v3473_v44 = vpop.f32.mrb[108].mxu1  ;;  %v3363_v27 = vadd.f32 %v3362_v59, %v3361_v25  ;;  %v3364_v7 = vpop.f32.mrb[110].mxu0 }
 0x36c   : > { %v3474_v20 = vpop.f32.mrb[109].mxu1  ;;  %v3365_v46 = vpop.f32.mrb[111].mxu0 }
 0x36d   : > { %v3475_v1 = vadd.f32 %v3474_v20, %v3473_v44  ;;  %v3476_v36 = vpop.f32.mrb[110].mxu1  ;;  %v3366_v41 = vadd.f32 %v3365_v46, %v3364_v7  ;;  %v2248_v20 = vld [vmem:[#allocation2 + $0xe8] sm:$0xff] }
 0x36e   : > { %v3477_v54 = vpop.f32.mrb[111].mxu1 }
 0x36f   : > { %v2855_v0 = vadd.f32 %v3475_v1, %v3363_v27  ;;  %v3478_v62 = vadd.f32 %v3477_v54, %v3476_v36 }
 0x371   : > { %v2915_v40 = vadd.f32 %v2855_v0, %v2241_v34  ;;  %v2858_v49 = vadd.f32 %v3478_v62, %v3366_v41  ;;  %v3367_v9 = vpop.f32.mrb[112].mxu0 }
 0x372   : > { %v3368_v58 = vpop.f32.mrb[113].mxu0 }
 0x373   : > { %2947 = vst [vmem:[#allocation2 + $0xb0] sm:$0xff] %v2915_v40  ;;  %v2916_v6 = vadd.f32 %v2858_v49, %v2242_v17  ;;  %v3479_v61 = vpop.f32.mrb[112].mxu1  ;;  %v3369_v13 = vadd.f32 %v3368_v58, %v3367_v9  ;;  %v3370_v10 = vpop.f32.mrb[114].mxu0  ;;  %v2249_v9 = vld [vmem:[#allocation2 + $0xf0] sm:$0xff] }
 0x374   : > { %v3480_v24 = vpop.f32.mrb[113].mxu1  ;;  %v3371_v15 = vpop.f32.mrb[115].mxu0 }
 0x375   : > { %2948 = vst [vmem:[#allocation2 + $0xb8] sm:$0xff] %v2916_v6  ;;  %v3481_v60 = vadd.f32 %v3480_v24, %v3479_v61  ;;  %v3482_v18 = vpop.f32.mrb[114].mxu1  ;;  %v3372_v55 = vadd.f32 %v3371_v15, %v3370_v10  ;;  %v2250_v24 = vld [vmem:[#allocation2 + $0xf8] sm:$0xff]  ;;  %v2961_v15 = vld [vmem:[#allocation2] sm:$0xff] (!%p3270_p7) }
 0x376   : > { %v3483_v5 = vpop.f32.mrb[115].mxu1 }
 0x377   : > { %v2863_v52 = vadd.f32 %v3481_v60, %v3369_v13  ;;  %v3484_v45 = vadd.f32 %v3483_v5, %v3482_v18 }
 0x379   : > { %v2917_v48 = vadd.f32 %v2863_v52, %v2243_v11  ;;  %v2866_v12 = vadd.f32 %v3484_v45, %v3372_v55  ;;  %v3373_v4 = vpop.f32.mrb[116].mxu0  ;;  %v6216_v11 = vld [vmem:[%s6355_s4] ss:$0 sm:$0xff] (!%p3270_p7)  ;;  %v2962_v55 = vld [vmem:[#allocation2 + $0x8] sm:$0xff] (!%p3270_p7)  ;;  %v2963_v45 = vld [vmem:[#allocation2 + $0x10] sm:$0xff] (!%p3270_p7) }
 0x37a   : > { %v3374_v22 = vpop.f32.mrb[117].mxu0  ;;  %v3000_v5 = vadd.f32 (!%p3270_p7), %v6216_v11, %v2961_v15  ;;  %v3001_v52 = vadd.f32 (!%p3270_p7), %v6216_v11, %v2962_v55 }
 0x37b   : > { %2949 = vst [vmem:[#allocation2 + $0xc0] sm:$0xff] %v2917_v48  ;;  %v2918_v53 = vadd.f32 %v2866_v12, %v2244_v56  ;;  %v3485_v32 = vpop.f32.mrb[116].mxu1  ;;  %v3375_v28 = vadd.f32 %v3374_v22, %v3373_v4  ;;  %v3376_v8 = vpop.f32.mrb[118].mxu0  ;;  %v2964_v56 = vld [vmem:[#allocation2 + $0x18] sm:$0xff] (!%p3270_p7)  ;;  %v2965_v48 = vld [vmem:[#allocation2 + $0x20] sm:$0xff] (!%p3270_p7)  ;;  %v3002_v12 = vadd.f32 (!%p3270_p7), %v6216_v11, %v2963_v45  ;;  %v2967_v22 = vld [vmem:[#allocation2 + $0x30] sm:$0xff] (!%p3270_p7) }
 0x37c   : > { %v3486_v42 = vpop.f32.mrb[117].mxu1  ;;  %v3377_v30 = vpop.f32.mrb[119].mxu0  ;;  %v3003_v4 = vadd.f32 (!%p3270_p7), %v6216_v11, %v2964_v56  ;;  %3032 = vst [vmem:[%s4270_s28] sm:$0xff] (!%p3270_p7), %v3000_v5  ;;  %3033 = vst [vmem:[%s4270_s28 + $0x8] sm:$0xff] (!%p3270_p7), %v3001_v52 }
 0x37d   : > { %2950 = vst [vmem:[#allocation2 + $0xc8] sm:$0xff] %v2918_v53  ;;  %v3487_v29 = vadd.f32 %v3486_v42, %v3485_v32  ;;  %v3488_v31 = vpop.f32.mrb[118].mxu1  ;;  %v3378_v35 = vadd.f32 %v3377_v30, %v3376_v8  ;;  %v3004_v53 = vadd.f32 (!%p3270_p7), %v6216_v11, %v2965_v48  ;;  %v2966_v32 = vld [vmem:[#allocation2 + $0x28] sm:$0xff] (!%p3270_p7)  ;;  %v3006_v8 = vadd.f32 (!%p3270_p7), %v6216_v11, %v2967_v22 }
 0x37e   : > { %v3489_v63 = vpop.f32.mrb[119].mxu1  ;;  %v3005_v42 = vadd.f32 (!%p3270_p7), %v6216_v11, %v2966_v32  ;;  %v2970_v30 = vld [vmem:[#allocation2 + $0x48] sm:$0xff] (!%p3270_p7)  ;;  %3034 = vst [vmem:[%s4270_s28 + $0x10] sm:$0xff] (!%p3270_p7), %v3002_v12  ;;  %3035 = vst [vmem:[%s4270_s28 + $0x18] sm:$0xff] (!%p3270_p7), %v3003_v4 }
 0x37f   : > { %v2871_v37 = vadd.f32 %v3487_v29, %v3375_v28  ;;  %v3490_v39 = vadd.f32 %v3489_v63, %v3488_v31  ;;  %v2968_v28 = vld [vmem:[#allocation2 + $0x38] sm:$0xff] (!%p3270_p7)  ;;  %v2969_v31 = vld [vmem:[#allocation2 + $0x40] sm:$0xff] (!%p3270_p7)  ;;  %3036 = vst [vmem:[%s4270_s28 + $0x20] sm:$0xff] (!%p3270_p7), %v3004_v53  ;;  %v3009_v63 = vadd.f32 (!%p3270_p7), %v6216_v11, %v2970_v30  ;;  %3038 = vst [vmem:[%s4270_s28 + $0x30] sm:$0xff] (!%p3270_p7), %v3006_v8 }
 0x380   : > { %v3007_v29 = vadd.f32 (!%p3270_p7), %v6216_v11, %v2968_v28  ;;  %3037 = vst [vmem:[%s4270_s28 + $0x28] sm:$0xff] (!%p3270_p7), %v3005_v42 }
 0x381   : > { %v2919_v47 = vadd.f32 %v2871_v37, %v2245_v23  ;;  %v2874_v2 = vadd.f32 %v3490_v39, %v3378_v35  ;;  %v3379_v21 = vpop.f32.mrb[120].mxu0  ;;  %v2971_v23 = vld [vmem:[#allocation2 + $0x50] sm:$0xff] (!%p3270_p7)  ;;  %v3008_v35 = vadd.f32 (!%p3270_p7), %v6216_v11, %v2969_v31  ;;  %v2972_v39 = vld [vmem:[#allocation2 + $0x58] sm:$0xff] (!%p3270_p7)  ;;  %3041 = vst [vmem:[%s4270_s28 + $0x48] sm:$0xff] (!%p3270_p7), %v3009_v63 }
 0x382   : > { %v3380_v19 = vpop.f32.mrb[121].mxu0  ;;  %v3010_v37 = vadd.f32 (!%p3270_p7), %v6216_v11, %v2971_v23  ;;  %3039 = vst [vmem:[%s4270_s28 + $0x38] sm:$0xff] (!%p3270_p7), %v3007_v29 }
 0x383   : > { %2951 = vst [vmem:[#allocation2 + $0xd0] sm:$0xff] %v2919_v47  ;;  %v2920_v16 = vadd.f32 %v2874_v2, %v2246_v51  ;;  %v3491_v14 = vpop.f32.mrb[120].mxu1  ;;  %v3381_v43 = vadd.f32 %v3380_v19, %v3379_v21  ;;  %v3382_v57 = vpop.f32.mrb[122].mxu0  ;;  %v2973_v51 = vld [vmem:[#allocation2 + $0x60] sm:$0xff] (!%p3270_p7)  ;;  %v2974_v47 = vld [vmem:[#allocation2 + $0x68] sm:$0xff] (!%p3270_p7)  ;;  %v3011_v2 = vadd.f32 (!%p3270_p7), %v6216_v11, %v2972_v39  ;;  %v2976_v19 = vld [vmem:[#allocation2 + $0x78] sm:$0xff] (!%p3270_p7) }
 0x384   : > { %v3492_v33 = vpop.f32.mrb[121].mxu1  ;;  %v3383_v26 = vpop.f32.mrb[123].mxu0  ;;  %v3012_v21 = vadd.f32 (!%p3270_p7), %v6216_v11, %v2973_v51  ;;  %3040 = vst [vmem:[%s4270_s28 + $0x40] sm:$0xff] (!%p3270_p7), %v3008_v35  ;;  %3042 = vst [vmem:[%s4270_s28 + $0x50] sm:$0xff] (!%p3270_p7), %v3010_v37 }
 0x385   : > { %2952 = vst [vmem:[#allocation2 + $0xd8] sm:$0xff] %v2920_v16  ;;  %v3493_v38 = vadd.f32 %v3492_v33, %v3491_v14  ;;  %v3494_v50 = vpop.f32.mrb[122].mxu1  ;;  %v3384_v25 = vadd.f32 %v3383_v26, %v3382_v57  ;;  %v3013_v16 = vadd.f32 (!%p3270_p7), %v6216_v11, %v2974_v47  ;;  %v2975_v14 = vld [vmem:[#allocation2 + $0x70] sm:$0xff] (!%p3270_p7)  ;;  %v3015_v57 = vadd.f32 (!%p3270_p7), %v6216_v11, %v2976_v19 }
 0x386   : > { %v3495_v44 = vpop.f32.mrb[123].mxu1  ;;  %v3014_v33 = vadd.f32 (!%p3270_p7), %v6216_v11, %v2975_v14  ;;  %v2979_v26 = vld [vmem:[#allocation2 + $0x90] sm:$0xff] (!%p3270_p7)  ;;  %3043 = vst [vmem:[%s4270_s28 + $0x58] sm:$0xff] (!%p3270_p7), %v3011_v2  ;;  %3044 = vst [vmem:[%s4270_s28 + $0x60] sm:$0xff] (!%p3270_p7), %v3012_v21 }
 0x387   : > { %v2879_v59 = vadd.f32 %v3493_v38, %v3381_v43  ;;  %v3496_v27 = vadd.f32 %v3495_v44, %v3494_v50  ;;  %v2977_v43 = vld [vmem:[#allocation2 + $0x80] sm:$0xff] (!%p3270_p7)  ;;  %v2978_v50 = vld [vmem:[#allocation2 + $0x88] sm:$0xff] (!%p3270_p7)  ;;  %3045 = vst [vmem:[%s4270_s28 + $0x68] sm:$0xff] (!%p3270_p7), %v3013_v16  ;;  %v3018_v44 = vadd.f32 (!%p3270_p7), %v6216_v11, %v2979_v26  ;;  %3047 = vst [vmem:[%s4270_s28 + $0x78] sm:$0xff] (!%p3270_p7), %v3015_v57 }
 0x388   : > { %v3016_v38 = vadd.f32 (!%p3270_p7), %v6216_v11, %v2977_v43  ;;  %3046 = vst [vmem:[%s4270_s28 + $0x70] sm:$0xff] (!%p3270_p7), %v3014_v33 }
 0x389   : > { %v2921_v7 = vadd.f32 %v2879_v59, %v2247_v3  ;;  %v2882_v1 = vadd.f32 %v3496_v27, %v3384_v25  ;;  %v3385_v36 = vpop.f32.mrb[124].mxu0  ;;  %v2980_v3 = vld [vmem:[#allocation2 + $0x98] sm:$0xff] (!%p3270_p7)  ;;  %v3017_v25 = vadd.f32 (!%p3270_p7), %v6216_v11, %v2978_v50  ;;  %v2981_v27 = vld [vmem:[#allocation2 + $0xa0] sm:$0xff] (!%p3270_p7)  ;;  %3050 = vst [vmem:[%s4270_s28 + $0x90] sm:$0xff] (!%p3270_p7), %v3018_v44 }
 0x38a   : > { %v3386_v41 = vpop.f32.mrb[125].mxu0  ;;  %v3019_v59 = vadd.f32 (!%p3270_p7), %v6216_v11, %v2980_v3  ;;  %3048 = vst [vmem:[%s4270_s28 + $0x80] sm:$0xff] (!%p3270_p7), %v3016_v38 }
 0x38b   : > { %2953 = vst [vmem:[#allocation2 + $0xe0] sm:$0xff] %v2921_v7  ;;  %v2922_v46 = vadd.f32 %v2882_v1, %v2248_v20  ;;  %v3497_v34 = vpop.f32.mrb[124].mxu1  ;;  %v3387_v54 = vadd.f32 %v3386_v41, %v3385_v36  ;;  %v3388_v62 = vpop.f32.mrb[126].mxu0  ;;  %v2982_v20 = vld [vmem:[#allocation2 + $0xa8] sm:$0xff] (!%p3270_p7)  ;;  %v2983_v7 = vld [vmem:[#allocation2 + $0xb0] sm:$0xff] (!%p3270_p7)  ;;  %v3020_v1 = vadd.f32 (!%p3270_p7), %v6216_v11, %v2981_v27  ;;  %v2985_v41 = vld [vmem:[#allocation2 + $0xc0] sm:$0xff] (!%p3270_p7) }
 0x38c   : > { %v3498_v0 = vpop.f32.mrb[125].mxu1  ;;  %v3389_v49 = vpop.f32.mrb[127].mxu0  ;;  %v3021_v36 = vadd.f32 (!%p3270_p7), %v6216_v11, %v2982_v20  ;;  %3049 = vst [vmem:[%s4270_s28 + $0x88] sm:$0xff] (!%p3270_p7), %v3017_v25  ;;  %3051 = vst [vmem:[%s4270_s28 + $0x98] sm:$0xff] (!%p3270_p7), %v3019_v59 }
 0x38d   : > { %2954 = vst [vmem:[#allocation2 + $0xe8] sm:$0xff] %v2922_v46  ;;  %v3499_v17 = vadd.f32 %v3498_v0, %v3497_v34  ;;  %v3500_v40 = vpop.f32.mrb[126].mxu1  ;;  %v3390_v6 = vadd.f32 %v3389_v49, %v3388_v62  ;;  %v3022_v46 = vadd.f32 (!%p3270_p7), %v6216_v11, %v2983_v7  ;;  %v2984_v34 = vld [vmem:[#allocation2 + $0xb8] sm:$0xff] (!%p3270_p7)  ;;  %v3024_v62 = vadd.f32 (!%p3270_p7), %v6216_v11, %v2985_v41 }
 0x38e   : > { %v3501_v61 = vpop.f32.mrb[127].mxu1  ;;  %v3023_v0 = vadd.f32 (!%p3270_p7), %v6216_v11, %v2984_v34  ;;  %v2988_v49 = vld [vmem:[#allocation2 + $0xd8] sm:$0xff] (!%p3270_p7)  ;;  %3052 = vst [vmem:[%s4270_s28 + $0xa0] sm:$0xff] (!%p3270_p7), %v3020_v1  ;;  %3053 = vst [vmem:[%s4270_s28 + $0xa8] sm:$0xff] (!%p3270_p7), %v3021_v36 }
 0x38f   : > { %v2887_v58 = vadd.f32 %v3499_v17, %v3387_v54  ;;  %v3502_v13 = vadd.f32 %v3501_v61, %v3500_v40  ;;  %2960 = sbr.rel (%p3270_p7) target bundleno = 928 (0x3a0), region = 71  ;;  %v2986_v54 = vld [vmem:[#allocation2 + $0xc8] sm:$0xff] (!%p3270_p7)  ;;  %v2987_v40 = vld [vmem:[#allocation2 + $0xd0] sm:$0xff] (!%p3270_p7)  ;;  %3054 = vst [vmem:[%s4270_s28 + $0xb0] sm:$0xff] (!%p3270_p7), %v3022_v46  ;;  %v3027_v61 = vadd.f32 (!%p3270_p7), %v6216_v11, %v2988_v49  ;;  %3056 = vst [vmem:[%s4270_s28 + $0xc0] sm:$0xff] (!%p3270_p7), %v3024_v62 }
 0x390   : > { %v3025_v17 = vadd.f32 (!%p3270_p7), %v6216_v11, %v2986_v54  ;;  %3055 = vst [vmem:[%s4270_s28 + $0xb8] sm:$0xff] (!%p3270_p7), %v3023_v0 }
 0x391   : > { %v2923_v10 = vadd.f32 %v2887_v58, %v2249_v9  ;;  %v2890_v60 = vadd.f32 %v3502_v13, %v3390_v6  ;;  %v3026_v6 = vadd.f32 (!%p3270_p7), %v6216_v11, %v2987_v40  ;;  %3059 = vst [vmem:[%s4270_s28 + $0xd8] sm:$0xff] (!%p3270_p7), %v3027_v61 }
 0x392   : > { %v2989_v9 = vld [vmem:[#allocation2 + $0xe0] sm:$0xff] (!%p3270_p7)  ;;  %3057 = vst [vmem:[%s4270_s28 + $0xc8] sm:$0xff] (!%p3270_p7), %v3025_v17 }
 0x393   : > { %2955 = vst [vmem:[#allocation2 + $0xf0] sm:$0xff] %v2923_v10  ;;  %v2924_v18 = vadd.f32 %v2890_v60, %v2250_v24  ;;  %v3028_v58 = vadd.f32 (!%p3270_p7), %v6216_v11, %v2989_v9  ;;  %3058 = vst [vmem:[%s4270_s28 + $0xd0] sm:$0xff] (!%p3270_p7), %v3026_v6 }
 0x394   : > { %v2990_v13 = vld [vmem:[#allocation2 + $0xe8] sm:$0xff] (!%p3270_p7) }
 0x395   : > { %2956 = vst [vmem:[#allocation2 + $0xf8] sm:$0xff] %v2924_v18  ;;  %v3029_v60 = vadd.f32 (!%p3270_p7), %v6216_v11, %v2990_v13  ;;  %3060 = vst [vmem:[%s4270_s28 + $0xe0] sm:$0xff] (!%p3270_p7), %v3028_v58 }
 0x397   : > { %3061 = vst [vmem:[%s4270_s28 + $0xe8] sm:$0xff] %v3029_v60 }
 0x39a   : > { %v2991_v24 = vld [vmem:[#allocation2 + $0xf0] sm:$0xff] }
 0x39b   : > { %v3030_v18 = vadd.f32 %v6216_v11, %v2991_v24 }
 0x39c   : > { %v2992_v10 = vld [vmem:[#allocation2 + $0xf8] sm:$0xff] }
 0x39d   : > { %v3031_v15 = vadd.f32 %v6216_v11, %v2992_v10  ;;  %3062 = vst [vmem:[%s4270_s28 + $0xf0] sm:$0xff] %v3030_v18 }
 0x39f   : > { %3063 = vst [vmem:[%s4270_s28 + $0xf8] sm:$0xff] %v3031_v15 }
 0x3a0 PF: > { %s3278_s23 = sshll.u32 %s4028_s24, 12  ;;  %s3078_s12 = sshll.u32 %s4270_s28, 4  ;;  %s6289_s12 = int_to_ptr.vmem [resolvable:$true] %s3078_s12 }
 0x3a1   : > { %s6286_s11 = scalar_lea.hbm %s6356_s5, %s3278_s23  ;;  %s6852_s16 = sand.u32 1, %s4008_s19  }
 0x3a2   : > { %s6293_s17 = scalar_lea.sflag [#allocation5], %s6852_s16  ;;  %s3930_s7 = scalar_lea.vmem %s6289_s12, 4096 }
 0x3a3   : > { %p3931_p8 = scmp.ne.s32.totalorder %s6289_s12, %s3930_s7  ;;  %s4044_s24 = smov [#allocation4]  }
 0x3a4   : > { %s3934_s8 = sshll.u32 %s4044_s24, 4  ;;  %s3935_s8 = int_to_ptr.vmem [resolvable:$false] %s3934_s8 }
 0x3a5   : > { %p3932_p9 = pnand %p3931_p8, %p4156_p10  ;;  %s3936_s29 = scalar_lea.vmem %s3935_s8, 8192 }
 0x3a6   : > { %p3937_p13 = scmp.lt.s32.totalorder %s6289_s12, %s3935_s8  ;;  %p3938_p0 = scmp.lt.s32.totalorder %s3936_s29, %s3930_s7 }
 0x3a7   : > { %p3933_p11 = pneg %p3932_p9 }
 0x3a8   : > { %p3939_p1 = por %p3938_p0, %p3937_p13 }
 0x3aa   : > { %p3940_p2 = pnand %p3939_p1, %p3933_p11 }
 0x3ac   : > { %3943 = shalt.err (!%p3940_p2)
}
 0x3ad   : > { %s3944_s9 = scalar_lea.hbm %s6286_s11, 4096  ;;  %s3948_s28 = scalar_lea.hbm %s6356_s5, 16384 }
 0x3ae   : > { %p3945_p3 = scmp.ne.s32.totalorder %s6286_s11, %s3944_s9  ;;  %p3949_p6 = scmp.lt.u32.totalorder %s6286_s11, %s6356_s5 }
 0x3af   : > { %p3950_p7 = scmp.lt.u32.totalorder %s3948_s28, %s3944_s9  ;;  %p3952_p9 = scmp.lt.u32.totalorder %s3944_s9, %s6286_s11 }
 0x3b0   : > { %p3946_p4 = pnand %p3945_p3, %p4156_p10 }
 0x3b1   : > { %p3951_p8 = por %p3950_p7, %p3949_p6 }
 0x3b2   : > { %p3947_p5 = pneg %p3946_p4 }
 0x3b3   : > { %p3953_p11 = por %p3952_p9, %p3951_p8 }
 0x3b5   : > { %p3954_p13 = pnand %p3953_p11, %p3947_p5 }
 0x3b7   : > { %3957 = shalt.err (!%p3954_p13)
}
 0x3b8   : > { %s4045_s25 = smov 128   ;;  %s4046_s26 = smov 8  }
 0x3b9   : > { %3503 = dma.vmem_to_hbm [thread:$0]  (%p4156_p10), %s6289_s12, 4096, %s6286_s11, %s6293_s17, %s4045_s25, %s4045_s25, %s4046_s26  }
 0x3ba PF: > { %p3509_p0 = scmp.ge.s32.totalorder %s4040_s27, 2  ;;  %s3093_s23 = sand.u32 1, %s4004_s18  }
 0x3bb   : > { %s3094_s30 = scalar_lea.sflag [#allocation5], %s3093_s23 }
 0x3bc   : > { %p3506_p1 = pnand %p3509_p0, %p4163_p12 }
 0x3be   : > { %3999 = dma.done.wait (!%p3506_p1), %s3094_s30, 4096  }
 0x3bf   : > { %4001 = vsyncadd (!%p3506_p1), %s3094_s30, 4294963200  ;;  %s18_s27 = sadd.s32 1, %s4040_s27   ;;  %s6853_s21 = sld [smem:[#allocation7_spill]] }
 0x3c0   : > { %p15_p2 = scmp.ge.s32.totalorder %s18_s27, 10   ;;  %s6854_s22 = sld [smem:[#allocation12_spill]] }
 0x3c1   : > { %s6855_s23 = sld [smem:[#allocation8_spill]]  ;;  %s6856_s24 = sld [smem:[#allocation9_spill]] }
 0x3c2   : > { %s6857_s25 = sld [smem:[#allocation10_spill]]  ;;  %s6858_s26 = sld [smem:[#allocation11_spill]] }
 0x3c3   : > { %s6859_s18 = smov %s4008_s19  ;;  %s6860_s19 = smov %s4012_s20 }
 0x3c4   : > { %s6861_s20 = smov %s4161_s14  ;;  %17 = sbr.rel (!%p15_p2) target bundleno = 8 (0x8), region = 120 }
 0x3cb   :  { %3099 = vsyncpa [#allocation5], 1 }
 0x3cc   :  { %3101 = vsyncpa [#allocation5 + $0x1], 1 }

</bundles_post_ra>
